<compile_context>
chip_gen: v6e
topology: v6e:2x2x1
jax: 0.10.0
libtpu: 0.0.40
codegen_flags: <defaults>
</compile_context>

<pallas_src>
import jax
import jax.numpy as jnp
from jax.experimental import pallas as pl
from jax.experimental.pallas import tpu as pltpu

IN_DIM = 784   # 1 * 28 * 28
H1_DIM = 512
H2_DIM = 256


def _round_up(x, m):
    return ((x + m - 1) // m) * m


def _stable_sigmoid(h):
    # Numerically stable sigmoid with a single reciprocal (exact, not approx).
    t = jnp.exp(-jnp.abs(h))
    inv = 1.0 / (1.0 + t)
    return jnp.where(h >= 0, inv, t * inv)


def _discriminator_kernel(x_ref, w1_ref, b1_ref, w2_ref, b2_ref,
                          w3_ref, b3_ref, o_ref):
    # x arrives as f32; cast to bf16 here on the VPU (hidden under MXU work).
    x = x_ref[...].astype(jnp.bfloat16)                                # (TM, 784)

    h1 = jnp.dot(x, w1_ref[...],
                 preferred_element_type=jnp.float32) + b1_ref[...]     # (TM, 512) f32
    h1 = jnp.maximum(h1, 0.2 * h1)                                     # LeakyReLU(0.2)

    h2 = jnp.dot(h1.astype(jnp.bfloat16), w2_ref[...],
                 preferred_element_type=jnp.float32) + b2_ref[...]     # (TM, 256) f32
    h2 = jnp.maximum(h2, 0.2 * h2)                                     # LeakyReLU(0.2)

    # Layer 3 (256 -> 1): VPU multiply + XLU lane reduce against the single
    # real weight column (no padded N=128 MXU pass, no padded writeback).
    h3 = jnp.sum(h2 * w3_ref[...], axis=-1, keepdims=True) + b3_ref[...]  # (TM, 1)
    o_ref[...] = _stable_sigmoid(h3)                                   # Sigmoid


def discriminator_forward(img, kernel_params, *, tm=512):
    """img: (B, 1, 28, 28) float32 -> (B, 1) float32."""
    w1, b1, w2, b2, w3r, b3r = kernel_params
    B = img.shape[0]
    x = img.reshape(B, -1)                       # (B, 784) f32, no wrapper astype

    # Batch tile: multiple of 128 lanes, big enough to amortize the ~0.35us
    # per-grid-step overhead, but split into >=2 steps when the batch allows
    # it so both v7x TensorCores get work.
    tm = max(128, min(tm, _round_up(B, 128)))
    if B > 128:
        tm = max(128, min(tm, _round_up(pl.cdiv(B, 2), 128)))

    rows = B
    if rows < tm:                                # tiny batches: cheap zero pad
        x = jnp.pad(x, ((0, tm - rows), (0, 0)))
        rows = tm
    # For rows % tm != 0 the ragged last block is handled by Pallas boundary
    # padding; garbage tail rows never mix across rows and are sliced away.

    grid = (pl.cdiv(rows, tm),)

    cost = pl.CostEstimate(
        flops=2 * rows * (IN_DIM * H1_DIM + H1_DIM * H2_DIM + H2_DIM),
        transcendentals=rows,
        bytes_accessed=rows * (IN_DIM * 4 + 4)
        + 2 * (IN_DIM * H1_DIM + H1_DIM * H2_DIM)
        + 4 * (H1_DIM + 2 * H2_DIM + 2),
    )

    out = pl.pallas_call(
        _discriminator_kernel,
        out_shape=jax.ShapeDtypeStruct((rows, 1), jnp.float32),
        grid=grid,
        in_specs=[
            pl.BlockSpec((tm, IN_DIM), lambda i: (i, 0)),       # x tile (f32)
            pl.BlockSpec((IN_DIM, H1_DIM), lambda i: (0, 0)),   # w1 bf16 (resident)
            pl.BlockSpec((1, H1_DIM), lambda i: (0, 0)),        # b1 f32
            pl.BlockSpec((H1_DIM, H2_DIM), lambda i: (0, 0)),   # w2 bf16 (resident)
            pl.BlockSpec((1, H2_DIM), lambda i: (0, 0)),        # b2 f32
            pl.BlockSpec((1, H2_DIM), lambda i: (0, 0)),        # w3 row (f32)
            pl.BlockSpec((1, 1), lambda i: (0, 0)),             # b3 f32
        ],
        out_specs=pl.BlockSpec((tm, 1), lambda i: (i, 0)),      # 4 B/sample writeback
        compiler_params=pltpu.CompilerParams(
            dimension_semantics=("parallel",)),
        cost_estimate=cost,
    )(x, w1, b1, w2, b2, w3r, b3r)

    return out[:B]


def init_params(key):
    """Logical f32 params mimicking torch.nn.Linear init (U[-1/sqrt(fan_in), +])."""
    dims = [(IN_DIM, H1_DIM), (H1_DIM, H2_DIM), (H2_DIM, 1)]
    params = []
    for i, (fan_in, fan_out) in enumerate(dims):
        kw, kb = jax.random.split(jax.random.fold_in(key, i))
        bound = 1.0 / jnp.sqrt(fan_in)
        w = jax.random.uniform(kw, (fan_in, fan_out), jnp.float32, -bound, bound)
        b = jax.random.uniform(kb, (1, fan_out), jnp.float32, -bound, bound)
        params += [w, b]
    return tuple(params)


def prepare_kernel_params(params):
    """Kernel storage: bf16 matmul weights, f32 biases, w3 as a lane-dense (1,256) row."""
    w1, b1, w2, b2, w3, b3 = params
    return (w1.astype(jnp.bfloat16), b1,
            w2.astype(jnp.bfloat16), b2,
            w3.reshape(1, H2_DIM).astype(jnp.float32),
            b3.reshape(1, 1).astype(jnp.float32))


def reference_forward(img, params):
    """Pure-JAX reference with the same bf16 matmul inputs / f32 accumulation."""
    w1, b1, w2, b2, w3, b3 = params
    x = img.reshape(img.shape[0], -1).astype(jnp.bfloat16)
    h1 = jnp.dot(x, w1.astype(jnp.bfloat16),
                 preferred_element_type=jnp.float32) + b1
    h1 = jnp.maximum(h1, 0.2 * h1)
    h2 = jnp.dot(h1.astype(jnp.bfloat16), w2.astype(jnp.bfloat16),
                 preferred_element_type=jnp.float32) + b2
    h2 = jnp.maximum(h2, 0.2 * h2)
    h3 = jnp.dot(h2, w3) + b3          # f32 last layer, matches kernel math
    return _stable_sigmoid(h3)


if __name__ == "__main__":
    key = jax.random.PRNGKey(0)
    k_img, k_par = jax.random.split(key)

    B = 8
    img = jax.random.normal(k_img, (B, 1, 28, 28), jnp.float32)
    params = init_params(k_par)
    kernel_params = prepare_kernel_params(params)

    out = discriminator_forward(img, kernel_params)
    out = jax.block_until_ready(out)

    ref = reference_forward(img, params)
    assert out.shape == (B, 1), out.shape
    assert jnp.allclose(out, ref, atol=1e-5, rtol=1e-4), "mismatch vs reference"

    print("KERNEL_OK")
</pallas_src>

<mosaic_0001>
module attributes {stable_mosaic.version = 11 : i64} {
  func.func @_discriminator_kernel(%arg0: i32, %arg1: memref<128x784xf32, #tpu.memory_space<vmem>>, %arg2: memref<784x512xbf16, #tpu.memory_space<vmem>>, %arg3: memref<1x512xf32, #tpu.memory_space<vmem>>, %arg4: memref<512x256xbf16, #tpu.memory_space<vmem>>, %arg5: memref<1x256xf32, #tpu.memory_space<vmem>>, %arg6: memref<1x256xf32, #tpu.memory_space<vmem>>, %arg7: memref<1x1xf32, #tpu.memory_space<vmem>>, %arg8: memref<128x1xf32, #tpu.memory_space<vmem>>) attributes {dimension_semantics = [#tpu.dimension_semantics<parallel>], iteration_bounds = array<i64: 1>, scalar_prefetch = 0 : i64, scratch_operands = 0 : i64, tpu.core_type = #tpu.core_type<tc>, window_params = [{transform_indices = @transform_0, window_bounds = array<i64: 128, 784>}, {pipeline_mode = #tpu.pipeline_mode<synchronous>, transform_indices = @transform_1, window_bounds = array<i64: 784, 512>}, {pipeline_mode = #tpu.pipeline_mode<synchronous>, transform_indices = @transform_2, window_bounds = array<i64: 1, 512>}, {pipeline_mode = #tpu.pipeline_mode<synchronous>, transform_indices = @transform_3, window_bounds = array<i64: 512, 256>}, {pipeline_mode = #tpu.pipeline_mode<synchronous>, transform_indices = @transform_4, window_bounds = array<i64: 1, 256>}, {pipeline_mode = #tpu.pipeline_mode<synchronous>, transform_indices = @transform_5, window_bounds = array<i64: 1, 256>}, {pipeline_mode = #tpu.pipeline_mode<synchronous>, transform_indices = @transform_6, window_bounds = array<i64: 1, 1>}, {transform_indices = @transform_7, window_bounds = array<i64: 128, 1>}]} {
    %c0 = arith.constant 0 : index
    %c0_0 = arith.constant 0 : index
    %0 = vector.load %arg1[%c0, %c0_0] : memref<128x784xf32, #tpu.memory_space<vmem>>, vector<128x784xf32>
    %1 = arith.truncf %0 : vector<128x784xf32> to vector<128x784xbf16>
    %c0_1 = arith.constant 0 : index
    %c0_2 = arith.constant 0 : index
    %2 = vector.load %arg2[%c0_1, %c0_2] : memref<784x512xbf16, #tpu.memory_space<vmem>>, vector<784x512xbf16>
    %cst = arith.constant dense<0.000000e+00> : vector<128x512xf32>
    %3 = tpu.matmul %1, %2, %cst {dimension_numbers = #tpu.dot_dimension_numbers<[1], [0], [0], [1], [0, 0, 1, 1], [], []>} : vector<128x784xbf16>, vector<784x512xbf16>, vector<128x512xf32> -> vector<128x512xf32>
    %c0_3 = arith.constant 0 : index
    %c0_4 = arith.constant 0 : index
    %4 = vector.load %arg3[%c0_3, %c0_4] : memref<1x512xf32, #tpu.memory_space<vmem>>, vector<1x512xf32>
    %5 = vector.broadcast %4 : vector<1x512xf32> to vector<128x512xf32>
    %6 = arith.addf %3, %5 : vector<128x512xf32>
    %cst_5 = arith.constant 2.000000e-01 : f32
    %7 = vector.broadcast %cst_5 : f32 to vector<128x512xf32>
    %8 = arith.mulf %7, %6 : vector<128x512xf32>
    %9 = arith.maximumf %6, %8 : vector<128x512xf32>
    %10 = arith.truncf %9 : vector<128x512xf32> to vector<128x512xbf16>
    %c0_6 = arith.constant 0 : index
    %c0_7 = arith.constant 0 : index
    %11 = vector.load %arg4[%c0_6, %c0_7] : memref<512x256xbf16, #tpu.memory_space<vmem>>, vector<512x256xbf16>
    %cst_8 = arith.constant dense<0.000000e+00> : vector<128x256xf32>
    %12 = tpu.matmul %10, %11, %cst_8 {dimension_numbers = #tpu.dot_dimension_numbers<[1], [0], [0], [1], [0, 0, 1, 1], [], []>} : vector<128x512xbf16>, vector<512x256xbf16>, vector<128x256xf32> -> vector<128x256xf32>
    %c0_9 = arith.constant 0 : index
    %c0_10 = arith.constant 0 : index
    %13 = vector.load %arg5[%c0_9, %c0_10] : memref<1x256xf32, #tpu.memory_space<vmem>>, vector<1x256xf32>
    %14 = vector.broadcast %13 : vector<1x256xf32> to vector<128x256xf32>
    %15 = arith.addf %12, %14 : vector<128x256xf32>
    %cst_11 = arith.constant 2.000000e-01 : f32
    %16 = vector.broadcast %cst_11 : f32 to vector<128x256xf32>
    %17 = arith.mulf %16, %15 : vector<128x256xf32>
    %18 = arith.maximumf %15, %17 : vector<128x256xf32>
    %c0_12 = arith.constant 0 : index
    %c0_13 = arith.constant 0 : index
    %19 = vector.load %arg6[%c0_12, %c0_13] : memref<1x256xf32, #tpu.memory_space<vmem>>, vector<1x256xf32>
    %20 = vector.broadcast %19 : vector<1x256xf32> to vector<128x256xf32>
    %21 = arith.mulf %18, %20 : vector<128x256xf32>
    %cst_14 = arith.constant dense<0.000000e+00> : vector<128xf32>
    %22 = vector.multi_reduction <add>, %21, %cst_14 [1] : vector<128x256xf32> to vector<128xf32>
    %23 = vector.shape_cast %22 : vector<128xf32> to vector<128x1xf32>
    %c0_15 = arith.constant 0 : index
    %c0_16 = arith.constant 0 : index
    %24 = vector.load %arg7[%c0_15, %c0_16] : memref<1x1xf32, #tpu.memory_space<vmem>>, vector<1x1xf32>
    %25 = vector.broadcast %24 : vector<1x1xf32> to vector<128x1xf32>
    %26 = arith.addf %23, %25 : vector<128x1xf32>
    %27 = math.absf %26 : vector<128x1xf32>
    %cst_17 = arith.constant 0.000000e+00 : f32
    %28 = vector.broadcast %cst_17 : f32 to vector<128x1xf32>
    %29 = arith.subf %28, %27 : vector<128x1xf32>
    %30 = math.exp %29 : vector<128x1xf32>
    %cst_18 = arith.constant 1.000000e+00 : f32
    %31 = vector.broadcast %cst_18 : f32 to vector<128x1xf32>
    %32 = arith.addf %31, %30 : vector<128x1xf32>
    %cst_19 = arith.constant 1.000000e+00 : f32
    %33 = vector.broadcast %cst_19 : f32 to vector<128x1xf32>
    %34 = arith.divf %33, %32 : vector<128x1xf32>
    %cst_20 = arith.constant 0.000000e+00 : f32
    %35 = vector.broadcast %cst_20 : f32 to vector<128x1xf32>
    %36 = arith.cmpf oge, %26, %35 : vector<128x1xf32>
    %37 = arith.mulf %30, %34 : vector<128x1xf32>
    %38 = arith.select %36, %34, %37 : vector<128x1xi1>, vector<128x1xf32>
    %c0_21 = arith.constant 0 : index
    %c0_22 = arith.constant 0 : index
    %39 = vector.load %arg8[%c0_21, %c0_22] : memref<128x1xf32, #tpu.memory_space<vmem>>, vector<128x1xf32>
    tpu.vector_store %arg8[%c0_21, %c0_22], %38 {strides = array<i32>} : memref<128x1xf32, #tpu.memory_space<vmem>>, vector<128x1xf32>,
    return
  }
  func.func @transform_0(%arg0: i32) -> (i32, i32) {
    %c0_i32 = arith.constant 0 : i32
    %c0_i32_0 = arith.constant 0 : i32
    return %arg0, %c0_i32 : i32, i32
  }
  func.func @transform_1(%arg0: i32) -> (i32, i32) {
    %c0_i32 = arith.constant 0 : i32
    %c0_i32_0 = arith.constant 0 : i32
    %c0_i32_1 = arith.constant 0 : i32
    return %c0_i32, %c0_i32_0 : i32, i32
  }
  func.func @transform_2(%arg0: i32) -> (i32, i32) {
    %c0_i32 = arith.constant 0 : i32
    %c0_i32_0 = arith.constant 0 : i32
    %c0_i32_1 = arith.constant 0 : i32
    return %c0_i32, %c0_i32_0 : i32, i32
  }
  func.func @transform_3(%arg0: i32) -> (i32, i32) {
    %c0_i32 = arith.constant 0 : i32
    %c0_i32_0 = arith.constant 0 : i32
    %c0_i32_1 = arith.constant 0 : i32
    return %c0_i32, %c0_i32_0 : i32, i32
  }
  func.func @transform_4(%arg0: i32) -> (i32, i32) {
    %c0_i32 = arith.constant 0 : i32
    %c0_i32_0 = arith.constant 0 : i32
    %c0_i32_1 = arith.constant 0 : i32
    return %c0_i32, %c0_i32_0 : i32, i32
  }
  func.func @transform_5(%arg0: i32) -> (i32, i32) {
    %c0_i32 = arith.constant 0 : i32
    %c0_i32_0 = arith.constant 0 : i32
    %c0_i32_1 = arith.constant 0 : i32
    return %c0_i32, %c0_i32_0 : i32, i32
  }
  func.func @transform_6(%arg0: i32) -> (i32, i32) {
    %c0_i32 = arith.constant 0 : i32
    %c0_i32_0 = arith.constant 0 : i32
    %c0_i32_1 = arith.constant 0 : i32
    return %c0_i32, %c0_i32_0 : i32, i32
  }
  func.func @transform_7(%arg0: i32) -> (i32, i32) {
    %c0_i32 = arith.constant 0 : i32
    %c0_i32_0 = arith.constant 0 : i32
    return %arg0, %c0_i32 : i32, i32
  }
}

</mosaic_0001>

<bundles_post_ra>
// kernel: tpu_custom_call.1
= control target key start
LH: loop header
LB: loop body
LE: loop exit
PB: predicated region body
PF: predicated region fallthrough
CT: control target
= control target key end

     0   :  { %s6083_s0 = inlined_call_operand.vmem [shape: f32[128,784], index: 0, kind: input, shape index: {}]   ;;  %s6084_s1 = inlined_call_operand.vmem [shape: bf16[784,512], index: 1, kind: input, shape index: {}]   ;;  %s6085_s2 = inlined_call_operand.vmem [shape: f32[1,512], index: 2, kind: input, shape index: {}]   ;;  %s6086_s3 = inlined_call_operand.hbm [shape: bf16[512,256], index: 3, kind: input, shape index: {}]   ;;  %s6087_s4 = inlined_call_operand.vmem [shape: f32[1,256], index: 4, kind: input, shape index: {}]   ;;  %s6088_s5 = inlined_call_operand.vmem [shape: f32[1,256], index: 5, kind: input, shape index: {}]   ;;  %s6089_s6 = inlined_call_operand.<no memory space> [shape: f32[1,1], index: 6, kind: input, shape index: {}]   ;;  %s6090_s7 = inlined_call_operand.vmem [shape: f32[128,1], index: 7, kind: output, shape index: {}]  }
   0x1   :  { %v12_v0 = vstv %s6089_s6 }
   0x2   :  { %13 = vst [vmem:[#allocation2] sm:$0x1] %v12_v0 }
   0x3   :  { %14 = vsyncpa [#allocation4], 0  ;;  %s4238_s26 = smov [#allocation3]  }
   0x4   :  { %s26_s27 = sshll.u32 %s4238_s26, 4  ;;  %s27_s27 = int_to_ptr.vmem [resolvable:$true] %s26_s27 }
   0x5   :  { %s4224_s28 = scalar_lea.vmem %s27_s27, 8192  ;;  %p4229_p1 = scmp.lt.s32.totalorder %s27_s27, %s27_s27 }
   0x6   :  { %p4225_p0 = scmp.ne.s32.totalorder %s27_s27, %s4224_s28  ;;  %p4230_p2 = scmp.lt.s32.totalorder %s4224_s28, %s4224_s28 }
   0x8   :  { %p4231_p3 = por %p4230_p2, %p4229_p1 }
   0xa   :  { %p4232_p4 = pnand %p4231_p3, %p4225_p0 }
   0xc   :  { %4235 = shalt.err (!%p4232_p4)
}
   0xd   :  { %s4239_s29 = smov 128   ;;  %s4240_s30 = smov 8  }
   0xe   :  { %32 = dma.hbm_to_vmem [thread:$0]  %s6086_s3, 8192, %s27_s27, [#allocation4], %s4239_s29, %s4239_s29, %s4240_s30  }
   0xf   :  { %4236 = dma.done.wait [#allocation4], 8192  }
  0x10   :  { %4237 = vsyncadd [#allocation4], 4294959104  ;;  %v3762_v1 = vld [vmem:[%s6084_s1 + $0xe4] ss:$16 sps:$4 sm:$0xff]   ;;  %v3766_v3 = vld [vmem:[%s6084_s1 + $0xe0] ss:$16 sps:$4 sm:$0xff]  }
  0x11   :  { %v3764_v2 = vld [vmem:[%s6084_s1 + $0x2e4] ss:$16 sps:$4 sm:$0xff]   ;;  %1434 = vmatprep.subr.bf16.mxu0 %v3762_v1  ;;  %v3767_v4 = vld [vmem:[%s6084_s1 + $0x2e0] ss:$16 sps:$4 sm:$0xff]   ;;  %v44_v47 = vld [vmem:[%s6083_s0 + $0x8] sm:$0xff]  ;;  %vm1409_vm0 = vcmask 130048  }
  0x12   :  { %1547 = vmatprep.subr.bf16.mxu1 %v3764_v2  ;;  %v3768_v5 = vld [vmem:[%s6084_s1 + $0xc4] ss:$16 sps:$4 sm:$0xff]   ;;  %1435 = vmatpush1.bf16.msra.mxu0 %v3766_v3  ;;  %v3772_v7 = vld [vmem:[%s6084_s1 + $0xc0] ss:$16 sps:$4 sm:$0xff]   ;;  %v46_v49 = vld [vmem:[%s6083_s0 + $0x18] sm:$0xff]  ;;  %vm3459_vm1 = vcmask 7168  }
  0x13   :  { %1548 = vmatpush1.bf16.msra.mxu1 %v3767_v4  ;;  %v3770_v6 = vld [vmem:[%s6084_s1 + $0x2c4] ss:$16 sps:$4 sm:$0xff]   ;;  %1436 = vmatprep.subr.bf16.mxu0 %v3768_v5  ;;  %v3773_v8 = vld [vmem:[%s6084_s1 + $0x2c0] ss:$16 sps:$4 sm:$0xff]  }
  0x14   :  { %1549 = vmatprep.subr.bf16.mxu1 %v3770_v6  ;;  %v3774_v9 = vld [vmem:[%s6084_s1 + $0xa4] ss:$16 sps:$4 sm:$0xff]   ;;  %v3778_v11 = vld [vmem:[%s6084_s1 + $0xa0] ss:$16 sps:$4 sm:$0xff]  }
  0x15   :  { %v3776_v10 = vld [vmem:[%s6084_s1 + $0x2a4] ss:$16 sps:$4 sm:$0xff]   ;;  %v3779_v12 = vld [vmem:[%s6084_s1 + $0x2a0] ss:$16 sps:$4 sm:$0xff]  }
  0x16   :  { %1437 = vmatpush1.bf16.msra.mxu0 %v3772_v7  ;;  %v3780_v13 = vld [vmem:[%s6084_s1 + $0x84] ss:$16 sps:$4 sm:$0xff]   ;;  %v3784_v15 = vld [vmem:[%s6084_s1 + $0x80] ss:$16 sps:$4 sm:$0xff]  }
  0x17   :  { %1550 = vmatpush1.bf16.msra.mxu1 %v3773_v8  ;;  %1438 = vmatprep.subr.bf16.mxu0 %v3774_v9  ;;  %v3782_v14 = vld [vmem:[%s6084_s1 + $0x284] ss:$16 sps:$4 sm:$0xff]   ;;  %v3785_v16 = vld [vmem:[%s6084_s1 + $0x280] ss:$16 sps:$4 sm:$0xff]   ;;  %v50_v8 = vld [vmem:[%s6083_s0 + $0x38] sm:$0xff] }
  0x18   :  { %1551 = vmatprep.subr.bf16.mxu1 %v3776_v10  ;;  %v3786_v17 = vld [vmem:[%s6084_s1 + $0x64] ss:$16 sps:$4 sm:$0xff]   ;;  %v3790_v19 = vld [vmem:[%s6084_s1 + $0x60] ss:$16 sps:$4 sm:$0xff]   ;;  %v52_v10 = vld [vmem:[%s6083_s0 + $0x48] sm:$0xff] }
  0x19   :  { %v3788_v18 = vld [vmem:[%s6084_s1 + $0x264] ss:$16 sps:$4 sm:$0xff]   ;;  %v3791_v20 = vld [vmem:[%s6084_s1 + $0x260] ss:$16 sps:$4 sm:$0xff]  }
  0x1a   :  { %1439 = vmatpush1.bf16.msra.mxu0 %v3778_v11  ;;  %v3792_v21 = vld [vmem:[%s6084_s1 + $0x44] ss:$16 sps:$4 sm:$0xff]   ;;  %v3796_v23 = vld [vmem:[%s6084_s1 + $0x40] ss:$16 sps:$4 sm:$0xff]  }
  0x1b   :  { %1552 = vmatpush1.bf16.msra.mxu1 %v3779_v12  ;;  %1440 = vmatprep.subr.bf16.mxu0 %v3780_v13  ;;  %v3794_v22 = vld [vmem:[%s6084_s1 + $0x244] ss:$16 sps:$4 sm:$0xff]   ;;  %v3797_v24 = vld [vmem:[%s6084_s1 + $0x240] ss:$16 sps:$4 sm:$0xff]  }
  0x1c   :  { %1553 = vmatprep.subr.bf16.mxu1 %v3782_v14  ;;  %v3798_v25 = vld [vmem:[%s6084_s1 + $0x24] ss:$16 sps:$4 sm:$0xff]   ;;  %v3802_v27 = vld [vmem:[%s6084_s1 + $0x20] ss:$16 sps:$4 sm:$0xff]   ;;  %v58_v14 = vld [vmem:[%s6083_s0 + $0x78] sm:$0xff] }
  0x1d   :  { %v3800_v26 = vld [vmem:[%s6084_s1 + $0x224] ss:$16 sps:$4 sm:$0xff]   ;;  %v3803_v28 = vld [vmem:[%s6084_s1 + $0x220] ss:$16 sps:$4 sm:$0xff]  }
  0x1e   :  { %1441 = vmatpush1.bf16.msra.mxu0 %v3784_v15  ;;  %v3804_v29 = vld [vmem:[%s6084_s1 + $0x4] ss:$16 sps:$4 sm:$0xff]   ;;  %v3808_v31 = vld [vmem:[%s6084_s1] ss:$16 sps:$4 sm:$0xff]  }
  0x1f   :  { %1554 = vmatpush1.bf16.msra.mxu1 %v3785_v16  ;;  %1442 = vmatprep.subr.bf16.mxu0 %v3786_v17  ;;  %v3806_v30 = vld [vmem:[%s6084_s1 + $0x204] ss:$16 sps:$4 sm:$0xff]   ;;  %v3809_v32 = vld [vmem:[%s6084_s1 + $0x200] ss:$16 sps:$4 sm:$0xff]  }
  0x20   :  { %1555 = vmatprep.subr.bf16.mxu1 %v3788_v18  ;;  %v3810_v33 = vld [vmem:[%s6084_s1 + $0x1e4] ss:$16 sps:$4 sm:$0xff]   ;;  %v3814_v35 = vld [vmem:[%s6084_s1 + $0x1e0] ss:$16 sps:$4 sm:$0xff]   ;;  %v60_v18 = vld [vmem:[%s6083_s0 + $0x88] sm:$0xff] }
  0x21   :  { %v3812_v34 = vld [vmem:[%s6084_s1 + $0x3e4] ss:$16 sps:$4 sm:$0xff]   ;;  %v3815_v36 = vld [vmem:[%s6084_s1 + $0x3e0] ss:$16 sps:$4 sm:$0xff]  }
  0x22   :  { %1443 = vmatpush1.bf16.msra.mxu0 %v3790_v19  ;;  %v3816_v37 = vld [vmem:[%s6084_s1 + $0x1c4] ss:$16 sps:$4 sm:$0xff]   ;;  %v3820_v39 = vld [vmem:[%s6084_s1 + $0x1c0] ss:$16 sps:$4 sm:$0xff]  }
  0x23   :  { %1556 = vmatpush1.bf16.msra.mxu1 %v3791_v20  ;;  %1444 = vmatprep.subr.bf16.mxu0 %v3792_v21  ;;  %v3818_v38 = vld [vmem:[%s6084_s1 + $0x3c4] ss:$16 sps:$4 sm:$0xff]   ;;  %v3821_v40 = vld [vmem:[%s6084_s1 + $0x3c0] ss:$16 sps:$4 sm:$0xff]  }
  0x24   :  { %1557 = vmatprep.subr.bf16.mxu1 %v3794_v22  ;;  %v3822_v41 = vld [vmem:[%s6084_s1 + $0x1a4] ss:$16 sps:$4 sm:$0xff]   ;;  %v3826_v43 = vld [vmem:[%s6084_s1 + $0x1a0] ss:$16 sps:$4 sm:$0xff]  }
  0x25   :  { %v3824_v42 = vld [vmem:[%s6084_s1 + $0x3a4] ss:$16 sps:$4 sm:$0xff]   ;;  %v3827_v44 = vld [vmem:[%s6084_s1 + $0x3a0] ss:$16 sps:$4 sm:$0xff]  }
  0x26   :  { %1445 = vmatpush1.bf16.msra.mxu0 %v3796_v23  ;;  %v3828_v45 = vld [vmem:[%s6084_s1 + $0x184] ss:$16 sps:$4 sm:$0xff]   ;;  %v3832_v51 = vld [vmem:[%s6084_s1 + $0x180] ss:$16 sps:$4 sm:$0xff]  }
  0x27   :  { %1558 = vmatpush1.bf16.msra.mxu1 %v3797_v24  ;;  %1446 = vmatprep.subr.bf16.mxu0 %v3798_v25  ;;  %v3830_v46 = vld [vmem:[%s6084_s1 + $0x384] ss:$16 sps:$4 sm:$0xff]   ;;  %v3833_v52 = vld [vmem:[%s6084_s1 + $0x380] ss:$16 sps:$4 sm:$0xff]  }
  0x28   :  { %1559 = vmatprep.subr.bf16.mxu1 %v3800_v26  ;;  %v51_v48 = vld [vmem:[%s6083_s0 + $0x40] sm:$0xff]  ;;  %v53_v50 = vld [vmem:[%s6083_s0 + $0x50] sm:$0xff]  ;;  %v64_v26 = vld [vmem:[%s6083_s0 + $0xa8] sm:$0xff] }
  0x29   :  { %v3834_v53 = vld [vmem:[%s6084_s1 + $0x164] ss:$16 sps:$4 sm:$0xff]   ;;  %v4447_v54 = vpack.c.bf16 %v51_v48, %v44_v47  ;;  %v4449_v55 = vpack.c.bf16 %v53_v50, %v46_v49  ;;  %v3838_v57 = vld [vmem:[%s6084_s1 + $0x160] ss:$16 sps:$4 sm:$0xff]   ;;  %v88_v48 = vld [vmem:[%s6083_s0 + $0x168] sm:$0xff] }
  0x2a   :  { %1447 = vmatpush1.bf16.msra.mxu0 %v3802_v27  ;;  %v3836_v56 = vld [vmem:[%s6084_s1 + $0x364] ss:$16 sps:$4 sm:$0xff]   ;;  %v3839_v58 = vld [vmem:[%s6084_s1 + $0x360] ss:$16 sps:$4 sm:$0xff]  }
  0x2b   :  { %1560 = vmatpush1.bf16.msra.mxu1 %v3803_v28  ;;  %1448 = vmatprep.subr.bf16.mxu0 %v3804_v29  ;;  %v3840_v59 = vld [vmem:[%s6084_s1 + $0x144] ss:$16 sps:$4 sm:$0xff]   ;;  %v3844_v61 = vld [vmem:[%s6084_s1 + $0x140] ss:$16 sps:$4 sm:$0xff]   ;;  %v66_v28 = vld [vmem:[%s6083_s0 + $0xb8] sm:$0xff] }
  0x2c   :  { %1561 = vmatprep.subr.bf16.mxu1 %v3806_v30  ;;  %1466 = vmatprep.mubr.bf16.mxu0 %v4447_v54  ;;  %v3842_v60 = vld [vmem:[%s6084_s1 + $0x344] ss:$16 sps:$4 sm:$0xff]   ;;  %v3845_v62 = vld [vmem:[%s6084_s1 + $0x340] ss:$16 sps:$4 sm:$0xff]   ;;  %v72_v30 = vld [vmem:[%s6083_s0 + $0xe8] sm:$0xff] }
  0x2d   :  { %1579 = vmatprep.mubr.bf16.mxu1 %v4449_v55  ;;  %v3846_v63 = vld [vmem:[%s6084_s1 + $0x124] ss:$16 sps:$4 sm:$0xff]   ;;  %v3850_v1 = vld [vmem:[%s6084_s1 + $0x120] ss:$16 sps:$4 sm:$0xff]  }
  0x2e   :  { %1449 = vmatpush1.bf16.msra.mxu0 %v3808_v31  ;;  %v3848_v0 = vld [vmem:[%s6084_s1 + $0x324] ss:$16 sps:$4 sm:$0xff]   ;;  %v3851_v2 = vld [vmem:[%s6084_s1 + $0x320] ss:$16 sps:$4 sm:$0xff]  }
  0x2f   :  { %1562 = vmatpush1.bf16.msra.mxu1 %v3809_v32  ;;  %1450 = vmatprep.subr.bf16.mxu0 %v3810_v33  ;;  %v3852_v3 = vld [vmem:[%s6084_s1 + $0x104] ss:$16 sps:$4 sm:$0xff]   ;;  %v3856_v5 = vld [vmem:[%s6084_s1 + $0x100] ss:$16 sps:$4 sm:$0xff]   ;;  %v74_v32 = vld [vmem:[%s6083_s0 + $0xf8] sm:$0xff] }
  0x30   :  { %1563 = vmatprep.subr.bf16.mxu1 %v3812_v34  ;;  %v3854_v4 = vld [vmem:[%s6084_s1 + $0x304] ss:$16 sps:$4 sm:$0xff]   ;;  %v3857_v6 = vld [vmem:[%s6084_s1 + $0x300] ss:$16 sps:$4 sm:$0xff]  }
  0x31   :  { %v43_v7 = vld [vmem:[%s6083_s0] sm:$0xff]  ;;  %v45_v9 = vld [vmem:[%s6083_s0 + $0x10] sm:$0xff] }
  0x32   :  { %1451 = vmatpush2.bf16.msra.mxu0 %v3814_v35  ;;  %v3860_v11 = vld [vmem:[%s6084_s1 + $0x4e4] ss:$16 sps:$4 sm:$0xff]   ;;  %v3858_v13 = vld [vmem:[%s6084_s1 + $0x4e0] ss:$16 sps:$4 sm:$0xff]   ;;  %v4525_v16 = vpack.c.bf16 %v50_v8, %v43_v7  ;;  %v4527_v17 = vpack.c.bf16 %v52_v10, %v45_v9 }
  0x33   :  { %1564 = vmatpush2.bf16.msra.mxu1 %v3815_v36  ;;  %1452 = vmatprep.subr.bf16.mxu0 %v3816_v37  ;;  %v3863_v12 = vld [vmem:[%s6084_s1 + $0x604] ss:$16 sps:$4 sm:$0xff]   ;;  %v3861_v20 = vld [vmem:[%s6084_s1 + $0x600] ss:$16 sps:$4 sm:$0xff]  }
  0x34   :  { %1565 = vmatprep.subr.bf16.mxu1 %v3818_v38  ;;  %v65_v15 = vld [vmem:[%s6083_s0 + $0xb0] sm:$0xff]  ;;  %v67_v19 = vld [vmem:[%s6083_s0 + $0xc0] sm:$0xff] }
  0x35   :  { %v3866_v21 = vld [vmem:[%s6084_s1 + $0x4c4] ss:$16 sps:$4 sm:$0xff]   ;;  %v4541_v22 = vpack.c.bf16 %v65_v15, %v58_v14  ;;  %v3864_v23 = vld [vmem:[%s6084_s1 + $0x4c0] ss:$16 sps:$4 sm:$0xff]   ;;  %v4546_v24 = vpack.c.bf16 %v67_v19, %v60_v18  ;;  %v3914_v14 = vld [vmem:[%s6084_s1 + $0x2ec] ss:$16 sps:$4 sm:$0xff]  }
  0x36   :  { %1453 = vmatpush2.bf16.msra.mxu0 %v3820_v39  ;;  %v57_v25 = vld [vmem:[%s6083_s0 + $0x70] sm:$0xff]  ;;  %v59_v27 = vld [vmem:[%s6083_s0 + $0x80] sm:$0xff]  ;;  %v108_v15 = vld [vmem:[%s6083_s0 + $0x208] sm:$0xff] }
  0x37   :  { %1566 = vmatpush2.bf16.msra.mxu1 %v3821_v40  ;;  %1454 = vmatprep.subr.bf16.mxu0 %v3822_v41  ;;  %v3869_v29 = vld [vmem:[%s6084_s1 + $0x4a4] ss:$16 sps:$4 sm:$0xff]   ;;  %v4579_v34 = vpack.c.bf16 %v64_v26, %v57_v25  ;;  %v4581_v35 = vpack.c.bf16 %v66_v28, %v59_v27  ;;  %v3867_v36 = vld [vmem:[%s6084_s1 + $0x4a0] ss:$16 sps:$4 sm:$0xff]   ;;  %v114_v19 = vld [vmem:[%s6083_s0 + $0x238] sm:$0xff] }
  0x38   :  { %1567 = vmatprep.subr.bf16.mxu1 %v3824_v42  ;;  %v79_v31 = vld [vmem:[%s6083_s0 + $0x120] sm:$0xff]  ;;  %v81_v33 = vld [vmem:[%s6083_s0 + $0x130] sm:$0xff]  ;;  %v78_v42 = vld [vmem:[%s6083_s0 + $0x118] sm:$0xff] }
  0x39   :  { %v4586_v37 = vpack.c.bf16 %v79_v31, %v72_v30  ;;  %v3872_v38 = vld [vmem:[%s6084_s1 + $0x484] ss:$16 sps:$4 sm:$0xff]   ;;  %v4591_v39 = vpack.c.bf16 %v81_v33, %v74_v32  ;;  %v3870_v40 = vld [vmem:[%s6084_s1 + $0x480] ss:$16 sps:$4 sm:$0xff]   ;;  %v120_v33 = vld [vmem:[%s6083_s0 + $0x268] sm:$0xff] }
  0x3a   :  { %1455 = vmatpush2.bf16.msra.mxu0 %v3826_v43  ;;  %v71_v41 = vld [vmem:[%s6083_s0 + $0xe0] sm:$0xff]  ;;  %v73_v43 = vld [vmem:[%s6083_s0 + $0xf0] sm:$0xff] }
  0x3b   :  { %1568 = vmatpush2.bf16.msra.mxu1 %v3827_v44  ;;  %1456 = vmatprep.subr.bf16.mxu0 %v3828_v45  ;;  %v80_v44 = vld [vmem:[%s6083_s0 + $0x128] sm:$0xff]  ;;  %v3875_v45 = vld [vmem:[%s6084_s1 + $0x464] ss:$16 sps:$4 sm:$0xff]   ;;  %v4627_v50 = vpack.c.bf16 %v78_v42, %v71_v41  ;;  %v3882_v10 = vld [vmem:[%s6084_s1 + $0x400] ss:$16 sps:$4 sm:$0xff]  }
  0x3c   :  { %1569 = vmatprep.subr.bf16.mxu1 %v3830_v46  ;;  %v86_v46 = vld [vmem:[%s6083_s0 + $0x158] sm:$0xff]  ;;  %v93_v47 = vld [vmem:[%s6083_s0 + $0x190] sm:$0xff]  ;;  %v95_v49 = vld [vmem:[%s6083_s0 + $0x1a0] sm:$0xff] }
  0x3d   :  { %v3884_v8 = vld [vmem:[%s6084_s1 + $0x404] ss:$16 sps:$4 sm:$0xff]   ;;  %v3885_v27 = vld [vmem:[%s6084_s1 + $0x5e0] ss:$16 sps:$4 sm:$0xff]   ;;  %v128_v41 = vld [vmem:[%s6083_s0 + $0x2a8] sm:$0xff] }
  0x3e   :  { %1457 = vmatpush2.bf16.msra.mxu0 %v3832_v51  ;;  %v4629_v51 = vpack.c.bf16 %v80_v44, %v73_v43  ;;  %v3887_v18 = vld [vmem:[%s6084_s1 + $0x5e4] ss:$16 sps:$4 sm:$0xff]   ;;  %v3888_v31 = vld [vmem:[%s6084_s1 + $0x5c0] ss:$16 sps:$4 sm:$0xff]   ;;  %v130_v43 = vld [vmem:[%s6083_s0 + $0x2b8] sm:$0xff] }
  0x3f   :  { %1570 = vmatpush2.bf16.msra.mxu1 %v3833_v52  ;;  %1458 = vmatprep.subr.bf16.mxu0 %v3834_v53  ;;  %v3873_v52 = vld [vmem:[%s6084_s1 + $0x460] ss:$16 sps:$4 sm:$0xff]   ;;  %v4634_v53 = vpack.c.bf16 %v93_v47, %v86_v46 }
  0x40   :  { %1571 = vmatprep.subr.bf16.mxu1 %v3836_v56  ;;  %v3878_v56 = vld [vmem:[%s6084_s1 + $0x444] ss:$16 sps:$4 sm:$0xff]   ;;  %v3891_v47 = vld [vmem:[%s6084_s1 + $0x5a0] ss:$16 sps:$4 sm:$0xff]  }
  0x41   :  { %v113_v32 = vld [vmem:[%s6083_s0 + $0x230] sm:$0xff]  ;;  %v135_v42 = vld [vmem:[%s6083_s0 + $0x2e0] sm:$0xff] }
  0x42   :  { %1459 = vmatpush2.bf16.msra.mxu0 %v3838_v57  ;;  %v4639_v57 = vpack.c.bf16 %v95_v49, %v88_v48  ;;  %v137_v44 = vld [vmem:[%s6083_s0 + $0x2f0] sm:$0xff]  ;;  %v4781_v48 = vpack.c.bf16 %v135_v42, %v128_v41  ;;  %v56_v42 = vld [vmem:[%s6083_s0 + $0x68] sm:$0xff] }
  0x43   :  { %1572 = vmatpush2.bf16.msra.mxu1 %v3839_v58  ;;  %1460 = vmatprep.subr.bf16.mxu0 %v3840_v59  ;;  %v3876_v58 = vld [vmem:[%s6084_s1 + $0x440] ss:$16 sps:$4 sm:$0xff]   ;;  %v3896_v49 = vld [vmem:[%s6084_s1 + $0x584] ss:$16 sps:$4 sm:$0xff]  }
  0x44   :  { %1573 = vmatprep.subr.bf16.mxu1 %v3842_v60  ;;  %v85_v59 = vld [vmem:[%s6083_s0 + $0x150] sm:$0xff]  ;;  %v92_v60 = vld [vmem:[%s6083_s0 + $0x188] sm:$0xff] }
  0x45   :  { %v49_v41 = vld [vmem:[%s6083_s0 + $0x30] sm:$0xff] }
  0x46   :  { %1461 = vmatpush2.bf16.msra.mxu0 %v3844_v61  ;;  %v87_v61 = vld [vmem:[%s6083_s0 + $0x160] sm:$0xff] }
  0x47   :  { %1574 = vmatpush2.bf16.msra.mxu1 %v3845_v62  ;;  %1462 = vmatprep.subr.bf16.mxu0 %v3846_v63  ;;  %v94_v62 = vld [vmem:[%s6083_s0 + $0x198] sm:$0xff]  ;;  %v3881_v63 = vld [vmem:[%s6084_s1 + $0x424] ss:$16 sps:$4 sm:$0xff]  }
  0x48   :  { %1575 = vmatprep.subr.bf16.mxu1 %v3848_v0  ;;  %v100_v0 = vld [vmem:[%s6083_s0 + $0x1c8] sm:$0xff] }
  0x4a   :  { %1463 = vmatpush2.bf16.msra.mxu0 %v3850_v1  ;;  %v107_v1 = vld [vmem:[%s6083_s0 + $0x200] sm:$0xff] }
  0x4b   :  { %1576 = vmatpush2.bf16.msra.mxu1 %v3851_v2  ;;  %1464 = vmatprep.subr.bf16.mxu0 %v3852_v3  ;;  %v102_v2 = vld [vmem:[%s6083_s0 + $0x1d8] sm:$0xff]  ;;  %v109_v3 = vld [vmem:[%s6083_s0 + $0x210] sm:$0xff]  ;;  %v4682_v7 = vpack.c.bf16 %v107_v1, %v100_v0  ;;  %v144_v1 = vld [vmem:[%s6083_s0 + $0x328] sm:$0xff] }
  0x4c   :  { %1577 = vmatprep.subr.bf16.mxu1 %v3854_v4  ;;  %v4675_v4 = vpack.c.bf16 %v92_v60, %v85_v59  ;;  %v4687_v9 = vpack.c.bf16 %v109_v3, %v102_v2  ;;  %v134_v59 = vld [vmem:[%s6083_s0 + $0x2d8] sm:$0xff]  ;;  %v129_v60 = vld [vmem:[%s6083_s0 + $0x2b0] sm:$0xff]  ;;  %v151_v2 = vld [vmem:[%s6083_s0 + $0x360] sm:$0xff] }
  0x4d   :  { %v149_v0 = vld [vmem:[%s6083_s0 + $0x350] sm:$0xff] }
  0x4e   :  { %1465 = vmatpush2.bf16.msra.mxu0 %v3856_v5  ;;  %v4677_v5 = vpack.c.bf16 %v94_v62, %v87_v61  ;;  %v136_v61 = vld [vmem:[%s6083_s0 + $0x2e8] sm:$0xff]  ;;  %v3899_v62 = vld [vmem:[%s6084_s1 + $0x564] ss:$16 sps:$4 sm:$0xff]  }
  0x4f   :  { %1578 = vmatpush2.bf16.msra.mxu1 %v3857_v6  ;;  %1660 = vmatprep.subr.bf16.mxu0 %v3860_v11  ;;  %v3879_v6 = vld [vmem:[%s6084_s1 + $0x420] ss:$16 sps:$4 sm:$0xff]  }
  0x50   :  { %1787 = vmatprep.subr.bf16.mxu1 %v3863_v12  ;;  %v99_v11 = vld [vmem:[%s6083_s0 + $0x1c0] sm:$0xff]  ;;  %v106_v12 = vld [vmem:[%s6083_s0 + $0x1f8] sm:$0xff] }
  0x51   :  { %1467 = vmatmul.mubr.bf16.vlgmr.msra.gmra.mxu0 %v4525_v16  ;;  %v4726_v25 = vpack.c.bf16 %v106_v12, %v99_v11  ;;  %v3902_v11 = vld [vmem:[%s6084_s1 + $0x544] ss:$16 sps:$4 sm:$0xff]   ;;  %v4834_v12 = vpack.c.bf16 %v151_v2, %v144_v1  ;;  %v3918_v1 = vld [vmem:[%s6084_s1 + $0x2c8] ss:$16 sps:$4 sm:$0xff]  }
  0x52   :  { %1580 = vmatmul.mubr.bf16.vlgmr.msra.gmra.mxu1 %v4527_v17  ;;  %1661 = vmatpush1.bf16.msra.mxu0 %v3858_v13  ;;  %v101_v13 = vld [vmem:[%s6083_s0 + $0x1d0] sm:$0xff] }
  0x53   :  { %1788 = vmatpush1.bf16.msra.mxu1 %v3861_v20  ;;  %1662 = vmatprep.subr.bf16.mxu0 %v3866_v21  ;;  %v121_v20 = vld [vmem:[%s6083_s0 + $0x270] sm:$0xff]  ;;  %v116_v21 = vld [vmem:[%s6083_s0 + $0x248] sm:$0xff]  ;;  %v4728_v26 = vpack.c.bf16 %v108_v15, %v101_v13 }
  0x54   :  { %1476 = vmatprep.mubr.bf16.mxu0 %v4541_v22  ;;  %1589 = vmatprep.mubr.bf16.mxu1 %v4546_v24  ;;  %v4733_v28 = vpack.c.bf16 %v121_v20, %v114_v19  ;;  %v3900_v13 = vld [vmem:[%s6084_s1 + $0x540] ss:$16 sps:$4 sm:$0xff]   ;;  %v148_v15 = vld [vmem:[%s6083_s0 + $0x348] sm:$0xff]  ;;  %v150_v19 = vld [vmem:[%s6083_s0 + $0x358] sm:$0xff] }
  0x55   :  { %1999 = vmatprep.subr.bf16.mxu1 %v3914_v14  ;;  %v141_v14 = vld [vmem:[%s6083_s0 + $0x310] sm:$0xff] }
  0x56   :  { %1663 = vmatpush1.bf16.msra.mxu0 %v3864_v23  ;;  %v123_v23 = vld [vmem:[%s6083_s0 + $0x280] sm:$0xff]  ;;  %v61_v2 = vld [vmem:[%s6083_s0 + $0x90] sm:$0xff] }
  0x57   :  { %1664 = vmatprep.subr.bf16.mxu0 %v3869_v29  ;;  %v3890_v29 = vld [vmem:[%s6084_s1 + $0x5c4] ss:$16 sps:$4 sm:$0xff]   ;;  %v4738_v30 = vpack.c.bf16 %v123_v23, %v116_v21  ;;  %v48_v21 = vld [vmem:[%s6083_s0 + $0x28] sm:$0xff] }
  0x58   :  { %v3905_v20 = vld [vmem:[%s6084_s1 + $0x524] ss:$16 sps:$4 sm:$0xff]  }
  0x59   :  { %1477 = vmatmul.mubr.bf16.gmra.mxu0 %v4579_v34  ;;  %v55_v23 = vld [vmem:[%s6083_s0 + $0x60] sm:$0xff] }
  0x5a   :  { %1590 = vmatmul.mubr.bf16.gmra.mxu1 %v4581_v35  ;;  %1665 = vmatpush1.bf16.msra.mxu0 %v3867_v36  ;;  %v115_v36 = vld [vmem:[%s6083_s0 + $0x240] sm:$0xff] }
  0x5b   :  { %1486 = vmatprep.mubr.bf16.mxu0 %v4586_v37  ;;  %1666 = vmatprep.subr.bf16.mxu0 %v3872_v38  ;;  %v122_v38 = vld [vmem:[%s6083_s0 + $0x278] sm:$0xff] }
  0x5c   :  { %1599 = vmatprep.mubr.bf16.mxu1 %v4591_v39  ;;  %v4776_v46 = vpack.c.bf16 %v122_v38, %v115_v36  ;;  %v3906_v36 = vld [vmem:[%s6084_s1 + $0x500] ss:$16 sps:$4 sm:$0xff]  }
  0x5d   :  { %v47_v38 = vld [vmem:[%s6083_s0 + $0x20] sm:$0xff] }
  0x5e   :  { %1667 = vmatpush1.bf16.msra.mxu0 %v3870_v40  ;;  %v3893_v40 = vld [vmem:[%s6084_s1 + $0x5a4] ss:$16 sps:$4 sm:$0xff]  }
  0x5f   :  { %1668 = vmatprep.subr.bf16.mxu0 %v3875_v45  ;;  %v4774_v45 = vpack.c.bf16 %v120_v33, %v113_v32  ;;  %v4871_v32 = vpack.c.bf16 %v55_v23, %v48_v21  ;;  %v3908_v33 = vld [vmem:[%s6084_s1 + $0x504] ss:$16 sps:$4 sm:$0xff]   ;;  %v3921_v23 = vld [vmem:[%s6084_s1 + $0xa8] ss:$16 sps:$4 sm:$0xff]  }
  0x60   :  { %v83_v21 = vld [vmem:[%s6083_s0 + $0x140] sm:$0xff] }
  0x61   :  { %1487 = vmatmul.mubr.bf16.gmra.mxu0 %v4627_v50 }
  0x62   :  { %1600 = vmatmul.mubr.bf16.gmra.mxu1 %v4629_v51  ;;  %1669 = vmatpush1.bf16.msra.mxu0 %v3873_v52  ;;  %v4786_v52 = vpack.c.bf16 %v137_v44, %v130_v43  ;;  %v6092_v43 = vmov 0   ;;  %v3911_v44 = vld [vmem:[%s6084_s1 + $0xec] ss:$16 sps:$4 sm:$0xff]  }
  0x63   :  { %1496 = vmatprep.mubr.bf16.mxu0 %v4634_v53  ;;  %1670 = vmatprep.subr.bf16.mxu0 %v3878_v56  ;;  %v3894_v56 = vld [vmem:[%s6084_s1 + $0x580] ss:$16 sps:$4 sm:$0xff]  }
  0x64   :  { %1609 = vmatprep.mubr.bf16.mxu1 %v4639_v57 }
  0x66   :  { %1671 = vmatpush1.bf16.msra.mxu0 %v3876_v58  ;;  %v127_v58 = vld [vmem:[%s6083_s0 + $0x2a0] sm:$0xff] }
  0x67   :  { %1672 = vmatprep.subr.bf16.mxu0 %v3881_v63  ;;  %v142_v63 = vld [vmem:[%s6083_s0 + $0x318] sm:$0xff]  ;;  %v4822_v3 = vpack.c.bf16 %v134_v59, %v127_v58  ;;  %v4906_v58 = vpack.c.bf16 %v56_v42, %v49_v41  ;;  %v75_v42 = vld [vmem:[%s6083_s0 + $0x100] sm:$0xff] }
  0x68   :  { %v62_v59 = vld [vmem:[%s6083_s0 + $0x98] sm:$0xff] }
  0x69   :  { %1497 = vmatmul.mubr.bf16.gmra.mxu0 %v4675_v4 }
  0x6a   :  { %1610 = vmatmul.mubr.bf16.gmra.mxu1 %v4677_v5  ;;  %1673 = vmatpush1.bf16.msra.mxu0 %v3879_v6  ;;  %v4824_v6 = vpack.c.bf16 %v136_v61, %v129_v60  ;;  %v69_v60 = vld [vmem:[%s6083_s0 + $0xd0] sm:$0xff]  ;;  %v3917_v61 = vld [vmem:[%s6084_s1 + $0xcc] ss:$16 sps:$4 sm:$0xff]  }
  0x6b   :  { %1506 = vmatprep.mubr.bf16.mxu0 %v4682_v7  ;;  %1674 = vmatprep.subr.bf16.mxu0 %v3884_v8  ;;  %v3897_v8 = vld [vmem:[%s6084_s1 + $0x560] ss:$16 sps:$4 sm:$0xff]  }
  0x6c   :  { %1619 = vmatprep.mubr.bf16.mxu1 %v4687_v9 }
  0x6e   :  { %1675 = vmatpush1.bf16.msra.mxu0 %v3882_v10  ;;  %v4829_v10 = vpack.c.bf16 %v149_v0, %v142_v63  ;;  %v3915_v63 = vld [vmem:[%s6084_s1 + $0xc8] ss:$16 sps:$4 sm:$0xff]   ;;  %v4923_v0 = vpack.c.bf16 %v69_v60, %v62_v59  ;;  %v3935_v59 = vld [vmem:[%s6084_s1 + $0x6c] ss:$16 sps:$4 sm:$0xff]  }
  0x6f   :  { %1676 = vmatprep.subr.bf16.mxu0 %v3887_v18  ;;  %v143_v18 = vld [vmem:[%s6083_s0 + $0x320] sm:$0xff]  ;;  %v3938_v60 = vld [vmem:[%s6084_s1 + $0x26c] ss:$16 sps:$4 sm:$0xff]  }
  0x71   :  { %1507 = vmatmul.mubr.bf16.gmra.mxu0 %v4726_v25 }
  0x72   :  { %1620 = vmatmul.mubr.bf16.gmra.mxu1 %v4728_v26  ;;  %1677 = vmatpush2.bf16.msra.mxu0 %v3885_v27  ;;  %v4864_v27 = vpack.c.bf16 %v148_v15, %v141_v14  ;;  %v3923_v14 = vld [vmem:[%s6084_s1 + $0xac] ss:$16 sps:$4 sm:$0xff]  }
  0x73   :  { %1516 = vmatprep.mubr.bf16.mxu0 %v4733_v28  ;;  %1678 = vmatprep.subr.bf16.mxu0 %v3890_v29  ;;  %v4866_v29 = vpack.c.bf16 %v150_v19, %v143_v18  ;;  %v3926_v15 = vld [vmem:[%s6084_s1 + $0x2ac] ss:$16 sps:$4 sm:$0xff]  }
  0x74   :  { %1629 = vmatprep.mubr.bf16.mxu1 %v4738_v30  ;;  %v76_v18 = vld [vmem:[%s6083_s0 + $0x108] sm:$0xff] }
  0x75   :  { %v4979_v41 = vpack.c.bf16 %v83_v21, %v76_v18  ;;  %v89_v21 = vld [vmem:[%s6083_s0 + $0x170] sm:$0xff] }
  0x76   :  { %1679 = vmatpush2.bf16.msra.mxu0 %v3888_v31  ;;  %v3903_v31 = vld [vmem:[%s6084_s1 + $0x520] ss:$16 sps:$4 sm:$0xff]  }
  0x77   :  { %1680 = vmatprep.subr.bf16.mxu0 %v3893_v40  ;;  %v54_v40 = vld [vmem:[%s6083_s0 + $0x58] sm:$0xff] }
  0x79   :  { %1517 = vmatmul.mubr.bf16.gmra.mxu0 %v4774_v45 }
  0x7a   :  { %1630 = vmatmul.mubr.bf16.gmra.mxu1 %v4776_v46  ;;  %1681 = vmatpush2.bf16.msra.mxu0 %v3891_v47  ;;  %v3909_v47 = vld [vmem:[%s6084_s1 + $0xe8] ss:$16 sps:$4 sm:$0xff]  }
  0x7b   :  { %1526 = vmatprep.mubr.bf16.mxu0 %v4781_v48  ;;  %1682 = vmatprep.subr.bf16.mxu0 %v3896_v49  ;;  %v3912_v49 = vld [vmem:[%s6084_s1 + $0x2e8] ss:$16 sps:$4 sm:$0xff]  }
  0x7c   :  { %1639 = vmatprep.mubr.bf16.mxu1 %v4786_v52 }
  0x7e   :  { %1683 = vmatpush2.bf16.msra.mxu0 %v3894_v56  ;;  %v4904_v56 = vpack.c.bf16 %v54_v40, %v47_v38  ;;  %v3927_v38 = vld [vmem:[%s6084_s1 + $0x88] ss:$16 sps:$4 sm:$0xff]  }
  0x7f   :  { %1684 = vmatprep.subr.bf16.mxu0 %v3899_v62  ;;  %v3920_v62 = vld [vmem:[%s6084_s1 + $0x2cc] ss:$16 sps:$4 sm:$0xff]   ;;  %v3930_v40 = vld [vmem:[%s6084_s1 + $0x288] ss:$16 sps:$4 sm:$0xff]  }
  0x81   :  { %1527 = vmatmul.mubr.bf16.gmra.mxu0 %v4822_v3 }
  0x82   :  { %1640 = vmatmul.mubr.bf16.gmra.mxu1 %v4824_v6  ;;  %1685 = vmatpush2.bf16.msra.mxu0 %v3897_v8  ;;  %v68_v8 = vld [vmem:[%s6083_s0 + $0xc8] sm:$0xff] }
  0x83   :  { %1536 = vmatprep.mubr.bf16.mxu0 %v4829_v10  ;;  %1686 = vmatprep.subr.bf16.mxu0 %v3902_v11  ;;  %v63_v11 = vld [vmem:[%s6083_s0 + $0xa0] sm:$0xff]  ;;  %v4954_v19 = vpack.c.bf16 %v68_v8, %v61_v2  ;;  %v90_v2 = vld [vmem:[%s6083_s0 + $0x178] sm:$0xff]  ;;  %v97_v8 = vld [vmem:[%s6083_s0 + $0x1b0] sm:$0xff] }
  0x84   :  { %1649 = vmatprep.mubr.bf16.mxu1 %v4834_v12  ;;  %v5032_v18 = vpack.c.bf16 %v97_v8, %v90_v2  ;;  %v3954_v2 = vld [vmem:[%s6084_s1 + $0x208] ss:$16 sps:$4 sm:$0xff]  }
  0x86   :  { %1687 = vmatpush2.bf16.msra.mxu0 %v3900_v13  ;;  %v70_v13 = vld [vmem:[%s6083_s0 + $0xd8] sm:$0xff] }
  0x87   :  { %1688 = vmatprep.subr.bf16.mxu0 %v3905_v20  ;;  %v4956_v20 = vpack.c.bf16 %v70_v13, %v63_v11  ;;  %v3941_v11 = vld [vmem:[%s6084_s1 + $0x4c] ss:$16 sps:$4 sm:$0xff]  }
  0x88   :  { %v3944_v13 = vld [vmem:[%s6084_s1 + $0x24c] ss:$16 sps:$4 sm:$0xff]  }
  0x89   :  { %1537 = vmatmul.mubr.bf16.gmra.mxu0 %v4864_v27 }
  0x8a   :  { %1650 = vmatmul.mubr.bf16.gmra.mxu1 %v4866_v29  ;;  %1689 = vmatpush2.bf16.msra.mxu0 %v3903_v31  ;;  %v3924_v31 = vld [vmem:[%s6084_s1 + $0x2a8] ss:$16 sps:$4 sm:$0xff]  }
  0x8b   :  { %1692 = vmatprep.mubr.bf16.mxu0 %v4871_v32  ;;  %1690 = vmatprep.subr.bf16.mxu0 %v3908_v33  ;;  %v3929_v33 = vld [vmem:[%s6084_s1 + $0x8c] ss:$16 sps:$4 sm:$0xff]  }
  0x8c   :  { %1805 = vmatprep.mubr.bf16.mxu1 %v6092_v43 }
  0x8e   :  { %1691 = vmatpush2.bf16.msra.mxu0 %v3906_v36  ;;  %v3932_v36 = vld [vmem:[%s6084_s1 + $0x28c] ss:$16 sps:$4 sm:$0xff]  }
  0x8f   :  { %1886 = vmatprep.subr.bf16.mxu0 %v3911_v44  ;;  %v82_v44 = vld [vmem:[%s6083_s0 + $0x138] sm:$0xff] }
  0x91   :  { %1693 = vmatmul.mubr.bf16.vlgmr.msra.gmra.mxu0 %v4904_v56 }
  0x92   :  { %3677 = vmatmul.mubr.msk.bf16.vlgmr.msra.gmra.mxu1 %vm1409_vm0, %v4906_v58  ;;  %1887 = vmatpush1.bf16.msra.mxu0 %v3909_v47  ;;  %v77_v47 = vld [vmem:[%s6083_s0 + $0x110] sm:$0xff] }
  0x93   :  { %2000 = vmatpush1.bf16.msra.mxu1 %v3912_v49  ;;  %1888 = vmatprep.subr.bf16.mxu0 %v3917_v61  ;;  %v84_v49 = vld [vmem:[%s6083_s0 + $0x148] sm:$0xff] }
  0x94   :  { %2001 = vmatprep.subr.bf16.mxu1 %v3920_v62  ;;  %1702 = vmatprep.mubr.bf16.mxu0 %v4923_v0  ;;  %v3933_v61 = vld [vmem:[%s6084_s1 + $0x68] ss:$16 sps:$4 sm:$0xff]  }
  0x95   :  { %1815 = vmatprep.mubr.bf16.mxu1 %v6092_v43  ;;  %v3936_v62 = vld [vmem:[%s6084_s1 + $0x268] ss:$16 sps:$4 sm:$0xff]  }
  0x96   :  { %1889 = vmatpush1.bf16.msra.mxu0 %v3915_v63  ;;  %v5010_v63 = vpack.c.bf16 %v82_v44, %v75_v42  ;;  %v3948_v42 = vld [vmem:[%s6084_s1 + $0x228] ss:$16 sps:$4 sm:$0xff]  }
  0x97   :  { %2002 = vmatpush1.bf16.msra.mxu1 %v3918_v1  ;;  %1890 = vmatprep.subr.bf16.mxu0 %v3923_v14  ;;  %v5012_v1 = vpack.c.bf16 %v84_v49, %v77_v47  ;;  %v3939_v14 = vld [vmem:[%s6084_s1 + $0x48] ss:$16 sps:$4 sm:$0xff]  }
  0x98   :  { %2003 = vmatprep.subr.bf16.mxu1 %v3926_v15  ;;  %v3942_v15 = vld [vmem:[%s6084_s1 + $0x248] ss:$16 sps:$4 sm:$0xff]  }
  0x99   :  { %1703 = vmatmul.mubr.bf16.gmra.mxu0 %v4954_v19  ;;  %v104_v49 = vld [vmem:[%s6083_s0 + $0x1e8] sm:$0xff] }
  0x9a   :  { %3678 = vmatmul.mubr.msk.bf16.gmra.mxu1 %vm1409_vm0, %v4956_v20  ;;  %1891 = vmatpush1.bf16.msra.mxu0 %v3921_v23  ;;  %v96_v23 = vld [vmem:[%s6083_s0 + $0x1a8] sm:$0xff] }
  0x9b   :  { %2004 = vmatpush1.bf16.msra.mxu1 %v3924_v31  ;;  %1892 = vmatprep.subr.bf16.mxu0 %v3929_v33  ;;  %v91_v31 = vld [vmem:[%s6083_s0 + $0x180] sm:$0xff]  ;;  %v98_v33 = vld [vmem:[%s6083_s0 + $0x1b8] sm:$0xff]  ;;  %v5063_v44 = vpack.c.bf16 %v96_v23, %v89_v21 }
  0x9c   :  { %2005 = vmatprep.subr.bf16.mxu1 %v3932_v36  ;;  %1712 = vmatprep.mubr.bf16.mxu0 %v4979_v41  ;;  %v3947_v36 = vld [vmem:[%s6084_s1 + $0x2c] ss:$16 sps:$4 sm:$0xff]   ;;  %v5065_v47 = vpack.c.bf16 %v98_v33, %v91_v31  ;;  %v3957_v31 = vld [vmem:[%s6084_s1 + $0x1e8] ss:$16 sps:$4 sm:$0xff]  }
  0x9d   :  { %1825 = vmatprep.mubr.bf16.mxu1 %v6092_v43  ;;  %v3959_v21 = vld [vmem:[%s6084_s1 + $0x1ec] ss:$16 sps:$4 sm:$0xff]   ;;  %v3960_v33 = vld [vmem:[%s6084_s1 + $0x3e8] ss:$16 sps:$4 sm:$0xff]  }
  0x9e   :  { %1893 = vmatpush1.bf16.msra.mxu0 %v3927_v38  ;;  %v3950_v38 = vld [vmem:[%s6084_s1 + $0x22c] ss:$16 sps:$4 sm:$0xff]  }
  0x9f   :  { %2006 = vmatpush1.bf16.msra.mxu1 %v3930_v40  ;;  %1894 = vmatprep.subr.bf16.mxu0 %v3935_v59  ;;  %v3945_v40 = vld [vmem:[%s6084_s1 + $0x28] ss:$16 sps:$4 sm:$0xff]   ;;  %v111_v59 = vld [vmem:[%s6083_s0 + $0x220] sm:$0xff]  ;;  %v3962_v23 = vld [vmem:[%s6084_s1 + $0x3ec] ss:$16 sps:$4 sm:$0xff]  }
  0xa0   :  { %2007 = vmatprep.subr.bf16.mxu1 %v3938_v60  ;;  %v3953_v60 = vld [vmem:[%s6084_s1 + $0xc] ss:$16 sps:$4 sm:$0xff]   ;;  %v5085_v8 = vpack.c.bf16 %v111_v59, %v104_v49 }
  0xa1   :  { %1713 = vmatmul.mubr.bf16.gmra.mxu0 %v5010_v63  ;;  %v3965_v49 = vld [vmem:[%s6084_s1 + $0x1cc] ss:$16 sps:$4 sm:$0xff]  }
  0xa2   :  { %3679 = vmatmul.mubr.msk.bf16.gmra.mxu1 %vm1409_vm0, %v5012_v1  ;;  %1895 = vmatpush1.bf16.msra.mxu0 %v3933_v61  ;;  %v3956_v61 = vld [vmem:[%s6084_s1 + $0x20c] ss:$16 sps:$4 sm:$0xff]  }
  0xa3   :  { %2008 = vmatpush1.bf16.msra.mxu1 %v3936_v62  ;;  %1896 = vmatprep.subr.bf16.mxu0 %v3941_v11  ;;  %v3951_v62 = vld [vmem:[%s6084_s1 + $0x8] ss:$16 sps:$4 sm:$0xff]   ;;  %v103_v11 = vld [vmem:[%s6083_s0 + $0x1e0] sm:$0xff]  ;;  %v3968_v59 = vld [vmem:[%s6084_s1 + $0x3cc] ss:$16 sps:$4 sm:$0xff]  }
  0xa4   :  { %2009 = vmatprep.subr.bf16.mxu1 %v3944_v13  ;;  %1722 = vmatprep.mubr.bf16.mxu0 %v5032_v18  ;;  %v110_v13 = vld [vmem:[%s6083_s0 + $0x218] sm:$0xff] }
  0xa5   :  { %1835 = vmatprep.mubr.bf16.mxu1 %v6092_v43 }
  0xa6   :  { %1897 = vmatpush1.bf16.msra.mxu0 %v3939_v14  ;;  %v105_v14 = vld [vmem:[%s6083_s0 + $0x1f0] sm:$0xff] }
  0xa7   :  { %2010 = vmatpush1.bf16.msra.mxu1 %v3942_v15  ;;  %1898 = vmatprep.subr.bf16.mxu0 %v3947_v36  ;;  %v112_v15 = vld [vmem:[%s6083_s0 + $0x228] sm:$0xff]  ;;  %v5116_v36 = vpack.c.bf16 %v110_v13, %v103_v11  ;;  %v119_v13 = vld [vmem:[%s6083_s0 + $0x260] sm:$0xff] }
  0xa8   :  { %2011 = vmatprep.subr.bf16.mxu1 %v3950_v38  ;;  %v5118_v38 = vpack.c.bf16 %v112_v15, %v105_v14  ;;  %v124_v11 = vld [vmem:[%s6083_s0 + $0x288] sm:$0xff]  ;;  %v126_v14 = vld [vmem:[%s6083_s0 + $0x298] sm:$0xff] }
  0xa9   :  { %1723 = vmatmul.mubr.bf16.gmra.mxu0 %v5063_v44  ;;  %v3971_v15 = vld [vmem:[%s6084_s1 + $0x1ac] ss:$16 sps:$4 sm:$0xff]  }
  0xaa   :  { %3680 = vmatmul.mubr.msk.bf16.gmra.mxu1 %vm1409_vm0, %v5065_v47  ;;  %1899 = vmatpush1.bf16.msra.mxu0 %v3945_v40  ;;  %v118_v40 = vld [vmem:[%s6083_s0 + $0x258] sm:$0xff] }
  0xab   :  { %2012 = vmatpush1.bf16.msra.mxu1 %v3948_v42  ;;  %1900 = vmatprep.subr.bf16.mxu0 %v3953_v60  ;;  %v125_v42 = vld [vmem:[%s6083_s0 + $0x290] sm:$0xff]  ;;  %v3963_v60 = vld [vmem:[%s6084_s1 + $0x1c8] ss:$16 sps:$4 sm:$0xff]  }
  0xac   :  { %2013 = vmatprep.subr.bf16.mxu1 %v3956_v61  ;;  %1732 = vmatprep.mubr.bf16.mxu0 %v5085_v8  ;;  %v3966_v61 = vld [vmem:[%s6084_s1 + $0x3c8] ss:$16 sps:$4 sm:$0xff]  }
  0xad   :  { %1845 = vmatprep.mubr.bf16.mxu1 %v6092_v43 }
  0xae   :  { %1901 = vmatpush1.bf16.msra.mxu0 %v3951_v62  ;;  %v5138_v62 = vpack.c.bf16 %v125_v42, %v118_v40  ;;  %v132_v40 = vld [vmem:[%s6083_s0 + $0x2c8] sm:$0xff]  ;;  %v139_v42 = vld [vmem:[%s6083_s0 + $0x300] sm:$0xff] }
  0xaf   :  { %2014 = vmatpush1.bf16.msra.mxu1 %v3954_v2  ;;  %1902 = vmatprep.subr.bf16.mxu0 %v3959_v21  ;;  %v117_v2 = vld [vmem:[%s6083_s0 + $0x250] sm:$0xff]  ;;  %v3974_v21 = vld [vmem:[%s6084_s1 + $0x3ac] ss:$16 sps:$4 sm:$0xff]  }
  0xb0   :  { %2015 = vmatprep.subr.bf16.mxu1 %v3962_v23  ;;  %v3969_v23 = vld [vmem:[%s6084_s1 + $0x1a8] ss:$16 sps:$4 sm:$0xff]  }
  0xb1   :  { %1733 = vmatmul.mubr.bf16.gmra.mxu0 %v5116_v36 }
  0xb2   :  { %3681 = vmatmul.mubr.msk.bf16.gmra.mxu1 %vm1409_vm0, %v5118_v38  ;;  %1903 = vmatpush2.bf16.msra.mxu0 %v3957_v31  ;;  %v5166_v31 = vpack.c.bf16 %v124_v11, %v117_v2  ;;  %v3980_v2 = vld [vmem:[%s6084_s1 + $0x38c] ss:$16 sps:$4 sm:$0xff]   ;;  %v3975_v11 = vld [vmem:[%s6084_s1 + $0x188] ss:$16 sps:$4 sm:$0xff]  }
  0xb3   :  { %2016 = vmatpush2.bf16.msra.mxu1 %v3960_v33  ;;  %1904 = vmatprep.subr.bf16.mxu0 %v3965_v49  ;;  %v5168_v33 = vpack.c.bf16 %v126_v14, %v119_v13  ;;  %v3972_v49 = vld [vmem:[%s6084_s1 + $0x3a8] ss:$16 sps:$4 sm:$0xff]   ;;  %v131_v13 = vld [vmem:[%s6083_s0 + $0x2c0] sm:$0xff] }
  0xb4   :  { %2017 = vmatprep.subr.bf16.mxu1 %v3968_v59  ;;  %1742 = vmatprep.mubr.bf16.mxu0 %v5138_v62  ;;  %6105 = vst [vmem:[#allocation6_spill] sm:$0xff] %v5166_v31  ;;  %v3977_v59 = vld [vmem:[%s6084_s1 + $0x18c] ss:$16 sps:$4 sm:$0xff]  }
  0xb5   :  { %1855 = vmatprep.mubr.bf16.mxu1 %v6092_v43  ;;  %6106 = vst [vmem:[#allocation7_spill] sm:$0xff] %v5168_v33  ;;  %v138_v14 = vld [vmem:[%s6083_s0 + $0x2f8] sm:$0xff] }
  0xb6   :  { %1905 = vmatpush2.bf16.msra.mxu0 %v3963_v60  ;;  %v3978_v60 = vld [vmem:[%s6084_s1 + $0x388] ss:$16 sps:$4 sm:$0xff]  }
  0xb7   :  { %2018 = vmatpush2.bf16.msra.mxu1 %v3966_v61  ;;  %1906 = vmatprep.subr.bf16.mxu0 %v3971_v15  ;;  %v5191_v61 = vpack.c.bf16 %v139_v42, %v132_v40  ;;  %v133_v15 = vld [vmem:[%s6083_s0 + $0x2d0] sm:$0xff]  ;;  %v3983_v40 = vld [vmem:[%s6084_s1 + $0x16c] ss:$16 sps:$4 sm:$0xff]  }
  0xb8   :  { %2019 = vmatprep.subr.bf16.mxu1 %v3974_v21  ;;  %v140_v21 = vld [vmem:[%s6083_s0 + $0x308] sm:$0xff] }
  0xb9   :  { %6107 = vst [vmem:[#allocation8_spill] sm:$0xff] %v5191_v61  ;;  %1743 = vmatmul.mubr.bf16.gmra.mxu0 %v5166_v31  ;;  %v3986_v42 = vld [vmem:[%s6084_s1 + $0x36c] ss:$16 sps:$4 sm:$0xff]   ;;  %v6111_v31 = vmov 0  }
  0xba   :  { %3682 = vmatmul.mubr.msk.bf16.gmra.mxu1 %vm1409_vm0, %v5168_v33  ;;  %1907 = vmatpush2.bf16.msra.mxu0 %v3969_v23  ;;  %v3981_v23 = vld [vmem:[%s6084_s1 + $0x168] ss:$16 sps:$4 sm:$0xff]   ;;  %v153_v33 = vld [vmem:[%s6083_s0 + $0x370] sm:$0xff] }
  0xbb   :  { %2020 = vmatpush2.bf16.msra.mxu1 %v3972_v49  ;;  %1908 = vmatprep.subr.bf16.mxu0 %v3977_v59  ;;  %v146_v49 = vld [vmem:[%s6083_s0 + $0x338] sm:$0xff]  ;;  %v5222_v59 = vpack.c.bf16 %v138_v14, %v131_v13 }
  0xbc   :  { %2021 = vmatprep.subr.bf16.mxu1 %v3980_v2  ;;  %1752 = vmatprep.mubr.bf16.mxu0 %v5191_v61  ;;  %v5224_v2 = vpack.c.bf16 %v140_v21, %v133_v15  ;;  %v3989_v61 = vld [vmem:[%s6084_s1 + $0x14c] ss:$16 sps:$4 sm:$0xff]   ;;  %v3987_v14 = vld [vmem:[%s6084_s1 + $0x148] ss:$16 sps:$4 sm:$0xff]   ;;  %v145_v15 = vld [vmem:[%s6083_s0 + $0x330] sm:$0xff] }
  0xbd   :  { %1865 = vmatprep.mubr.bf16.mxu1 %v6092_v43  ;;  %6108 = vst [vmem:[#allocation9_spill] sm:$0xff] %v5222_v59  ;;  %v3984_v43 = vld [vmem:[%s6084_s1 + $0x368] ss:$16 sps:$4 sm:$0xff]   ;;  %v3992_v13 = vld [vmem:[%s6084_s1 + $0x34c] ss:$16 sps:$4 sm:$0xff]  }
  0xbe   :  { %6109 = vst [vmem:[#allocation10_spill] sm:$0xff] %v5224_v2  ;;  %1909 = vmatpush2.bf16.msra.mxu0 %v3975_v11  ;;  %v3990_v11 = vld [vmem:[%s6084_s1 + $0x348] ss:$16 sps:$4 sm:$0xff]  }
  0xbf   :  { %2022 = vmatpush2.bf16.msra.mxu1 %v3978_v60  ;;  %1910 = vmatprep.subr.bf16.mxu0 %v3983_v40  ;;  %v5244_v60 = vpack.c.bf16 %v153_v33, %v146_v49  ;;  %v152_v21 = vld [vmem:[%s6083_s0 + $0x368] sm:$0xff]  ;;  %v147_v40 = vld [vmem:[%s6083_s0 + $0x340] sm:$0xff] }
  0xc0   :  { %2023 = vmatprep.subr.bf16.mxu1 %v3986_v42  ;;  %v154_v42 = vld [vmem:[%s6083_s0 + $0x378] sm:$0xff] }
  0xc1   :  { %6110 = vst [vmem:[#allocation11_spill] sm:$0xff] %v5244_v60  ;;  %1753 = vmatmul.mubr.bf16.gmra.mxu0 %v5222_v59  ;;  %v3995_v33 = vld [vmem:[%s6084_s1 + $0x12c] ss:$16 sps:$4 sm:$0xff]   ;;  %v3996_v59 = vld [vmem:[%s6084_s1 + $0x328] ss:$16 sps:$4 sm:$0xff]  }
  0xc2   :  { %3683 = vmatmul.mubr.msk.bf16.gmra.mxu1 %vm1409_vm0, %v5224_v2  ;;  %1911 = vmatpush2.bf16.msra.mxu0 %v3981_v23  ;;  %v3998_v49 = vld [vmem:[%s6084_s1 + $0x32c] ss:$16 sps:$4 sm:$0xff]   ;;  %v3993_v2 = vld [vmem:[%s6084_s1 + $0x128] ss:$16 sps:$4 sm:$0xff]   ;;  %v5275_v23 = vpack.c.bf16 %v152_v21, %v145_v15 }
  0xc3   :  { %2024 = vmatpush2.bf16.msra.mxu1 %v3984_v43  ;;  %1912 = vmatprep.subr.bf16.mxu0 %v3989_v61  ;;  %v5277_v43 = vpack.c.bf16 %v154_v42, %v147_v40  ;;  %v4001_v61 = vld [vmem:[%s6084_s1 + $0x10c] ss:$16 sps:$4 sm:$0xff]   ;;  %v4002_v15 = vld [vmem:[%s6084_s1 + $0x308] ss:$16 sps:$4 sm:$0xff]   ;;  %v5438_v42 = vld [vmem:[%s6085_s2] sm:$0xf] }
  0xc4   :  { %2025 = vmatprep.subr.bf16.mxu1 %v3992_v13  ;;  %1762 = vmatprep.mubr.bf16.mxu0 %v5244_v60  ;;  %v4004_v13 = vld [vmem:[%s6084_s1 + $0x30c] ss:$16 sps:$4 sm:$0xff]   ;;  %v3999_v60 = vld [vmem:[%s6084_s1 + $0x108] ss:$16 sps:$4 sm:$0xff]   ;;  %6113 = vst [vmem:[#allocation13_spill] sm:$0xff] %v5438_v42 }
  0xc5   :  { %1875 = vmatprep.mubr.bf16.mxu1 %v6111_v31  ;;  %v4005_v21 = vld [vmem:[%s6084_s1 + $0x4e8] ss:$16 sps:$4 sm:$0xff]  }
  0xc6   :  { %1913 = vmatpush2.bf16.msra.mxu0 %v3987_v14  ;;  %v4007_v14 = vld [vmem:[%s6084_s1 + $0x4ec] ss:$16 sps:$4 sm:$0xff]   ;;  %v4008_v40 = vld [vmem:[%s6084_s1 + $0x608] ss:$16 sps:$4 sm:$0xff]  }
  0xc7   :  { %2026 = vmatpush2.bf16.msra.mxu1 %v3990_v11  ;;  %1914 = vmatprep.subr.bf16.mxu0 %v3995_v33  ;;  %v4010_v11 = vld [vmem:[%s6084_s1 + $0x60c] ss:$16 sps:$4 sm:$0xff]  }
  0xc8   :  { %2027 = vmatprep.subr.bf16.mxu1 %v3998_v49 }
  0xc9   :  { %1763 = vmatmul.mubr.bf16.gmra.mxu0 %v5275_v23 }
  0xca   :  { %3684 = vmatmul.mubr.msk.bf16.gmra.mxu1 %vm1409_vm0, %v5277_v43  ;;  %1915 = vmatpush2.bf16.msra.mxu0 %v3993_v2  ;;  %v4052_v2 = vld [vmem:[%s6084_s1 + $0x52c] ss:$16 sps:$4 sm:$0xff]  }
  0xcb   :  { %2028 = vmatpush2.bf16.msra.mxu1 %v3996_v59  ;;  %1916 = vmatprep.subr.bf16.mxu0 %v4001_v61  ;;  %v4013_v59 = vld [vmem:[%s6084_s1 + $0x4cc] ss:$16 sps:$4 sm:$0xff]  }
  0xcc   :  { %2029 = vmatprep.subr.bf16.mxu1 %v4004_v13  ;;  %1918 = vmatprep.mubr.bf16.mxu0 %v4447_v54  ;;  %v4011_v54 = vld [vmem:[%s6084_s1 + $0x4c8] ss:$16 sps:$4 sm:$0xff]  }
  0xcd   :  { %2031 = vmatprep.mubr.bf16.mxu1 %v4449_v55  ;;  %v4016_v55 = vld [vmem:[%s6084_s1 + $0x4ac] ss:$16 sps:$4 sm:$0xff]  }
  0xce   :  { %1917 = vmatpush2.bf16.msra.mxu0 %v3999_v60  ;;  %v4061_v61 = vld [vmem:[#allocation3 + $0x64] ss:$8 sps:$4 sm:$0xff]  }
  0xcf   :  { %2030 = vmatpush2.bf16.msra.mxu1 %v4002_v15  ;;  %2112 = vmatprep.subr.bf16.mxu0 %v4007_v14 }
  0xd0   :  { %2239 = vmatprep.subr.bf16.mxu1 %v4010_v11 }
  0xd1   :  { %1919 = vmatmul.mubr.bf16.vlgmr.msra.gmra.mxu0 %v4525_v16  ;;  %v4014_v16 = vld [vmem:[%s6084_s1 + $0x4a8] ss:$16 sps:$4 sm:$0xff]  }
  0xd2   :  { %2032 = vmatmul.mubr.bf16.vlgmr.msra.gmra.mxu1 %v4527_v17  ;;  %2113 = vmatpush1.bf16.msra.mxu0 %v4005_v21  ;;  %v4019_v17 = vld [vmem:[%s6084_s1 + $0x48c] ss:$16 sps:$4 sm:$0xff]  }
  0xd3   :  { %2240 = vmatpush1.bf16.msra.mxu1 %v4008_v40  ;;  %2114 = vmatprep.subr.bf16.mxu0 %v4013_v59  ;;  %v4059_v40 = vld [vmem:[#allocation3 + $0x60] ss:$8 sps:$4 sm:$0xff]  }
  0xd4   :  { %1928 = vmatprep.mubr.bf16.mxu0 %v4541_v22  ;;  %2041 = vmatprep.mubr.bf16.mxu1 %v4546_v24  ;;  %v4017_v22 = vld [vmem:[%s6084_s1 + $0x488] ss:$16 sps:$4 sm:$0xff]   ;;  %v4022_v24 = vld [vmem:[%s6084_s1 + $0x46c] ss:$16 sps:$4 sm:$0xff]  }
  0xd6   :  { %2115 = vmatpush1.bf16.msra.mxu0 %v4011_v54 }
  0xd7   :  { %2116 = vmatprep.subr.bf16.mxu0 %v4016_v55  ;;  %v4064_v55 = vld [vmem:[#allocation3 + $0x54] ss:$8 sps:$4 sm:$0xff]  }
  0xd9   :  { %1929 = vmatmul.mubr.bf16.gmra.mxu0 %v4579_v34  ;;  %v4020_v34 = vld [vmem:[%s6084_s1 + $0x468] ss:$16 sps:$4 sm:$0xff]  }
  0xda   :  { %2042 = vmatmul.mubr.bf16.gmra.mxu1 %v4581_v35  ;;  %2117 = vmatpush1.bf16.msra.mxu0 %v4014_v16  ;;  %v4025_v35 = vld [vmem:[%s6084_s1 + $0x44c] ss:$16 sps:$4 sm:$0xff]  }
  0xdb   :  { %1938 = vmatprep.mubr.bf16.mxu0 %v4586_v37  ;;  %2118 = vmatprep.subr.bf16.mxu0 %v4019_v17  ;;  %v4023_v37 = vld [vmem:[%s6084_s1 + $0x448] ss:$16 sps:$4 sm:$0xff]  }
  0xdc   :  { %2051 = vmatprep.mubr.bf16.mxu1 %v4591_v39  ;;  %v4028_v39 = vld [vmem:[%s6084_s1 + $0x42c] ss:$16 sps:$4 sm:$0xff]  }
  0xde   :  { %2119 = vmatpush1.bf16.msra.mxu0 %v4017_v22  ;;  %v4062_v22 = vld [vmem:[#allocation3 + $0x50] ss:$8 sps:$4 sm:$0xff]  }
  0xdf   :  { %2120 = vmatprep.subr.bf16.mxu0 %v4022_v24  ;;  %v4067_v24 = vld [vmem:[#allocation3 + $0x44] ss:$8 sps:$4 sm:$0xff]  }
  0xe1   :  { %1939 = vmatmul.mubr.bf16.gmra.mxu0 %v4627_v50  ;;  %v4026_v50 = vld [vmem:[%s6084_s1 + $0x428] ss:$16 sps:$4 sm:$0xff]  }
  0xe2   :  { %2052 = vmatmul.mubr.bf16.gmra.mxu1 %v4629_v51  ;;  %2121 = vmatpush1.bf16.msra.mxu0 %v4020_v34  ;;  %v4031_v51 = vld [vmem:[%s6084_s1 + $0x40c] ss:$16 sps:$4 sm:$0xff]  }
  0xe3   :  { %1948 = vmatprep.mubr.bf16.mxu0 %v4634_v53  ;;  %2122 = vmatprep.subr.bf16.mxu0 %v4025_v35  ;;  %v4029_v53 = vld [vmem:[%s6084_s1 + $0x408] ss:$16 sps:$4 sm:$0xff]  }
  0xe4   :  { %2061 = vmatprep.mubr.bf16.mxu1 %v4639_v57  ;;  %v4034_v57 = vld [vmem:[%s6084_s1 + $0x5ec] ss:$16 sps:$4 sm:$0xff]  }
  0xe6   :  { %2123 = vmatpush1.bf16.msra.mxu0 %v4023_v37 }
  0xe7   :  { %2124 = vmatprep.subr.bf16.mxu0 %v4028_v39 }
  0xe9   :  { %1949 = vmatmul.mubr.bf16.gmra.mxu0 %v4675_v4  ;;  %v4032_v4 = vld [vmem:[%s6084_s1 + $0x5e8] ss:$16 sps:$4 sm:$0xff]  }
  0xea   :  { %2062 = vmatmul.mubr.bf16.gmra.mxu1 %v4677_v5  ;;  %2125 = vmatpush1.bf16.msra.mxu0 %v4026_v50  ;;  %v4037_v5 = vld [vmem:[%s6084_s1 + $0x5cc] ss:$16 sps:$4 sm:$0xff]  }
  0xeb   :  { %1958 = vmatprep.mubr.bf16.mxu0 %v4682_v7  ;;  %2126 = vmatprep.subr.bf16.mxu0 %v4031_v51  ;;  %v4035_v7 = vld [vmem:[%s6084_s1 + $0x5c8] ss:$16 sps:$4 sm:$0xff]  }
  0xec   :  { %2071 = vmatprep.mubr.bf16.mxu1 %v4687_v9  ;;  %v4040_v9 = vld [vmem:[%s6084_s1 + $0x5ac] ss:$16 sps:$4 sm:$0xff]  }
  0xed   :  { %v4065_v51 = vld [vmem:[#allocation3 + $0x40] ss:$8 sps:$4 sm:$0xff]  }
  0xee   :  { %2127 = vmatpush1.bf16.msra.mxu0 %v4029_v53 }
  0xef   :  { %2128 = vmatprep.subr.bf16.mxu0 %v4034_v57 }
  0xf1   :  { %1959 = vmatmul.mubr.bf16.gmra.mxu0 %v4726_v25  ;;  %v4038_v25 = vld [vmem:[%s6084_s1 + $0x5a8] ss:$16 sps:$4 sm:$0xff]  }
  0xf2   :  { %2072 = vmatmul.mubr.bf16.gmra.mxu1 %v4728_v26  ;;  %2129 = vmatpush2.bf16.msra.mxu0 %v4032_v4  ;;  %v4043_v26 = vld [vmem:[%s6084_s1 + $0x58c] ss:$16 sps:$4 sm:$0xff]  }
  0xf3   :  { %1968 = vmatprep.mubr.bf16.mxu0 %v4733_v28  ;;  %2130 = vmatprep.subr.bf16.mxu0 %v4037_v5  ;;  %v4041_v28 = vld [vmem:[%s6084_s1 + $0x588] ss:$16 sps:$4 sm:$0xff]  }
  0xf4   :  { %2081 = vmatprep.mubr.bf16.mxu1 %v4738_v30  ;;  %v4046_v30 = vld [vmem:[%s6084_s1 + $0x56c] ss:$16 sps:$4 sm:$0xff]  }
  0xf5   :  { %v4070_v4 = vld [vmem:[#allocation3 + $0x34] ss:$8 sps:$4 sm:$0xff]  }
  0xf6   :  { %2131 = vmatpush2.bf16.msra.mxu0 %v4035_v7 }
  0xf7   :  { %2132 = vmatprep.subr.bf16.mxu0 %v4040_v9 }
  0xf9   :  { %1969 = vmatmul.mubr.bf16.gmra.mxu0 %v4774_v45  ;;  %v4044_v45 = vld [vmem:[%s6084_s1 + $0x568] ss:$16 sps:$4 sm:$0xff]  }
  0xfa   :  { %2082 = vmatmul.mubr.bf16.gmra.mxu1 %v4776_v46  ;;  %2133 = vmatpush2.bf16.msra.mxu0 %v4038_v25  ;;  %v4049_v46 = vld [vmem:[%s6084_s1 + $0x54c] ss:$16 sps:$4 sm:$0xff]  }
  0xfb   :  { %1978 = vmatprep.mubr.bf16.mxu0 %v4781_v48  ;;  %2134 = vmatprep.subr.bf16.mxu0 %v4043_v26  ;;  %v4047_v48 = vld [vmem:[%s6084_s1 + $0x548] ss:$16 sps:$4 sm:$0xff]  }
  0xfc   :  { %2091 = vmatprep.mubr.bf16.mxu1 %v4786_v52  ;;  %v409_v52 = vlaneseq  ;;  %v4068_v25 = vld [vmem:[#allocation3 + $0x30] ss:$8 sps:$4 sm:$0xff]  }
  0xfe   :  { %2135 = vmatpush2.bf16.msra.mxu0 %v4041_v28  ;;  %v4073_v28 = vld [vmem:[#allocation3 + $0x24] ss:$8 sps:$4 sm:$0xff]  }
  0xff   :  { %2136 = vmatprep.subr.bf16.mxu0 %v4046_v30 }
 0x101   :  { %1979 = vmatmul.mubr.bf16.gmra.mxu0 %v4822_v3  ;;  %v4050_v3 = vld [vmem:[%s6084_s1 + $0x528] ss:$16 sps:$4 sm:$0xff]  }
 0x102   :  { %2092 = vmatmul.mubr.bf16.gmra.mxu1 %v4824_v6  ;;  %2137 = vmatpush2.bf16.msra.mxu0 %v4044_v45  ;;  %v5420_v6 = vshrl.u32 %v409_v52, 7 }
 0x103   :  { %1988 = vmatprep.mubr.bf16.mxu0 %v4829_v10  ;;  %2138 = vmatprep.subr.bf16.mxu0 %v4049_v46  ;;  %v4055_v10 = vld [vmem:[%s6084_s1 + $0x50c] ss:$16 sps:$4 sm:$0xff]  }
 0x104   :  { %2101 = vmatprep.mubr.bf16.mxu1 %v4834_v12  ;;  %v4053_v12 = vld [vmem:[%s6084_s1 + $0x508] ss:$16 sps:$4 sm:$0xff]   ;;  %v5432_v60 = vsub.s32 0, %v5420_v6 }
 0x106   :  { %2139 = vmatpush2.bf16.msra.mxu0 %v4047_v48  ;;  %6112 = vst [vmem:[#allocation12_spill] sm:$0xff] %v5432_v60  ;;  %v5445_v33 = vrot.slane %v5438_v42, %v5432_v60  ;;  %v4106_v48 = vld [vmem:[#allocation3 + $0x174] ss:$8 sps:$4 sm:$0xff]  }
 0x107   :  { %2140 = vmatprep.subr.bf16.mxu0 %v4052_v2  ;;  %3007 = vmatprep.subr.bf16.mxu1 %v4106_v48 }
 0x109   :  { %1989 = vmatmul.mubr.bf16.gmra.mxu0 %v4864_v27  ;;  %v4058_v27 = vld [vmem:[#allocation3 + $0x74] ss:$8 sps:$4 sm:$0xff]  }
 0x10a   :  { %2102 = vmatmul.mubr.bf16.gmra.mxu1 %v4866_v29  ;;  %2141 = vmatpush2.bf16.msra.mxu0 %v4050_v3  ;;  %v5441_v29 = vsub.s32 1, %v5420_v6  ;;  %v4071_v3 = vld [vmem:[#allocation3 + $0x20] ss:$8 sps:$4 sm:$0xff]  }
 0x10b   :  { %2144 = vmatprep.mubr.bf16.mxu0 %v4871_v32  ;;  %2142 = vmatprep.subr.bf16.mxu0 %v4055_v10  ;;  %v4056_v32 = vld [vmem:[#allocation3 + $0x70] ss:$8 sps:$4 sm:$0xff]  }
 0x10c   :  { %2257 = vmatprep.mubr.bf16.mxu1 %v6111_v31  ;;  %6114 = vst [vmem:[#allocation14_spill] sm:$0xff] %v5441_v29  ;;  %v5449_v49 = vrot.slane %v5438_v42, %v5441_v29  ;;  %v4104_v10 = vld [vmem:[#allocation3 + $0x170] ss:$8 sps:$4 sm:$0xff]   ;;  %v4149_v42 = vld [vmem:[#allocation3 + $0x180] ss:$8 sps:$4 sm:$0xff]  }
 0x10e   :  { %2143 = vmatpush2.bf16.msra.mxu0 %v4053_v12 }
 0x10f   :  { %2894 = vmatprep.subr.bf16.mxu0 %v4058_v27 }
 0x111   :  { %v1468_v13 = vpop.f32.mrf.mxu0  ;;  %2145 = vmatmul.mubr.bf16.vlgmr.msra.gmra.mxu0 %v4904_v56 }
 0x112   :  { %v1581_v15 = vpop.f32.mrf.mxu1  ;;  %3685 = vmatmul.mubr.msk.bf16.vlgmr.msra.gmra.mxu1 %vm1409_vm0, %v4906_v58  ;;  %v1469_v14 = vadd.f32 %v1468_v13, %v5445_v33  ;;  %2154 = vmatprep.mubr.bf16.mxu0 %v4923_v0  ;;  %v4109_v13 = vld [vmem:[#allocation3 + $0x164] ss:$8 sps:$4 sm:$0xff]  }
 0x113   :  { %2267 = vmatprep.mubr.bf16.mxu1 %v6111_v31  ;;  %v1470_v11 = vpop.f32.mrf.mxu0  ;;  %2895 = vmatpush1.bf16.msra.mxu0 %v4056_v32 }
 0x114   :  { %v1583_v21 = vpop.f32.mrf.mxu1  ;;  %v5457_v59 = vadd.f32 %v1581_v15, %v1469_v14  ;;  %v1471_v54 = vadd.f32 %v1470_v11, %v5449_v49  ;;  %2896 = vmatprep.subr.bf16.mxu0 %v4061_v61  ;;  %3008 = vmatpush1.bf16.msra.mxu1 %v4104_v10  ;;  %v4074_v11 = vld [vmem:[#allocation3 + $0x10] ss:$8 sps:$4 sm:$0xff]  }
 0x115   :  { %v5460_v56 = vpop.f32.mrf.mxu0  ;;  %3009 = vmatprep.subr.bf16.mxu1 %v4109_v13 }
 0x116   :  { %v5462_v16 = vpop.f32.mrf.mxu1  ;;  %v5464_v58 = vadd.f32 %v1583_v21, %v1471_v54  ;;  %v4107_v21 = vld [vmem:[#allocation3 + $0x160] ss:$8 sps:$4 sm:$0xff]   ;;  %v4079_v54 = vld [vmem:[#allocation3 + $0x4] ss:$8 sps:$4 sm:$0xff]  }
 0x117   :  { %v5466_v17 = vpop.f32.mrf.mxu0  ;;  %2897 = vmatpush1.bf16.msra.mxu0 %v4059_v40 }
 0x118   :  { %v5468_v0 = vpop.f32.mrf.mxu1  ;;  %2898 = vmatprep.subr.bf16.mxu0 %v4064_v55  ;;  %3010 = vmatpush1.bf16.msra.mxu1 %v4107_v21  ;;  %v4121_v21 = vld [vmem:[#allocation3 + $0x124] ss:$8 sps:$4 sm:$0xff]  }
 0x119   :  { %v1478_v34 = vpop.f32.mrf.mxu0  ;;  %2155 = vmatmul.mubr.bf16.gmra.mxu0 %v4954_v19 }
 0x11a   :  { %v1591_v35 = vpop.f32.mrf.mxu1  ;;  %3686 = vmatmul.mubr.msk.bf16.gmra.mxu1 %vm1409_vm0, %v4956_v20  ;;  %v1479_v37 = vadd.f32 %v1478_v34, %v5445_v33  ;;  %2164 = vmatprep.mubr.bf16.mxu0 %v4979_v41  ;;  %v4112_v34 = vld [vmem:[#allocation3 + $0x154] ss:$8 sps:$4 sm:$0xff]  }
 0x11b   :  { %2277 = vmatprep.mubr.bf16.mxu1 %v6111_v31  ;;  %v1480_v39 = vpop.f32.mrf.mxu0  ;;  %2899 = vmatpush1.bf16.msra.mxu0 %v4062_v22 }
 0x11c   :  { %v1593_v50 = vpop.f32.mrf.mxu1  ;;  %v5476_v53 = vadd.f32 %v1591_v35, %v1479_v37  ;;  %v1481_v57 = vadd.f32 %v1480_v39, %v5449_v49  ;;  %2900 = vmatprep.subr.bf16.mxu0 %v4067_v24  ;;  %v4077_v39 = vld [vmem:[#allocation3] ss:$8 sps:$4 sm:$0xff]   ;;  %3011 = vmatprep.subr.bf16.mxu1 %v4112_v34 }
 0x11d   :  { %v1482_v19 = vpop.f32.mrf.mxu0 }
 0x11e   :  { %v1595_v5 = vpop.f32.mrf.mxu1  ;;  %v5479_v7 = vadd.f32 %v1593_v50, %v1481_v57  ;;  %v1483_v20 = vadd.f32 %v1482_v19, %v5445_v33  ;;  %v4110_v50 = vld [vmem:[#allocation3 + $0x150] ss:$8 sps:$4 sm:$0xff]   ;;  %v4082_v57 = vld [vmem:[#allocation3 + $0xf4] ss:$8 sps:$4 sm:$0xff]  }
 0x11f   :  { %v5482_v9 = vpop.f32.mrf.mxu0  ;;  %2901 = vmatpush1.bf16.msra.mxu0 %v4065_v51  ;;  %3012 = vmatpush1.bf16.msra.mxu1 %v4110_v50  ;;  %v6115_v50 = vld [vmem:[#allocation6_spill] sm:$0xff] }
 0x120   :  { %v5484_v41 = vpop.f32.mrf.mxu1  ;;  %v5486_v26 = vadd.f32 %v1595_v5, %v1483_v20  ;;  %2902 = vmatprep.subr.bf16.mxu0 %v4070_v4  ;;  %v4115_v5 = vld [vmem:[#allocation3 + $0x144] ss:$8 sps:$4 sm:$0xff]  }
 0x121   :  { %v1488_v30 = vpop.f32.mrf.mxu0  ;;  %2165 = vmatmul.mubr.bf16.gmra.mxu0 %v5010_v63  ;;  %v4076_v63 = vld [vmem:[#allocation3 + $0x14] ss:$8 sps:$4 sm:$0xff]   ;;  %3013 = vmatprep.subr.bf16.mxu1 %v4115_v5 }
 0x122   :  { %v1601_v45 = vpop.f32.mrf.mxu1  ;;  %3687 = vmatmul.mubr.msk.bf16.gmra.mxu1 %vm1409_vm0, %v5012_v1  ;;  %v1489_v46 = vadd.f32 %v1488_v30, %v5445_v33  ;;  %2174 = vmatprep.mubr.bf16.mxu0 %v5032_v18  ;;  %v4113_v30 = vld [vmem:[#allocation3 + $0x140] ss:$8 sps:$4 sm:$0xff]  }
 0x123   :  { %2287 = vmatprep.mubr.bf16.mxu1 %v6111_v31  ;;  %v1490_v52 = vpop.f32.mrf.mxu0  ;;  %2903 = vmatpush1.bf16.msra.mxu0 %v4068_v25 }
 0x124   :  { %v1603_v2 = vpop.f32.mrf.mxu1  ;;  %v5494_v12 = vadd.f32 %v1601_v45, %v1489_v46  ;;  %v1491_v27 = vadd.f32 %v1490_v52, %v5449_v49  ;;  %2904 = vmatprep.subr.bf16.mxu0 %v4073_v28  ;;  %v4080_v28 = vld [vmem:[#allocation3 + $0xf0] ss:$8 sps:$4 sm:$0xff]   ;;  %v4085_v46 = vld [vmem:[#allocation3 + $0xe4] ss:$8 sps:$4 sm:$0xff]   ;;  %3014 = vmatpush1.bf16.msra.mxu1 %v4113_v30 }
 0x125   :  { %v1492_v1 = vpop.f32.mrf.mxu0  ;;  %v4122_v30 = vld [vmem:[#allocation3 + $0x110] ss:$8 sps:$4 sm:$0xff]  }
 0x126   :  { %v1605_v32 = vpop.f32.mrf.mxu1  ;;  %v5497_v61 = vadd.f32 %v1603_v2, %v1491_v27  ;;  %v1493_v18 = vadd.f32 %v1492_v1, %v5445_v33  ;;  %v4116_v1 = vld [vmem:[#allocation3 + $0x130] ss:$8 sps:$4 sm:$0xff]  }
 0x127   :  { %v5500_v15 = vpop.f32.mrf.mxu0  ;;  %2905 = vmatpush1.bf16.msra.mxu0 %v4071_v3  ;;  %v4118_v3 = vld [vmem:[#allocation3 + $0x134] ss:$8 sps:$4 sm:$0xff]  }
 0x128   :  { %v5502_v14 = vpop.f32.mrf.mxu1  ;;  %v5504_v40 = vadd.f32 %v1605_v32, %v1493_v18  ;;  %2906 = vmatprep.subr.bf16.mxu0 %v4076_v63  ;;  %v4083_v63 = vld [vmem:[#allocation3 + $0xe0] ss:$8 sps:$4 sm:$0xff]   ;;  %v4088_v18 = vld [vmem:[#allocation3 + $0xd4] ss:$8 sps:$4 sm:$0xff]   ;;  %3015 = vmatprep.subr.bf16.mxu1 %v4118_v3 }
 0x129   :  { %v1498_v55 = vpop.f32.mrf.mxu0  ;;  %2175 = vmatmul.mubr.bf16.gmra.mxu0 %v5063_v44  ;;  %3016 = vmatpush1.bf16.msra.mxu1 %v4116_v1 }
 0x12a   :  { %v1611_v22 = vpop.f32.mrf.mxu1  ;;  %3688 = vmatmul.mubr.msk.bf16.gmra.mxu1 %vm1409_vm0, %v5065_v47  ;;  %v1499_v24 = vadd.f32 %v1498_v55, %v5445_v33  ;;  %2184 = vmatprep.mubr.bf16.mxu0 %v5085_v8 }
 0x12b   :  { %2297 = vmatprep.mubr.bf16.mxu1 %v6111_v31  ;;  %v1500_v35 = vpop.f32.mrf.mxu0  ;;  %2907 = vmatpush1.bf16.msra.mxu0 %v4074_v11 }
 0x12c   :  { %v1613_v37 = vpop.f32.mrf.mxu1  ;;  %v5512_v51 = vadd.f32 %v1611_v22, %v1499_v24  ;;  %v1501_v44 = vadd.f32 %v1500_v35, %v5449_v49  ;;  %2908 = vmatprep.subr.bf16.mxu0 %v4079_v54  ;;  %v4086_v22 = vld [vmem:[#allocation3 + $0xd0] ss:$8 sps:$4 sm:$0xff]   ;;  %v4119_v24 = vld [vmem:[#allocation3 + $0x120] ss:$8 sps:$4 sm:$0xff]   ;;  %v4091_v35 = vld [vmem:[#allocation3 + $0xc4] ss:$8 sps:$4 sm:$0xff]   ;;  %3017 = vmatprep.subr.bf16.mxu1 %v4121_v21 }
 0x12d   :  { %v1502_v47 = vpop.f32.mrf.mxu0  ;;  %3018 = vmatpush1.bf16.msra.mxu1 %v4119_v24  ;;  %v6118_v24 = vld [vmem:[#allocation9_spill] sm:$0xff] }
 0x12e   :  { %v1615_v4 = vpop.f32.mrf.mxu1  ;;  %v5515_v19 = vadd.f32 %v1613_v37, %v1501_v44  ;;  %v1503_v8 = vadd.f32 %v1502_v47, %v5445_v33  ;;  %v6116_v44 = vld [vmem:[#allocation7_spill] sm:$0xff]  ;;  %v6117_v47 = vld [vmem:[#allocation8_spill] sm:$0xff] }
 0x12f   :  { %v5518_v20 = vpop.f32.mrf.mxu0  ;;  %2909 = vmatpush1.bf16.msra.mxu0 %v4077_v39 }
 0x130   :  { %v5520_v25 = vpop.f32.mrf.mxu1  ;;  %v5522_v45 = vadd.f32 %v1615_v4, %v1503_v8  ;;  %2910 = vmatprep.subr.bf16.mxu0 %v4082_v57  ;;  %v4124_v4 = vld [vmem:[#allocation3 + $0x114] ss:$8 sps:$4 sm:$0xff]  }
 0x131   :  { %v1508_v48 = vpop.f32.mrf.mxu0  ;;  %2185 = vmatmul.mubr.bf16.gmra.mxu0 %v5116_v36  ;;  %3019 = vmatprep.subr.bf16.mxu1 %v4124_v4  ;;  %v4128_v4 = vld [vmem:[#allocation3 + $0x1f0] ss:$8 sps:$4 sm:$0xff]  }
 0x132   :  { %v1621_v52 = vpop.f32.mrf.mxu1  ;;  %3689 = vmatmul.mubr.msk.bf16.gmra.mxu1 %vm1409_vm0, %v5118_v38  ;;  %v1509_v2 = vadd.f32 %v1508_v48, %v5445_v33  ;;  %2194 = vmatprep.mubr.bf16.mxu0 %v5138_v62 }
 0x133   :  { %2307 = vmatprep.mubr.bf16.mxu1 %v6111_v31  ;;  %v1510_v10 = vpop.f32.mrf.mxu0  ;;  %2911 = vmatpush2.bf16.msra.mxu0 %v4080_v28  ;;  %v4089_v28 = vld [vmem:[#allocation3 + $0xc0] ss:$8 sps:$4 sm:$0xff]  }
 0x134   :  { %v1623_v27 = vpop.f32.mrf.mxu1  ;;  %v5530_v32 = vadd.f32 %v1621_v52, %v1509_v2  ;;  %v1511_v36 = vadd.f32 %v1510_v10, %v5449_v49  ;;  %2912 = vmatprep.subr.bf16.mxu0 %v4085_v46  ;;  %v4094_v52 = vld [vmem:[#allocation3 + $0xb4] ss:$8 sps:$4 sm:$0xff]   ;;  %3020 = vmatpush1.bf16.msra.mxu1 %v4122_v30 }
 0x135   :  { %v1512_v38 = vpop.f32.mrf.mxu0 }
 0x136   :  { %v1625_v13 = vpop.f32.mrf.mxu1  ;;  %v5533_v11 = vadd.f32 %v1623_v27, %v1511_v36  ;;  %v1513_v62 = vadd.f32 %v1512_v38, %v5445_v33  ;;  %v4125_v38 = vld [vmem:[#allocation3 + $0x100] ss:$8 sps:$4 sm:$0xff]  }
 0x137   :  { %v5536_v54 = vpop.f32.mrf.mxu0  ;;  %2913 = vmatpush2.bf16.msra.mxu0 %v4083_v63  ;;  %v4127_v63 = vld [vmem:[#allocation3 + $0x104] ss:$8 sps:$4 sm:$0xff]  }
 0x138   :  { %v5538_v55 = vpop.f32.mrf.mxu1  ;;  %v5540_v34 = vadd.f32 %v1625_v13, %v1513_v62  ;;  %2914 = vmatprep.subr.bf16.mxu0 %v4088_v18  ;;  %v4092_v18 = vld [vmem:[#allocation3 + $0xb0] ss:$8 sps:$4 sm:$0xff]   ;;  %v4097_v62 = vld [vmem:[#allocation3 + $0xa4] ss:$8 sps:$4 sm:$0xff]   ;;  %3021 = vmatprep.subr.bf16.mxu1 %v4127_v63 }
 0x139   :  { %v1518_v37 = vpop.f32.mrf.mxu0  ;;  %2195 = vmatmul.mubr.bf16.gmra.mxu0 %v6115_v50  ;;  %v4130_v50 = vld [vmem:[#allocation3 + $0x1f4] ss:$8 sps:$4 sm:$0xff]   ;;  %3022 = vmatpush1.bf16.msra.mxu1 %v4125_v38  ;;  %v4098_v63 = vld [vmem:[#allocation3 + $0x90] ss:$8 sps:$4 sm:$0xff]  }
 0x13a   :  { %v1631_v39 = vpop.f32.mrf.mxu1  ;;  %3690 = vmatmul.mubr.msk.bf16.gmra.mxu1 %vm1409_vm0, %v6116_v44  ;;  %v1519_v57 = vadd.f32 %v1518_v37, %v5445_v33  ;;  %2204 = vmatprep.mubr.bf16.mxu0 %v6117_v47  ;;  %v4095_v47 = vld [vmem:[#allocation3 + $0xa0] ss:$8 sps:$4 sm:$0xff]  }
 0x13b   :  { %2317 = vmatprep.mubr.bf16.mxu1 %v6111_v31  ;;  %v1520_v8 = vpop.f32.mrf.mxu0  ;;  %2915 = vmatpush2.bf16.msra.mxu0 %v4086_v22 }
 0x13c   :  { %v1633_v5 = vpop.f32.mrf.mxu1  ;;  %v5548_v46 = vadd.f32 %v1631_v39, %v1519_v57  ;;  %v1521_v48 = vadd.f32 %v1520_v8, %v5449_v49  ;;  %2916 = vmatprep.subr.bf16.mxu0 %v4091_v35  ;;  %v6119_v35 = vld [vmem:[#allocation10_spill] sm:$0xff]  ;;  %v6120_v39 = vld [vmem:[#allocation11_spill] sm:$0xff]  ;;  %3023 = vmatprep.subr.bf16.mxu1 %v4130_v50 }
 0x13d   :  { %v1522_v2 = vpop.f32.mrf.mxu0  ;;  %3024 = vmatpush2.bf16.msra.mxu1 %v4128_v4  ;;  %v4101_v50 = vld [vmem:[#allocation3 + $0x80] ss:$8 sps:$4 sm:$0xff]  }
 0x13e   :  { %v1635_v3 = vpop.f32.mrf.mxu1  ;;  %v5551_v10 = vadd.f32 %v1633_v5, %v1521_v48  ;;  %v1523_v27 = vadd.f32 %v1522_v2, %v5445_v33  ;;  %v4133_v2 = vld [vmem:[#allocation3 + $0x1e4] ss:$8 sps:$4 sm:$0xff]  }
 0x13f   :  { %v5554_v1 = vpop.f32.mrf.mxu0  ;;  %2917 = vmatpush2.bf16.msra.mxu0 %v4089_v28  ;;  %v4100_v28 = vld [vmem:[#allocation3 + $0x94] ss:$8 sps:$4 sm:$0xff]   ;;  %3025 = vmatprep.subr.bf16.mxu1 %v4133_v2  ;;  %v1473_v2 = vadd.f32 %v5460_v56, %v5445_v33 }
 0x140   :  { %v5556_v36 = vpop.f32.mrf.mxu1  ;;  %v5558_v13 = vadd.f32 %v1635_v3, %v1523_v27  ;;  %2918 = vmatprep.subr.bf16.mxu0 %v4094_v52 }
 0x141   :  { %v1528_v21 = vpop.f32.mrf.mxu0  ;;  %2205 = vmatmul.mubr.bf16.gmra.mxu0 %v6118_v24 }
 0x142   :  { %v1641_v22 = vpop.f32.mrf.mxu1  ;;  %3691 = vmatmul.mubr.msk.bf16.gmra.mxu1 %vm1409_vm0, %v6119_v35  ;;  %v1529_v37 = vadd.f32 %v1528_v21, %v5445_v33  ;;  %2214 = vmatprep.mubr.bf16.mxu0 %v6120_v39  ;;  %v4136_v35 = vld [vmem:[#allocation3 + $0x1d4] ss:$8 sps:$4 sm:$0xff]  }
 0x143   :  { %2327 = vmatprep.mubr.bf16.mxu1 %v6111_v31  ;;  %v1530_v44 = vpop.f32.mrf.mxu0  ;;  %2919 = vmatpush2.bf16.msra.mxu0 %v4092_v18  ;;  %v4131_v18 = vld [vmem:[#allocation3 + $0x1e0] ss:$8 sps:$4 sm:$0xff]  }
 0x144   :  { %v1643_v57 = vpop.f32.mrf.mxu1  ;;  %v5566_v8 = vadd.f32 %v1641_v22, %v1529_v37  ;;  %v1531_v5 = vadd.f32 %v1530_v44, %v5449_v49  ;;  %2920 = vmatprep.subr.bf16.mxu0 %v4097_v62  ;;  %v4103_v62 = vld [vmem:[#allocation3 + $0x84] ss:$8 sps:$4 sm:$0xff]   ;;  %3026 = vmatpush2.bf16.msra.mxu1 %v4131_v18  ;;  %v4134_v44 = vld [vmem:[#allocation3 + $0x1d0] ss:$8 sps:$4 sm:$0xff]  }
 0x145   :  { %v1532_v30 = vpop.f32.mrf.mxu0  ;;  %3027 = vmatprep.subr.bf16.mxu1 %v4136_v35 }
 0x146   :  { %v1645_v48 = vpop.f32.mrf.mxu1  ;;  %v5569_v52 = vadd.f32 %v1643_v57, %v1531_v5  ;;  %v1533_v31 = vadd.f32 %v1532_v30, %v5445_v33 }
 0x147   :  { %v5572_v3 = vpop.f32.mrf.mxu0  ;;  %2921 = vmatpush2.bf16.msra.mxu0 %v4095_v47 }
 0x148   :  { %v5574_v27 = vpop.f32.mrf.mxu1  ;;  %v5576_v38 = vadd.f32 %v1645_v48, %v1533_v31  ;;  %2922 = vmatprep.subr.bf16.mxu0 %v4100_v28  ;;  %v4139_v28 = vld [vmem:[#allocation3 + $0x1c4] ss:$8 sps:$4 sm:$0xff]   ;;  %3028 = vmatpush2.bf16.msra.mxu1 %v4134_v44  ;;  %v4137_v31 = vld [vmem:[#allocation3 + $0x1c0] ss:$8 sps:$4 sm:$0xff]  }
 0x149   :  { %v1538_v21 = vpop.f32.mrf.mxu0  ;;  %2215 = vmatmul.mubr.bf16.gmra.mxu0 %v5275_v23  ;;  %3029 = vmatprep.subr.bf16.mxu1 %v4139_v28 }
 0x14a   :  { %v1651_v22 = vpop.f32.mrf.mxu1  ;;  %3692 = vmatmul.mubr.msk.bf16.gmra.mxu1 %vm1409_vm0, %v5277_v43  ;;  %v1539_v24 = vadd.f32 %v1538_v21, %v5445_v33  ;;  %v1475_v21 = vadd.f32 %v5466_v17, %v5449_v49 }
 0x14b   :  { %v1540_v37 = vpop.f32.mrf.mxu0  ;;  %2923 = vmatpush2.bf16.msra.mxu0 %v4098_v63 }
 0x14c   :  { %v1653_v39 = vpop.f32.mrf.mxu1  ;;  %v5582_v57 = vadd.f32 %v1651_v22, %v1539_v24  ;;  %v1541_v47 = vadd.f32 %v1540_v37, %v5449_v49  ;;  %2924 = vmatprep.subr.bf16.mxu0 %v4103_v62  ;;  %v4142_v22 = vld [vmem:[#allocation3 + $0x1b4] ss:$8 sps:$4 sm:$0xff]   ;;  %3030 = vmatpush2.bf16.msra.mxu1 %v4137_v31 }
 0x14d   :  { %v1542_v4 = vpop.f32.mrf.mxu0  ;;  %3031 = vmatprep.subr.bf16.mxu1 %v4142_v22 }
 0x14e   :  { %v1655_v23 = vpop.f32.mrf.mxu1  ;;  %v5585_v5 = vadd.f32 %v1653_v39, %v1541_v47  ;;  %v1543_v43 = vadd.f32 %v1542_v4, %v5445_v33  ;;  %v4140_v39 = vld [vmem:[#allocation3 + $0x1b0] ss:$8 sps:$4 sm:$0xff]   ;;  %v1588_v47 = vadd.f32 %v5468_v0, %v1475_v21  ;;  %v4148_v21 = vld [vmem:[#allocation3 + $0x194] ss:$8 sps:$4 sm:$0xff]  }
 0x14f   :  { %v5588_v30 = vpop.f32.mrf.mxu0  ;;  %2925 = vmatpush2.bf16.msra.mxu0 %v4101_v50  ;;  %v1586_v50 = vadd.f32 %v5462_v16, %v1473_v2  ;;  %v1485_v16 = vadd.f32 %v5482_v9, %v5449_v49 }
 0x150   :  { %v5590_v48 = vpop.f32.mrf.mxu1  ;;  %v5594_v63 = vadd.f32 %v1655_v23, %v1543_v43  ;;  %v4145_v43 = vld [vmem:[#allocation3 + $0x1a4] ss:$8 sps:$4 sm:$0xff]   ;;  %3032 = vmatpush2.bf16.msra.mxu1 %v4140_v39  ;;  %v4146_v39 = vld [vmem:[#allocation3 + $0x190] ss:$8 sps:$4 sm:$0xff]  }
 0x151   :  { %6121 = vst [vmem:[#allocation6_spill] sm:$0xff] %v5590_v48  ;;  %v1694_v18 = vpop.f32.mrf.mxu0  ;;  %3033 = vmatprep.subr.bf16.mxu1 %v4145_v43 }
 0x152   :  { %6122 = vst [vmem:[#allocation7_spill] sm:$0xff] %v5594_v63  ;;  %v1807_v62 = vpop.f32.mrf.mxu1  ;;  %v1695_v24 = vadd.f32 %v1694_v18, %v5457_v59  ;;  %v4143_v59 = vld [vmem:[#allocation3 + $0x1a0] ss:$8 sps:$4 sm:$0xff]  }
 0x153   :  { %v1696_v35 = vpop.f32.mrf.mxu0 }
 0x154   :  { %v1809_v37 = vpop.f32.mrf.mxu1  ;;  %v1697_v44 = vadd.f32 %v1696_v35, %v5464_v58  ;;  %v1808_v17 = vadd.f32 %v1807_v62, %v1695_v24  ;;  %3034 = vmatpush2.bf16.msra.mxu1 %v4143_v59 }
 0x155   :  { %v1698_v33 = vpop.f32.mrf.mxu0  ;;  %3035 = vmatprep.subr.bf16.mxu1 %v4148_v21 }
 0x156   :  { %v1811_v56 = vpop.f32.mrf.mxu1  ;;  %v1810_v4 = vadd.f32 %v1809_v37, %v1697_v44  ;;  %v1699_v23 = vadd.f32 %v1698_v33, %v1586_v50  ;;  %v2338_v37 = vmul.f32 0.2, %v1808_v17 }
 0x157   :  { %v1700_v28 = vpop.f32.mrf.mxu0 }
 0x158   :  { %v1813_v29 = vpop.f32.mrf.mxu1  ;;  %v1812_v18 = vadd.f32 %v1811_v56, %v1699_v23  ;;  %v1701_v31 = vadd.f32 %v1700_v28, %v1588_v47  ;;  %v2339_v22 = vmul.f32 0.2, %v1810_v4  ;;  %v1598_v23 = vadd.f32 %v5484_v41, %v1485_v16  ;;  %v4151_v28 = vld [vmem:[#allocation3 + $0x184] ss:$8 sps:$4 sm:$0xff]   ;;  %3036 = vmatpush2.bf16.msra.mxu1 %v4146_v39 }
 0x159   :  { %v1704_v58 = vpop.f32.mrf.mxu0  ;;  %3037 = vmatprep.subr.bf16.mxu1 %v4151_v28 }
 0x15a   :  { %v1817_v2 = vpop.f32.mrf.mxu1  ;;  %v2342_v35 = vmul.f32 0.2, %v1812_v18  ;;  %v1814_v60 = vadd.f32 %v1813_v29, %v1701_v31  ;;  %v1705_v0 = vadd.f32 %v1704_v58, %v5476_v53  ;;  %v2403_v43 = vmax.f32 %v1810_v4, %v2339_v22 }
 0x15b   :  { %v1706_v62 = vpop.f32.mrf.mxu0  ;;  %v2402_v53 = vmax.f32 %v1808_v17, %v2338_v37 }
 0x15c   :  { %v1819_v24 = vpop.f32.mrf.mxu1  ;;  %v2343_v50 = vmul.f32 0.2, %v1814_v60  ;;  %v1707_v44 = vadd.f32 %v1706_v62, %v5479_v7  ;;  %v2406_v33 = vmax.f32 %v1812_v18, %v2342_v35  ;;  %v1818_v56 = vadd.f32 %v1817_v2, %v1705_v0  ;;  %3038 = vmatpush2.bf16.msra.mxu1 %v4149_v42 }
 0x15d   :  { %v1708_v9 = vpop.f32.mrf.mxu0 }
 0x15e   :  { %v1821_v47 = vpop.f32.mrf.mxu1  ;;  %v2407_v29 = vmax.f32 %v1814_v60, %v2343_v50  ;;  %v1820_v31 = vadd.f32 %v1819_v24, %v1707_v44  ;;  %v1709_v58 = vadd.f32 %v1708_v9, %v5486_v26  ;;  %v2466_v18 = vpack.c.bf16 %v2406_v33, %v2402_v53 }
 0x15f   :  { %v1710_v63 = vpop.f32.mrf.mxu0  ;;  %v2346_v2 = vmul.f32 0.2, %v1818_v56  ;;  %v1495_v60 = vadd.f32 %v5500_v15, %v5449_v49 }
 0x160   :  { %v1823_v59 = vpop.f32.mrf.mxu1  ;;  %v1711_v48 = vadd.f32 %v1710_v63, %v1598_v23  ;;  %v2467_v7 = vpack.c.bf16 %v2407_v29, %v2403_v43  ;;  %v1822_v35 = vadd.f32 %v1821_v47, %v1709_v58  ;;  %v2347_v26 = vmul.f32 0.2, %v1820_v31 }
 0x161   :  { %v1714_v0 = vpop.f32.mrf.mxu0  ;;  %v2410_v24 = vmax.f32 %v1818_v56, %v2346_v2  ;;  %v1608_v15 = vadd.f32 %v5502_v14, %v1495_v60 }
 0x162   :  { %v1827_v21 = vpop.f32.mrf.mxu1  ;;  %v1824_v41 = vadd.f32 %v1823_v59, %v1711_v48  ;;  %v1715_v4 = vadd.f32 %v1714_v0, %v5494_v12  ;;  %2926 = vmatprep.mubr.bf16.mxu0 %v2467_v7  ;;  %v2350_v17 = vmul.f32 0.2, %v1822_v35  ;;  %v2411_v9 = vmax.f32 %v1820_v31, %v2347_v26 }
 0x163   :  { %v1716_v16 = vpop.f32.mrf.mxu0  ;;  %2927 = vmatmul.mubr.bf16.vlgmr.msra.gmra.mxu0 %v2466_v18 }
 0x164   :  { %v1829_v22 = vpop.f32.mrf.mxu1  ;;  %v2351_v63 = vmul.f32 0.2, %v1824_v41  ;;  %v1828_v37 = vadd.f32 %v1827_v21, %v1715_v4  ;;  %v1717_v62 = vadd.f32 %v1716_v16, %v5497_v61  ;;  %v2414_v39 = vmax.f32 %v1822_v35, %v2350_v17 }
 0x165   :  { %v1718_v50 = vpop.f32.mrf.mxu0  ;;  %v1505_v61 = vadd.f32 %v5518_v20, %v5449_v49 }
 0x166   :  { %v1831_v44 = vpop.f32.mrf.mxu1  ;;  %v2415_v48 = vmax.f32 %v1824_v41, %v2351_v63  ;;  %v1830_v33 = vadd.f32 %v1829_v22, %v1717_v62  ;;  %v1719_v12 = vadd.f32 %v1718_v50, %v5504_v40  ;;  %v2470_v47 = vpack.c.bf16 %v2414_v39, %v2410_v24 }
 0x167   :  { %v1720_v23 = vpop.f32.mrf.mxu0  ;;  %v2354_v29 = vmul.f32 0.2, %v1828_v37  ;;  %v1618_v4 = vadd.f32 %v5520_v25, %v1505_v61 }
 0x168   :  { %v1833_v43 = vpop.f32.mrf.mxu1  ;;  %v1832_v42 = vadd.f32 %v1831_v44, %v1719_v12  ;;  %v1721_v28 = vadd.f32 %v1720_v23, %v1608_v15  ;;  %v2471_v58 = vpack.c.bf16 %v2415_v48, %v2411_v9  ;;  %v2355_v59 = vmul.f32 0.2, %v1830_v33 }
 0x169   :  { %v1724_v56 = vpop.f32.mrf.mxu0  ;;  %v2418_v2 = vmax.f32 %v1828_v37, %v2354_v29  ;;  %v1515_v15 = vadd.f32 %v5536_v54, %v5449_v49 }
 0x16a   :  { %v1837_v53 = vpop.f32.mrf.mxu1  ;;  %v2358_v7 = vmul.f32 0.2, %v1832_v42  ;;  %v1834_v14 = vadd.f32 %v1833_v43, %v1721_v28  ;;  %v1725_v18 = vadd.f32 %v1724_v56, %v5512_v51  ;;  %2936 = vmatprep.mubr.bf16.mxu0 %v2471_v58  ;;  %v2419_v26 = vmax.f32 %v1830_v33, %v2355_v59 }
 0x16b   :  { %v1726_v40 = vpop.f32.mrf.mxu0  ;;  %2937 = vmatmul.mubr.bf16.gmra.mxu0 %v2470_v47  ;;  %v1628_v56 = vadd.f32 %v5538_v55, %v1515_v15 }
 0x16c   :  { %v1839_v31 = vpop.f32.mrf.mxu1  ;;  %v2422_v35 = vmax.f32 %v1832_v42, %v2358_v7  ;;  %v2359_v0 = vmul.f32 0.2, %v1834_v14  ;;  %v1727_v21 = vadd.f32 %v1726_v40, %v5515_v19  ;;  %v1838_v60 = vadd.f32 %v1837_v53, %v1725_v18 }
 0x16d   :  { %v1728_v41 = vpop.f32.mrf.mxu0 }
 0x16e   :  { %v1841_v20 = vpop.f32.mrf.mxu1  ;;  %v2474_v17 = vpack.c.bf16 %v2422_v35, %v2418_v2  ;;  %v2423_v16 = vmax.f32 %v1834_v14, %v2359_v0  ;;  %v1840_v22 = vadd.f32 %v1839_v31, %v1727_v21  ;;  %v1729_v51 = vadd.f32 %v1728_v41, %v5522_v45 }
 0x16f   :  { %v1730_v63 = vpop.f32.mrf.mxu0  ;;  %v2362_v39 = vmul.f32 0.2, %v1838_v60 }
 0x170   :  { %v1843_v62 = vpop.f32.mrf.mxu1  ;;  %v1731_v24 = vadd.f32 %v1730_v63, %v1618_v4  ;;  %v2475_v37 = vpack.c.bf16 %v2423_v16, %v2419_v26  ;;  %v1842_v50 = vadd.f32 %v1841_v20, %v1729_v51  ;;  %v2363_v33 = vmul.f32 0.2, %v1840_v22 }
 0x171   :  { %v1734_v44 = vpop.f32.mrf.mxu0  ;;  %v2426_v29 = vmax.f32 %v1838_v60, %v2362_v39 }
 0x172   :  { %v1847_v19 = vpop.f32.mrf.mxu1  ;;  %v1844_v48 = vadd.f32 %v1843_v62, %v1731_v24  ;;  %v1735_v25 = vadd.f32 %v1734_v44, %v5530_v32  ;;  %2946 = vmatprep.mubr.bf16.mxu0 %v2475_v37  ;;  %v2366_v12 = vmul.f32 0.2, %v1842_v50  ;;  %v2427_v58 = vmax.f32 %v1840_v22, %v2363_v33 }
 0x173   :  { %v1736_v9 = vpop.f32.mrf.mxu0  ;;  %2947 = vmatmul.mubr.bf16.gmra.mxu0 %v2474_v17 }
 0x174   :  { %v1849_v47 = vpop.f32.mrf.mxu1  ;;  %v2367_v45 = vmul.f32 0.2, %v1844_v48  ;;  %v1848_v23 = vadd.f32 %v1847_v19, %v1735_v25  ;;  %v1737_v43 = vadd.f32 %v1736_v9, %v5533_v11  ;;  %v2430_v42 = vmax.f32 %v1842_v50, %v2366_v12 }
 0x175   :  { %v1738_v28 = vpop.f32.mrf.mxu0  ;;  %v1525_v11 = vadd.f32 %v5554_v1, %v5449_v49  ;;  %v1535_v12 = vadd.f32 %v5572_v3, %v5449_v49 }
 0x176   :  { %v1851_v61 = vpop.f32.mrf.mxu1  ;;  %v2431_v54 = vmax.f32 %v1844_v48, %v2367_v45  ;;  %v1850_v53 = vadd.f32 %v1849_v47, %v1737_v43  ;;  %v1739_v32 = vadd.f32 %v1738_v28, %v5540_v34  ;;  %v2478_v59 = vpack.c.bf16 %v2430_v42, %v2426_v29 }
 0x177   :  { %v1740_v7 = vpop.f32.mrf.mxu0  ;;  %v2370_v18 = vmul.f32 0.2, %v1848_v23  ;;  %v1638_v63 = vadd.f32 %v5556_v36, %v1525_v11 }
 0x178   :  { %v1853_v14 = vpop.f32.mrf.mxu1  ;;  %v1852_v40 = vadd.f32 %v1851_v61, %v1739_v32  ;;  %v1741_v31 = vadd.f32 %v1740_v7, %v1628_v56  ;;  %v2479_v0 = vpack.c.bf16 %v2431_v54, %v2427_v58  ;;  %v2371_v21 = vmul.f32 0.2, %v1850_v53 }
 0x179   :  { %v1744_v2 = vpop.f32.mrf.mxu0  ;;  %v2434_v4 = vmax.f32 %v1848_v23, %v2370_v18 }
 0x17a   :  { %v1857_v35 = vpop.f32.mrf.mxu1  ;;  %v2374_v60 = vmul.f32 0.2, %v1852_v40  ;;  %v1854_v55 = vadd.f32 %v1853_v14, %v1741_v31  ;;  %v1745_v41 = vadd.f32 %v1744_v2, %v5548_v46  ;;  %2956 = vmatprep.mubr.bf16.mxu0 %v2479_v0  ;;  %v2435_v62 = vmax.f32 %v1850_v53, %v2371_v21 }
 0x17b   :  { %v1746_v34 = vpop.f32.mrf.mxu0  ;;  %2957 = vmatmul.mubr.bf16.gmra.mxu0 %v2478_v59  ;;  %v1648_v53 = vadd.f32 %v5574_v27, %v1535_v12  ;;  %v419_v0 = vsub.s32 2, %v5420_v6 }
 0x17c   :  { %v1859_v20 = vpop.f32.mrf.mxu1  ;;  %v2438_v26 = vmax.f32 %v1852_v40, %v2374_v60  ;;  %v2375_v17 = vmul.f32 0.2, %v1854_v55  ;;  %v1747_v16 = vadd.f32 %v1746_v34, %v5551_v10  ;;  %v1858_v22 = vadd.f32 %v1857_v35, %v1745_v41 }
 0x17d   :  { %v1748_v51 = vpop.f32.mrf.mxu0  ;;  %v423_v34 = vsub.s32 3, %v5420_v6 }
 0x17e   :  { %v1861_v1 = vpop.f32.mrf.mxu1  ;;  %v2482_v24 = vpack.c.bf16 %v2438_v26, %v2434_v4  ;;  %v2439_v37 = vmax.f32 %v1854_v55, %v2375_v17  ;;  %v1860_v39 = vadd.f32 %v1859_v20, %v1747_v16  ;;  %v1749_v46 = vadd.f32 %v1748_v51, %v5558_v13 }
 0x17f   :  { %v1750_v50 = vpop.f32.mrf.mxu0  ;;  %v2378_v48 = vmul.f32 0.2, %v1858_v22 }
 0x180   :  { %v1863_v44 = vpop.f32.mrf.mxu1  ;;  %v1751_v19 = vadd.f32 %v1750_v50, %v1638_v63  ;;  %v2483_v15 = vpack.c.bf16 %v2439_v37, %v2435_v62  ;;  %v1862_v25 = vadd.f32 %v1861_v1, %v1749_v46  ;;  %v2379_v47 = vmul.f32 0.2, %v1860_v39  ;;  %v6124_v1 = vld [vmem:[#allocation13_spill] sm:$0xff] }
 0x181   :  { %v1754_v33 = vpop.f32.mrf.mxu0  ;;  %v2442_v28 = vmax.f32 %v1858_v22, %v2378_v48  ;;  %v5646_v63 = vrot.slane %v6124_v1, %v419_v0 }
 0x182   :  { %v1867_v10 = vpop.f32.mrf.mxu1  ;;  %v1864_v9 = vadd.f32 %v1863_v44, %v1751_v19  ;;  %v1755_v36 = vadd.f32 %v1754_v33, %v5566_v8  ;;  %2966 = vmatprep.mubr.bf16.mxu0 %v2483_v15  ;;  %v2382_v45 = vmul.f32 0.2, %v1862_v25  ;;  %v2443_v58 = vmax.f32 %v1860_v39, %v2379_v47  ;;  %v6125_v39 = vld [vmem:[#allocation7_spill] sm:$0xff] }
 0x183   :  { %v1756_v23 = vpop.f32.mrf.mxu0  ;;  %2967 = vmatmul.mubr.bf16.gmra.mxu0 %v2482_v24 }
 0x184   :  { %v1869_v43 = vpop.f32.mrf.mxu1  ;;  %v2383_v13 = vmul.f32 0.2, %v1864_v9  ;;  %v1868_v29 = vadd.f32 %v1867_v10, %v1755_v36  ;;  %v1757_v42 = vadd.f32 %v1756_v23, %v5569_v52  ;;  %v2446_v61 = vmax.f32 %v1862_v25, %v2382_v45 }
 0x185   :  { %v1758_v56 = vpop.f32.mrf.mxu0  ;;  %v1545_v52 = vadd.f32 %v5588_v30, %v5449_v49  ;;  %v6123_v30 = vld [vmem:[#allocation6_spill] sm:$0xff] }
 0x186   :  { %v1871_v54 = vpop.f32.mrf.mxu1  ;;  %v2447_v3 = vmax.f32 %v1864_v9, %v2383_v13  ;;  %v1870_v32 = vadd.f32 %v1869_v43, %v1757_v42  ;;  %v1759_v8 = vadd.f32 %v1758_v56, %v5576_v38  ;;  %v2486_v59 = vpack.c.bf16 %v2446_v61, %v2442_v28 }
 0x187   :  { %v1760_v7 = vpop.f32.mrf.mxu0  ;;  %v2386_v18 = vmul.f32 0.2, %v1868_v29  ;;  %v1658_v17 = vadd.f32 %v6123_v30, %v1545_v52 }
 0x188   :  { %v1873_v14 = vpop.f32.mrf.mxu1  ;;  %v1872_v40 = vadd.f32 %v1871_v54, %v1759_v8  ;;  %v1761_v31 = vadd.f32 %v1760_v7, %v1648_v53  ;;  %v2487_v35 = vpack.c.bf16 %v2447_v3, %v2443_v58  ;;  %v2387_v27 = vmul.f32 0.2, %v1870_v32 }
 0x189   :  { %v1764_v11 = vpop.f32.mrf.mxu0  ;;  %v2450_v20 = vmax.f32 %v1868_v29, %v2386_v18 }
 0x18a   :  { %v1877_v2 = vpop.f32.mrf.mxu1  ;;  %v2390_v21 = vmul.f32 0.2, %v1872_v40  ;;  %v1874_v60 = vadd.f32 %v1873_v14, %v1761_v31  ;;  %v1765_v38 = vadd.f32 %v1764_v11, %v5582_v57  ;;  %2976 = vmatprep.mubr.bf16.mxu0 %v2487_v35  ;;  %v2451_v57 = vmax.f32 %v1870_v32, %v2387_v27 }
 0x18b   :  { %v1766_v55 = vpop.f32.mrf.mxu0  ;;  %2977 = vmatmul.mubr.bf16.gmra.mxu0 %v2486_v59 }
 0x18c   :  { %v1879_v41 = vpop.f32.mrf.mxu1  ;;  %v2454_v4 = vmax.f32 %v1872_v40, %v2390_v21  ;;  %v2391_v26 = vmul.f32 0.2, %v1874_v60  ;;  %v1767_v49 = vadd.f32 %v1766_v55, %v5585_v5  ;;  %v1878_v16 = vadd.f32 %v1877_v2, %v1765_v38 }
 0x18d   :  { %v1768_v22 = vpop.f32.mrf.mxu0  ;;  %v5650_v5 = vrot.slane %v6124_v1, %v423_v34 }
 0x18e   :  { %v1881_v51 = vpop.f32.mrf.mxu1  ;;  %v2490_v62 = vpack.c.bf16 %v2454_v4, %v2450_v20  ;;  %v2455_v24 = vmax.f32 %v1874_v60, %v2391_v26  ;;  %v1880_v37 = vadd.f32 %v1879_v41, %v1767_v49  ;;  %v1769_v6 = vadd.f32 %v1768_v22, %v6125_v39 }
 0x18f   :  { %v1770_v46 = vpop.f32.mrf.mxu0  ;;  %v2394_v15 = vmul.f32 0.2, %v1878_v16 }
 0x190   :  { %v1883_v50 = vpop.f32.mrf.mxu1  ;;  %v1771_v44 = vadd.f32 %v1770_v46, %v1658_v17  ;;  %v2491_v19 = vpack.c.bf16 %v2455_v24, %v2451_v57  ;;  %v1882_v48 = vadd.f32 %v1881_v51, %v1769_v6  ;;  %v2395_v10 = vmul.f32 0.2, %v1880_v37 }
 0x191   :  { %v1920_v25 = vpop.f32.mrf.mxu0  ;;  %v2458_v29 = vmax.f32 %v1878_v16, %v2394_v15 }
 0x192   :  { %v2033_v33 = vpop.f32.mrf.mxu1  ;;  %v1884_v12 = vadd.f32 %v1883_v50, %v1771_v44  ;;  %v1921_v9 = vadd.f32 %v1920_v25, %v5646_v63  ;;  %2986 = vmatprep.mubr.bf16.mxu0 %v2491_v19  ;;  %v2398_v36 = vmul.f32 0.2, %v1882_v48  ;;  %v2459_v56 = vmax.f32 %v1880_v37, %v2395_v10 }
 0x193   :  { %v1922_v47 = vpop.f32.mrf.mxu0  ;;  %2987 = vmatmul.mubr.bf16.gmra.mxu0 %v2490_v62 }
 0x194   :  { %v2035_v45 = vpop.f32.mrf.mxu1  ;;  %v2399_v23 = vmul.f32 0.2, %v1884_v12  ;;  %v5653_v43 = vadd.f32 %v2033_v33, %v1921_v9  ;;  %v1923_v13 = vadd.f32 %v1922_v47, %v5650_v5  ;;  %v2462_v42 = vmax.f32 %v1882_v48, %v2398_v36 }
 0x195   :  { %v5656_v28 = vpop.f32.mrf.mxu0 }
 0x196   :  { %v5658_v61 = vpop.f32.mrf.mxu1  ;;  %v2463_v54 = vmax.f32 %v1884_v12, %v2399_v23  ;;  %v5660_v53 = vadd.f32 %v2035_v45, %v1923_v13  ;;  %v2494_v3 = vpack.c.bf16 %v2462_v42, %v2458_v29 }
 0x197   :  { %v5662_v32 = vpop.f32.mrf.mxu0 }
 0x198   :  { %v5664_v8 = vpop.f32.mrf.mxu1  ;;  %v2495_v58 = vpack.c.bf16 %v2463_v54, %v2459_v56 }
 0x199   :  { %v1930_v59 = vpop.f32.mrf.mxu0 }
 0x19a   :  { %v2043_v7 = vpop.f32.mrf.mxu1  ;;  %v1931_v14 = vadd.f32 %v1930_v59, %v5646_v63  ;;  %2996 = vmatprep.mubr.bf16.mxu0 %v2495_v58 }
 0x19b   :  { %v1932_v18 = vpop.f32.mrf.mxu0  ;;  %2997 = vmatmul.mubr.bf16.gmra.mxu0 %v2494_v3 }
 0x19c   :  { %v2045_v40 = vpop.f32.mrf.mxu1  ;;  %v5667_v31 = vadd.f32 %v2043_v7, %v1931_v14  ;;  %v1933_v52 = vadd.f32 %v1932_v18, %v5650_v5 }
 0x19d   :  { %v1934_v11 = vpop.f32.mrf.mxu0 }
 0x19e   :  { %v2047_v2 = vpop.f32.mrf.mxu1  ;;  %v5670_v35 = vadd.f32 %v2045_v40, %v1933_v52  ;;  %v1935_v0 = vadd.f32 %v1934_v11, %v5646_v63 }
 0x19f   :  { %v5673_v27 = vpop.f32.mrf.mxu0 }
 0x1a0   :  { %v5675_v21 = vpop.f32.mrf.mxu1  ;;  %v5677_v60 = vadd.f32 %v2047_v2, %v1935_v0 }
 0x1a1   :  { %v1940_v38 = vpop.f32.mrf.mxu0 }
 0x1a2   :  { %v2053_v55 = vpop.f32.mrf.mxu1  ;;  %v1941_v41 = vadd.f32 %v1940_v38, %v5646_v63 }
 0x1a3   :  { %v1942_v34 = vpop.f32.mrf.mxu0 }
 0x1a4   :  { %v2055_v20 = vpop.f32.mrf.mxu1  ;;  %v5680_v4 = vadd.f32 %v2053_v55, %v1941_v41  ;;  %v1943_v26 = vadd.f32 %v1942_v34, %v5650_v5 }
 0x1a5   :  { %v1944_v49 = vpop.f32.mrf.mxu0 }
 0x1a6   :  { %v2057_v30 = vpop.f32.mrf.mxu1  ;;  %v5683_v17 = vadd.f32 %v2055_v20, %v1943_v26  ;;  %v1945_v16 = vadd.f32 %v1944_v49, %v5646_v63 }
 0x1a7   :  { %v5686_v22 = vpop.f32.mrf.mxu0 }
 0x1a8   :  { %v5688_v51 = vpop.f32.mrf.mxu1  ;;  %v5690_v1 = vadd.f32 %v2057_v30, %v1945_v16 }
 0x1a9   :  { %v1950_v57 = vpop.f32.mrf.mxu0 }
 0x1aa   :  { %v2063_v62 = vpop.f32.mrf.mxu1  ;;  %v1951_v24 = vadd.f32 %v1950_v57, %v5646_v63 }
 0x1ab   :  { %v1952_v37 = vpop.f32.mrf.mxu0 }
 0x1ac   :  { %v2065_v39 = vpop.f32.mrf.mxu1  ;;  %v5693_v6 = vadd.f32 %v2063_v62, %v1951_v24  ;;  %v1953_v46 = vadd.f32 %v1952_v37, %v5650_v5 }
 0x1ad   :  { %v1954_v50 = vpop.f32.mrf.mxu0 }
 0x1ae   :  { %v2067_v44 = vpop.f32.mrf.mxu1  ;;  %v5696_v19 = vadd.f32 %v2065_v39, %v1953_v46  ;;  %v1955_v15 = vadd.f32 %v1954_v50, %v5646_v63 }
 0x1af   :  { %v5699_v48 = vpop.f32.mrf.mxu0 }
 0x1b0   :  { %v5701_v25 = vpop.f32.mrf.mxu1  ;;  %v5703_v33 = vadd.f32 %v2067_v44, %v1955_v15 }
 0x1b1   :  { %v1960_v10 = vpop.f32.mrf.mxu0 }
 0x1b2   :  { %v2073_v12 = vpop.f32.mrf.mxu1  ;;  %v1961_v9 = vadd.f32 %v1960_v10, %v5646_v63 }
 0x1b3   :  { %v1962_v36 = vpop.f32.mrf.mxu0 }
 0x1b4   :  { %v2075_v47 = vpop.f32.mrf.mxu1  ;;  %v5706_v45 = vadd.f32 %v2073_v12, %v1961_v9  ;;  %v1963_v23 = vadd.f32 %v1962_v36, %v5650_v5 }
 0x1b5   :  { %v1964_v13 = vpop.f32.mrf.mxu0 }
 0x1b6   :  { %v2077_v29 = vpop.f32.mrf.mxu1  ;;  %v5709_v42 = vadd.f32 %v2075_v47, %v1963_v23  ;;  %v1965_v56 = vadd.f32 %v1964_v13, %v5646_v63 }
 0x1b7   :  { %v5712_v54 = vpop.f32.mrf.mxu0 }
 0x1b8   :  { %v5714_v3 = vpop.f32.mrf.mxu1  ;;  %v5716_v58 = vadd.f32 %v2077_v29, %v1965_v56 }
 0x1b9   :  { %v1970_v59 = vpop.f32.mrf.mxu0 }
 0x1ba   :  { %v2083_v7 = vpop.f32.mrf.mxu1  ;;  %v1971_v14 = vadd.f32 %v1970_v59, %v5646_v63 }
 0x1bb   :  { %v1972_v18 = vpop.f32.mrf.mxu0 }
 0x1bc   :  { %v2085_v40 = vpop.f32.mrf.mxu1  ;;  %v5719_v52 = vadd.f32 %v2083_v7, %v1971_v14  ;;  %v1973_v11 = vadd.f32 %v1972_v18, %v5650_v5 }
 0x1bd   :  { %v1974_v2 = vpop.f32.mrf.mxu0 }
 0x1be   :  { %v2087_v0 = vpop.f32.mrf.mxu1  ;;  %v5722_v38 = vadd.f32 %v2085_v40, %v1973_v11  ;;  %v1975_v55 = vadd.f32 %v1974_v2, %v5646_v63  ;;  %v1925_v11 = vadd.f32 %v5656_v28, %v5646_v63 }
 0x1bf   :  { %v5725_v41 = vpop.f32.mrf.mxu0 }
 0x1c0   :  { %v5727_v34 = vpop.f32.mrf.mxu1  ;;  %v5729_v20 = vadd.f32 %v2087_v0, %v1975_v55 }
 0x1c1   :  { %v1980_v26 = vpop.f32.mrf.mxu0 }
 0x1c2   :  { %v2093_v49 = vpop.f32.mrf.mxu1  ;;  %v1981_v30 = vadd.f32 %v1980_v26, %v5646_v63  ;;  %v1927_v26 = vadd.f32 %v5662_v32, %v5650_v5 }
 0x1c3   :  { %v1982_v16 = vpop.f32.mrf.mxu0 }
 0x1c4   :  { %v2095_v57 = vpop.f32.mrf.mxu1  ;;  %v5732_v62 = vadd.f32 %v2093_v49, %v1981_v30  ;;  %v1983_v24 = vadd.f32 %v1982_v16, %v5650_v5 }
 0x1c5   :  { %v1984_v37 = vpop.f32.mrf.mxu0 }
 0x1c6   :  { %v2097_v39 = vpop.f32.mrf.mxu1  ;;  %v5735_v46 = vadd.f32 %v2095_v57, %v1983_v24  ;;  %v1985_v50 = vadd.f32 %v1984_v37, %v5646_v63  ;;  %v2038_v57 = vadd.f32 %v5658_v61, %v1925_v11 }
 0x1c7   :  { %v5738_v44 = vpop.f32.mrf.mxu0 }
 0x1c8   :  { %v5740_v15 = vpop.f32.mrf.mxu1  ;;  %v5742_v10 = vadd.f32 %v2097_v39, %v1985_v50  ;;  %v2040_v50 = vadd.f32 %v5664_v8, %v1927_v26 }
 0x1c9   :  { %v1990_v12 = vpop.f32.mrf.mxu0 }
 0x1ca   :  { %v2103_v9 = vpop.f32.mrf.mxu1  ;;  %v1991_v36 = vadd.f32 %v1990_v12, %v5646_v63 }
 0x1cb   :  { %v1992_v47 = vpop.f32.mrf.mxu0 }
 0x1cc   :  { %v2105_v23 = vpop.f32.mrf.mxu1  ;;  %v5745_v13 = vadd.f32 %v2103_v9, %v1991_v36  ;;  %v1993_v29 = vadd.f32 %v1992_v47, %v5650_v5 }
 0x1cd   :  { %v1994_v56 = vpop.f32.mrf.mxu0 }
 0x1ce   :  { %v2107_v59 = vpop.f32.mrf.mxu1  ;;  %v5748_v7 = vadd.f32 %v2105_v23, %v1993_v29  ;;  %v1995_v14 = vadd.f32 %v1994_v56, %v5646_v63 }
 0x1cf   :  { %v5751_v18 = vpop.f32.mrf.mxu0 }
 0x1d0   :  { %v5753_v40 = vpop.f32.mrf.mxu1  ;;  %v5757_v2 = vadd.f32 %v2107_v59, %v1995_v14 }
 0x1d1   :  { %v2146_v0 = vpop.f32.mrf.mxu0 }
 0x1d2   :  { %6126 = vst [vmem:[#allocation8_spill] sm:$0xff] %v5757_v2  ;;  %v2259_v55 = vpop.f32.mrf.mxu1  ;;  %v2147_v49 = vadd.f32 %v2146_v0, %v5653_v43  ;;  %v1937_v43 = vadd.f32 %v5673_v27, %v5650_v5 }
 0x1d3   :  { %v2148_v30 = vpop.f32.mrf.mxu0 }
 0x1d4   :  { %v2261_v16 = vpop.f32.mrf.mxu1  ;;  %v2149_v24 = vadd.f32 %v2148_v30, %v5660_v53  ;;  %v2260_v12 = vadd.f32 %v2259_v55, %v2147_v49 }
 0x1d5   :  { %v2150_v37 = vpop.f32.mrf.mxu0 }
 0x1d6   :  { %v2263_v39 = vpop.f32.mrf.mxu1  ;;  %v2262_v63 = vadd.f32 %v2261_v16, %v2149_v24  ;;  %v2151_v28 = vadd.f32 %v2150_v37, %v2038_v57  ;;  %v2340_v14 = vmul.f32 0.2, %v2260_v12  ;;  %v2050_v57 = vadd.f32 %v5675_v21, %v1937_v43 }
 0x1d7   :  { %v2152_v9 = vpop.f32.mrf.mxu0 }
 0x1d8   :  { %v2265_v36 = vpop.f32.mrf.mxu1  ;;  %v2264_v47 = vadd.f32 %v2263_v39, %v2151_v28  ;;  %v2153_v23 = vadd.f32 %v2152_v9, %v2040_v50  ;;  %v2341_v56 = vmul.f32 0.2, %v2262_v63  ;;  %v2404_v37 = vmax.f32 %v2260_v12, %v2340_v14 }
 0x1d9   :  { %v2156_v32 = vpop.f32.mrf.mxu0 }
 0x1da   :  { %v2269_v29 = vpop.f32.mrf.mxu1  ;;  %v2344_v61 = vmul.f32 0.2, %v2264_v47  ;;  %v2266_v59 = vadd.f32 %v2265_v36, %v2153_v23  ;;  %v2157_v53 = vadd.f32 %v2156_v32, %v5667_v31  ;;  %v2405_v27 = vmax.f32 %v2262_v63, %v2341_v56 }
 0x1db   :  { %v2158_v11 = vpop.f32.mrf.mxu0 }
 0x1dc   :  { %v2271_v8 = vpop.f32.mrf.mxu1  ;;  %v2345_v0 = vmul.f32 0.2, %v2266_v59  ;;  %v2159_v55 = vadd.f32 %v2158_v11, %v5670_v35  ;;  %v2408_v26 = vmax.f32 %v2264_v47, %v2344_v61  ;;  %v2270_v49 = vadd.f32 %v2269_v29, %v2157_v53 }
 0x1dd   :  { %v2160_v30 = vpop.f32.mrf.mxu0  ;;  %v1947_v29 = vadd.f32 %v5686_v22, %v5650_v5 }
 0x1de   :  { %v2273_v16 = vpop.f32.mrf.mxu1  ;;  %v2409_v24 = vmax.f32 %v2266_v59, %v2345_v0  ;;  %v2272_v39 = vadd.f32 %v2271_v8, %v2159_v55  ;;  %v2161_v50 = vadd.f32 %v2160_v30, %v5677_v60  ;;  %v2468_v23 = vpack.c.bf16 %v2408_v26, %v2404_v37 }
 0x1df   :  { %v2162_v28 = vpop.f32.mrf.mxu0  ;;  %v2348_v32 = vmul.f32 0.2, %v2270_v49  ;;  %v2060_v55 = vadd.f32 %v5688_v51, %v1947_v29 }
 0x1e0   :  { %v2275_v31 = vpop.f32.mrf.mxu1  ;;  %v2163_v9 = vadd.f32 %v2162_v28, %v2050_v57  ;;  %v2469_v36 = vpack.c.bf16 %v2409_v24, %v2405_v27  ;;  %v2274_v2 = vadd.f32 %v2273_v16, %v2161_v50  ;;  %v2349_v63 = vmul.f32 0.2, %v2272_v39 }
 0x1e1   :  { %v2166_v35 = vpop.f32.mrf.mxu0  ;;  %v2412_v14 = vmax.f32 %v2270_v49, %v2348_v32 }
 0x1e2   :  { %v2279_v47 = vpop.f32.mrf.mxu1  ;;  %v2276_v61 = vadd.f32 %v2275_v31, %v2163_v9  ;;  %v2167_v21 = vadd.f32 %v2166_v35, %v5680_v4  ;;  %3039 = vmatprep.mubr.bf16.mxu1 %v2469_v36  ;;  %v2352_v12 = vmul.f32 0.2, %v2274_v2  ;;  %v2413_v30 = vmax.f32 %v2272_v39, %v2349_v63 }
 0x1e3   :  { %v2168_v43 = vpop.f32.mrf.mxu0  ;;  %3040 = vmatmul.mubr.bf16.vlgmr.msra.gmra.mxu1 %v2468_v23 }
 0x1e4   :  { %v2281_v60 = vpop.f32.mrf.mxu1  ;;  %v2353_v56 = vmul.f32 0.2, %v2276_v61  ;;  %v2280_v59 = vadd.f32 %v2279_v47, %v2167_v21  ;;  %v2169_v53 = vadd.f32 %v2168_v43, %v5683_v17  ;;  %v2416_v11 = vmax.f32 %v2274_v2, %v2352_v12 }
 0x1e5   :  { %v2170_v8 = vpop.f32.mrf.mxu0  ;;  %v1957_v17 = vadd.f32 %v5699_v48, %v5650_v5 }
 0x1e6   :  { %v2283_v0 = vpop.f32.mrf.mxu1  ;;  %v2417_v22 = vmax.f32 %v2276_v61, %v2353_v56  ;;  %v2282_v26 = vadd.f32 %v2281_v60, %v2169_v53  ;;  %v2171_v4 = vadd.f32 %v2170_v8, %v5690_v1  ;;  %v2472_v16 = vpack.c.bf16 %v2416_v11, %v2412_v14 }
 0x1e7   :  { %v2172_v57 = vpop.f32.mrf.mxu0  ;;  %v2356_v24 = vmul.f32 0.2, %v2280_v59  ;;  %v2070_v21 = vadd.f32 %v5701_v25, %v1957_v17 }
 0x1e8   :  { %v2285_v27 = vpop.f32.mrf.mxu1  ;;  %v2284_v37 = vadd.f32 %v2283_v0, %v2171_v4  ;;  %v2173_v50 = vadd.f32 %v2172_v57, %v2060_v55  ;;  %v2473_v28 = vpack.c.bf16 %v2417_v22, %v2413_v30  ;;  %v2357_v31 = vmul.f32 0.2, %v2282_v26 }
 0x1e9   :  { %v2176_v49 = vpop.f32.mrf.mxu0  ;;  %v2420_v23 = vmax.f32 %v2280_v59, %v2356_v24  ;;  %v1967_v55 = vadd.f32 %v5712_v54, %v5650_v5 }
 0x1ea   :  { %v2289_v2 = vpop.f32.mrf.mxu1  ;;  %v2360_v9 = vmul.f32 0.2, %v2284_v37  ;;  %v2286_v51 = vadd.f32 %v2285_v27, %v2173_v50  ;;  %v2177_v36 = vadd.f32 %v2176_v49, %v5693_v6  ;;  %3049 = vmatprep.mubr.bf16.mxu1 %v2473_v28  ;;  %v2421_v63 = vmax.f32 %v2282_v26, %v2357_v31 }
 0x1eb   :  { %v2178_v1 = vpop.f32.mrf.mxu0  ;;  %3050 = vmatmul.mubr.bf16.gmra.mxu1 %v2472_v16  ;;  %v2080_v49 = vadd.f32 %v5714_v3, %v1967_v55 }
 0x1ec   :  { %v2291_v39 = vpop.f32.mrf.mxu1  ;;  %v2424_v32 = vmax.f32 %v2284_v37, %v2360_v9  ;;  %v2361_v35 = vmul.f32 0.2, %v2286_v51  ;;  %v2179_v47 = vadd.f32 %v2178_v1, %v5696_v19  ;;  %v2290_v29 = vadd.f32 %v2289_v2, %v2177_v36 }
 0x1ed   :  { %v2180_v61 = vpop.f32.mrf.mxu0 }
 0x1ee   :  { %v2293_v48 = vpop.f32.mrf.mxu1  ;;  %v2476_v12 = vpack.c.bf16 %v2424_v32, %v2420_v23  ;;  %v2425_v43 = vmax.f32 %v2286_v51, %v2361_v35  ;;  %v2292_v60 = vadd.f32 %v2291_v39, %v2179_v47  ;;  %v2181_v6 = vadd.f32 %v2180_v61, %v5703_v33 }
 0x1ef   :  { %v2182_v56 = vpop.f32.mrf.mxu0  ;;  %v2364_v11 = vmul.f32 0.2, %v2290_v29 }
 0x1f0   :  { %v2295_v53 = vpop.f32.mrf.mxu1  ;;  %v2183_v14 = vadd.f32 %v2182_v56, %v2070_v21  ;;  %v2477_v59 = vpack.c.bf16 %v2425_v43, %v2421_v63  ;;  %v2294_v8 = vadd.f32 %v2293_v48, %v2181_v6  ;;  %v2365_v26 = vmul.f32 0.2, %v2292_v60 }
 0x1f1   :  { %v2186_v0 = vpop.f32.mrf.mxu0  ;;  %v2428_v24 = vmax.f32 %v2290_v29, %v2364_v11 }
 0x1f2   :  { %v2299_v19 = vpop.f32.mrf.mxu1  ;;  %v2296_v22 = vadd.f32 %v2295_v53, %v2183_v14  ;;  %v2187_v25 = vadd.f32 %v2186_v0, %v5706_v45  ;;  %3059 = vmatprep.mubr.bf16.mxu1 %v2477_v59  ;;  %v2368_v4 = vmul.f32 0.2, %v2294_v8  ;;  %v2429_v28 = vmax.f32 %v2292_v60, %v2365_v26 }
 0x1f3   :  { %v2188_v30 = vpop.f32.mrf.mxu0  ;;  %3060 = vmatmul.mubr.bf16.gmra.mxu1 %v2476_v12 }
 0x1f4   :  { %v2301_v16 = vpop.f32.mrf.mxu1  ;;  %v2369_v33 = vmul.f32 0.2, %v2296_v22  ;;  %v2300_v57 = vadd.f32 %v2299_v19, %v2187_v25  ;;  %v2189_v27 = vadd.f32 %v2188_v30, %v5709_v42  ;;  %v2432_v37 = vmax.f32 %v2294_v8, %v2368_v4 }
 0x1f5   :  { %v2190_v50 = vpop.f32.mrf.mxu0  ;;  %v1977_v42 = vadd.f32 %v5725_v41, %v5650_v5  ;;  %v1987_v4 = vadd.f32 %v5738_v44, %v5650_v5 }
 0x1f6   :  { %v2303_v17 = vpop.f32.mrf.mxu1  ;;  %v2433_v54 = vmax.f32 %v2296_v22, %v2369_v33  ;;  %v2302_v2 = vadd.f32 %v2301_v16, %v2189_v27  ;;  %v2191_v45 = vadd.f32 %v2190_v50, %v5716_v58  ;;  %v2480_v31 = vpack.c.bf16 %v2432_v37, %v2428_v24 }
 0x1f7   :  { %v2192_v9 = vpop.f32.mrf.mxu0  ;;  %v2372_v36 = vmul.f32 0.2, %v2300_v57  ;;  %v2090_v56 = vadd.f32 %v5727_v34, %v1977_v42 }
 0x1f8   :  { %v2305_v51 = vpop.f32.mrf.mxu1  ;;  %v2304_v1 = vadd.f32 %v2303_v17, %v2191_v45  ;;  %v2193_v39 = vadd.f32 %v2192_v9, %v2080_v49  ;;  %v2481_v35 = vpack.c.bf16 %v2433_v54, %v2429_v28  ;;  %v2373_v47 = vmul.f32 0.2, %v2302_v2 }
 0x1f9   :  { %v2196_v23 = vpop.f32.mrf.mxu0  ;;  %v2436_v21 = vmax.f32 %v2300_v57, %v2372_v36 }
 0x1fa   :  { %v2309_v32 = vpop.f32.mrf.mxu1  ;;  %v2376_v29 = vmul.f32 0.2, %v2304_v1  ;;  %v2306_v3 = vadd.f32 %v2305_v51, %v2193_v39  ;;  %v2197_v61 = vadd.f32 %v2196_v23, %v5719_v52  ;;  %3069 = vmatprep.mubr.bf16.mxu1 %v2481_v35  ;;  %v2437_v53 = vmax.f32 %v2302_v2, %v2373_v47 }
 0x1fb   :  { %v2198_v58 = vpop.f32.mrf.mxu0  ;;  %3070 = vmatmul.mubr.bf16.gmra.mxu1 %v2480_v31  ;;  %v2100_v2 = vadd.f32 %v5740_v15, %v1987_v4 }
 0x1fc   :  { %v2311_v48 = vpop.f32.mrf.mxu1  ;;  %v2440_v63 = vmax.f32 %v2304_v1, %v2376_v29  ;;  %v2377_v12 = vmul.f32 0.2, %v2306_v3  ;;  %v2199_v43 = vadd.f32 %v2198_v58, %v5722_v38  ;;  %v2310_v60 = vadd.f32 %v2309_v32, %v2197_v61 }
 0x1fd   :  { %v2200_v6 = vpop.f32.mrf.mxu0 }
 0x1fe   :  { %v2313_v41 = vpop.f32.mrf.mxu1  ;;  %v2484_v14 = vpack.c.bf16 %v2440_v63, %v2436_v21  ;;  %v2441_v59 = vmax.f32 %v2306_v3, %v2377_v12  ;;  %v2312_v11 = vadd.f32 %v2311_v48, %v2199_v43  ;;  %v2201_v52 = vadd.f32 %v2200_v6, %v5729_v20 }
 0x1ff   :  { %v2202_v8 = vpop.f32.mrf.mxu0  ;;  %v2380_v22 = vmul.f32 0.2, %v2310_v60 }
 0x200   :  { %v2315_v0 = vpop.f32.mrf.mxu1  ;;  %v2203_v19 = vadd.f32 %v2202_v8, %v2090_v56  ;;  %v2485_v55 = vpack.c.bf16 %v2441_v59, %v2437_v53  ;;  %v2314_v25 = vadd.f32 %v2313_v41, %v2201_v52  ;;  %v2381_v16 = vmul.f32 0.2, %v2312_v11  ;;  %v6127_v56 = vld [vmem:[#allocation8_spill] sm:$0xff] }
 0x201   :  { %v2206_v26 = vpop.f32.mrf.mxu0  ;;  %v2444_v50 = vmax.f32 %v2310_v60, %v2380_v22 }
 0x202   :  { %v2319_v38 = vpop.f32.mrf.mxu1  ;;  %v2316_v30 = vadd.f32 %v2315_v0, %v2203_v19  ;;  %v2207_v34 = vadd.f32 %v2206_v26, %v5732_v62  ;;  %3079 = vmatprep.mubr.bf16.mxu1 %v2485_v55  ;;  %v2384_v33 = vmul.f32 0.2, %v2314_v25  ;;  %v2445_v28 = vmax.f32 %v2312_v11, %v2381_v16 }
 0x203   :  { %v2208_v57 = vpop.f32.mrf.mxu0  ;;  %3080 = vmatmul.mubr.bf16.gmra.mxu1 %v2484_v14 }
 0x204   :  { %v2321_v27 = vpop.f32.mrf.mxu1  ;;  %v2385_v20 = vmul.f32 0.2, %v2316_v30  ;;  %v2320_v24 = vadd.f32 %v2319_v38, %v2207_v34  ;;  %v2209_v37 = vadd.f32 %v2208_v57, %v5735_v46  ;;  %v2448_v17 = vmax.f32 %v2314_v25, %v2384_v33 }
 0x205   :  { %v2210_v49 = vpop.f32.mrf.mxu0  ;;  %v1997_v46 = vadd.f32 %v5751_v18, %v5650_v5 }
 0x206   :  { %v2323_v54 = vpop.f32.mrf.mxu1  ;;  %v2449_v44 = vmax.f32 %v2316_v30, %v2385_v20  ;;  %v2322_v45 = vadd.f32 %v2321_v27, %v2209_v37  ;;  %v2211_v62 = vadd.f32 %v2210_v49, %v5742_v10  ;;  %v2488_v31 = vpack.c.bf16 %v2448_v17, %v2444_v50 }
 0x207   :  { %v2212_v9 = vpop.f32.mrf.mxu0  ;;  %v2388_v36 = vmul.f32 0.2, %v2320_v24  ;;  %v2110_v63 = vadd.f32 %v5753_v40, %v1997_v46 }
 0x208   :  { %v2325_v51 = vpop.f32.mrf.mxu1  ;;  %v2324_v1 = vadd.f32 %v2323_v54, %v2211_v62  ;;  %v2213_v39 = vadd.f32 %v2212_v9, %v2100_v2  ;;  %v2489_v32 = vpack.c.bf16 %v2449_v44, %v2445_v28  ;;  %v2389_v35 = vmul.f32 0.2, %v2322_v45  ;;  %v6128_v28 = vld [vmem:[#allocation12_spill] sm:$0xff]  ;;  %v6129_v9 = vld [vmem:[#allocation14_spill] sm:$0xff] }
 0x209   :  { %v2216_v42 = vpop.f32.mrf.mxu0  ;;  %v2452_v61 = vmax.f32 %v2320_v24, %v2388_v36 }
 0x20a   :  { %v2329_v23 = vpop.f32.mrf.mxu1  ;;  %v2392_v47 = vmul.f32 0.2, %v2324_v1  ;;  %v2326_v15 = vadd.f32 %v2325_v51, %v2213_v39  ;;  %v2217_v29 = vadd.f32 %v2216_v42, %v5745_v13  ;;  %3089 = vmatprep.mubr.bf16.mxu1 %v2489_v32  ;;  %v2453_v43 = vmax.f32 %v2322_v45, %v2389_v35  ;;  %v2562_v45 = vld [vmem:[%s6087_s4] sm:$0x3] }
 0x20b   :  { %v2218_v10 = vpop.f32.mrf.mxu0  ;;  %3090 = vmatmul.mubr.bf16.gmra.mxu1 %v2488_v31  ;;  %v5825_v31 = vrot.slane %v2562_v45, %v6128_v28  ;;  %v5828_v51 = vrot.slane %v2562_v45, %v6129_v9 }
 0x20c   :  { %v2331_v3 = vpop.f32.mrf.mxu1  ;;  %v2456_v58 = vmax.f32 %v2324_v1, %v2392_v47  ;;  %v2393_v48 = vmul.f32 0.2, %v2326_v15  ;;  %v2219_v21 = vadd.f32 %v2218_v10, %v5748_v7  ;;  %v2330_v5 = vadd.f32 %v2329_v23, %v2217_v29  ;;  %v3184_v23 = vld [vmem:[%s6088_s5] sm:$0x3] }
 0x20d   :  { %v2220_v18 = vpop.f32.mrf.mxu0 }
 0x20e   :  { %v2333_v12 = vpop.f32.mrf.mxu1  ;;  %v2492_v60 = vpack.c.bf16 %v2456_v58, %v2452_v61  ;;  %v2457_v6 = vmax.f32 %v2326_v15, %v2393_v48  ;;  %v2332_v41 = vadd.f32 %v2331_v3, %v2219_v21  ;;  %v2221_v13 = vadd.f32 %v2220_v18, %v6127_v56 }
 0x20f   :  { %v2222_v53 = vpop.f32.mrf.mxu0  ;;  %v2396_v11 = vmul.f32 0.2, %v2330_v5  ;;  %v5842_v61 = vrot.slane %v3184_v23, %v6128_v28 }
 0x210   :  { %v2223_v14 = vadd.f32 %v2222_v53, %v2110_v63  ;;  %v2493_v59 = vpack.c.bf16 %v2457_v6, %v2453_v43  ;;  %v2334_v52 = vadd.f32 %v2333_v12, %v2221_v13  ;;  %v2335_v8 = vpop.f32.mrf.mxu1  ;;  %v2397_v0 = vmul.f32 0.2, %v2332_v41 }
 0x211   :  { %v2460_v55 = vmax.f32 %v2330_v5, %v2396_v11  ;;  %v5845_v63 = vrot.slane %v3184_v23, %v6129_v9 }
 0x212   :  { %v2336_v7 = vadd.f32 %v2335_v8, %v2223_v14  ;;  %3099 = vmatprep.mubr.bf16.mxu1 %v2493_v59  ;;  %v2400_v19 = vmul.f32 0.2, %v2334_v52  ;;  %v2461_v25 = vmax.f32 %v2332_v41, %v2397_v0 }
 0x213   :  { %3100 = vmatmul.mubr.bf16.gmra.mxu1 %v2492_v60 }
 0x214   :  { %v2401_v40 = vmul.f32 0.2, %v2336_v7  ;;  %v2464_v22 = vmax.f32 %v2334_v52, %v2400_v19 }
 0x216   :  { %v2465_v26 = vmax.f32 %v2336_v7, %v2401_v40  ;;  %v2496_v38 = vpack.c.bf16 %v2464_v22, %v2460_v55 }
 0x218   :  { %v2497_v4 = vpack.c.bf16 %v2465_v26, %v2461_v25 }
 0x21a   :  { %3109 = vmatprep.mubr.bf16.mxu1 %v2497_v4 }
 0x21b   :  { %3110 = vmatmul.mubr.bf16.gmra.mxu1 %v2496_v38 }
 0x223   :  { %v2928_v30 = vpop.f32.mrf.mxu0 }
 0x224   :  { %v2929_v1 = vadd.f32 %v2928_v30, %v5825_v31 }
 0x225   :  { %v2930_v34 = vpop.f32.mrf.mxu0 }
 0x226   :  { %v2931_v46 = vadd.f32 %v2930_v34, %v5828_v51 }
 0x227   :  { %v2932_v16 = vpop.f32.mrf.mxu0 }
 0x228   :  { %v2933_v47 = vadd.f32 %v2932_v16, %v5825_v31 }
 0x229   :  { %v2934_v33 = vpop.f32.mrf.mxu0 }
 0x22a   :  { %v2935_v10 = vadd.f32 %v2934_v33, %v5828_v51 }
 0x22b   :  { %v2938_v57 = vpop.f32.mrf.mxu0 }
 0x22c   :  { %v2939_v6 = vadd.f32 %v2938_v57, %v5825_v31 }
 0x22d   :  { %v2940_v27 = vpop.f32.mrf.mxu0 }
 0x22e   :  { %v2941_v59 = vadd.f32 %v2940_v27, %v5828_v51 }
 0x22f   :  { %v2942_v20 = vpop.f32.mrf.mxu0 }
 0x230   :  { %v2943_v19 = vadd.f32 %v2942_v20, %v5825_v31 }
 0x231   :  { %v2944_v24 = vpop.f32.mrf.mxu0 }
 0x232   :  { %v2945_v38 = vadd.f32 %v2944_v24, %v5828_v51 }
 0x233   :  { %v2948_v37 = vpop.f32.mrf.mxu0 }
 0x234   :  { %v2949_v27 = vadd.f32 %v2948_v37, %v5825_v31 }
 0x235   :  { %v5807_v50 = vpop.f32.mrf.mxu0 }
 0x236   :  { %v2951_v9 = vadd.f32 %v5807_v50, %v5828_v51 }
 0x237   :  { %v5809_v17 = vpop.f32.mrf.mxu0 }
 0x238   :  { %v2953_v37 = vadd.f32 %v5809_v17, %v5825_v31 }
 0x239   :  { %v5811_v49 = vpop.f32.mrf.mxu0 }
 0x23a   :  { %v2955_v50 = vadd.f32 %v5811_v49, %v5828_v51 }
 0x23b   :  { %v5813_v54 = vpop.f32.mrf.mxu0 }
 0x23c   :  { %v2959_v17 = vadd.f32 %v5813_v54, %v5825_v31 }
 0x23d   :  { %v5815_v2 = vpop.f32.mrf.mxu0 }
 0x23e   :  { %v2961_v49 = vadd.f32 %v5815_v2, %v5828_v51 }
 0x23f   :  { %v5817_v44 = vpop.f32.mrf.mxu0 }
 0x240   :  { %v2963_v54 = vadd.f32 %v5817_v44, %v5825_v31 }
 0x241   :  { %v5822_v62 = vpop.f32.mrf.mxu0 }
 0x242   :  { %v2965_v2 = vadd.f32 %v5822_v62, %v5828_v51 }
 0x243   :  { %v5830_v36 = vpop.f32.mrf.mxu0 }
 0x244   :  { %v2969_v44 = vadd.f32 %v5830_v36, %v5825_v31 }
 0x245   :  { %v5837_v32 = vpop.f32.mrf.mxu0 }
 0x246   :  { %v2971_v62 = vadd.f32 %v5837_v32, %v5828_v51 }
 0x247   :  { %v5847_v5 = vpop.f32.mrf.mxu0 }
 0x248   :  { %v2973_v36 = vadd.f32 %v5847_v5, %v5825_v31 }
 0x249   :  { %v5853_v11 = vpop.f32.mrf.mxu0 }
 0x24a   :  { %v2975_v32 = vadd.f32 %v5853_v11, %v5828_v51 }
 0x24b   :  { %v5859_v4 = vpop.f32.mrf.mxu0 }
 0x24c   :  { %v2979_v5 = vadd.f32 %v5859_v4, %v5825_v31 }
 0x24d   :  { %v5865_v24 = vpop.f32.mrf.mxu0 }
 0x24e   :  { %v2981_v11 = vadd.f32 %v5865_v24, %v5828_v51 }
 0x2a3   :  { %v3041_v39 = vpop.f32.mrf.mxu1 }
 0x2a4   :  { %v3042_v42 = vadd.f32 %v3041_v39, %v2929_v1 }
 0x2a5   :  { %v3043_v35 = vpop.f32.mrf.mxu1 }
 0x2a6   :  { %v3120_v15 = vmul.f32 0.2, %v3042_v42  ;;  %v3044_v29 = vadd.f32 %v3043_v35, %v2931_v46 }
 0x2a7   :  { %v3045_v3 = vpop.f32.mrf.mxu1 }
 0x2a8   :  { %v3152_v58 = vmax.f32 %v3042_v42, %v3120_v15  ;;  %v3121_v48 = vmul.f32 0.2, %v3044_v29  ;;  %v3046_v21 = vadd.f32 %v3045_v3, %v2933_v47 }
 0x2a9   :  { %v3047_v18 = vpop.f32.mrf.mxu1 }
 0x2aa   :  { %v3153_v12 = vmax.f32 %v3044_v29, %v3121_v48  ;;  %v3122_v43 = vmul.f32 0.2, %v3046_v21  ;;  %v3048_v60 = vadd.f32 %v3047_v18, %v2935_v10  ;;  %v3196_v53 = vmul.f32 %v5842_v61, %v3152_v58 }
 0x2ab   :  { %v3051_v13 = vpop.f32.mrf.mxu1 }
 0x2ac   :  { %v3154_v41 = vmax.f32 %v3046_v21, %v3122_v43  ;;  %v3123_v56 = vmul.f32 0.2, %v3048_v60  ;;  %v3197_v14 = vmul.f32 %v5845_v63, %v3153_v12  ;;  %v3052_v52 = vadd.f32 %v3051_v13, %v2939_v6  ;;  %v5873_v21 = vpop.f32.mrf.mxu0 }
 0x2ad   :  { %v3053_v0 = vpop.f32.mrf.mxu1  ;;  %v2983_v4 = vadd.f32 %v5873_v21, %v5825_v31 }
 0x2ae   :  { %v3155_v8 = vmax.f32 %v3048_v60, %v3123_v56  ;;  %v3228_v7 = vadd.f32 %v3197_v14, %v3196_v53  ;;  %v3124_v40 = vmul.f32 0.2, %v3052_v52  ;;  %v3054_v55 = vadd.f32 %v3053_v0, %v2941_v59 }
 0x2af   :  { %v3055_v22 = vpop.f32.mrf.mxu1  ;;  %v3198_v25 = vmul.f32 %v5842_v61, %v3154_v41 }
 0x2b0   :  { %3229 = vadd.xlane.f32.xlu0 %v3228_v7  ;;  %v3199_v26 = vmul.f32 %v5845_v63, %v3155_v8  ;;  %v3156_v30 = vmax.f32 %v3052_v52, %v3124_v40  ;;  %v3125_v34 = vmul.f32 0.2, %v3054_v55  ;;  %v3056_v16 = vadd.f32 %v3055_v22, %v2943_v19  ;;  %v5881_v52 = vpop.f32.mrf.mxu0 }
 0x2b1   :  { %v3057_v33 = vpop.f32.mrf.mxu1  ;;  %v2985_v24 = vadd.f32 %v5881_v52, %v5828_v51 }
 0x2b2   :  { %v3231_v57 = vadd.f32 %v3199_v26, %v3198_v25  ;;  %v3157_v20 = vmax.f32 %v3054_v55, %v3125_v34  ;;  %v3126_v45 = vmul.f32 0.2, %v3056_v16  ;;  %v3058_v28 = vadd.f32 %v3057_v33, %v2945_v38  ;;  %v5889_v34 = vpop.f32.mrf.mxu0 }
 0x2b3   :  { %v3061_v1 = vpop.f32.mrf.mxu1  ;;  %v3200_v39 = vmul.f32 %v5842_v61, %v3156_v30  ;;  %v2989_v21 = vadd.f32 %v5889_v34, %v5825_v31 }
 0x2b4   :  { %3232 = vadd.xlane.f32.xlu0 %v3231_v57  ;;  %v3158_v46 = vmax.f32 %v3056_v16, %v3126_v45  ;;  %v3127_v42 = vmul.f32 0.2, %v3058_v28  ;;  %v3062_v23 = vadd.f32 %v3061_v1, %v2949_v27  ;;  %v3201_v35 = vmul.f32 %v5845_v63, %v3157_v20 }
 0x2b5   :  { %v3063_v47 = vpop.f32.mrf.mxu1 }
 0x2b6   :  { %v3159_v15 = vmax.f32 %v3058_v28, %v3127_v42  ;;  %v3128_v29 = vmul.f32 0.2, %v3062_v23  ;;  %v3064_v10 = vadd.f32 %v3063_v47, %v2951_v9  ;;  %v3234_v3 = vadd.f32 %v3201_v35, %v3200_v39  ;;  %v2990_v42 = vpop.f32.mrf.mxu0 }
 0x2b7   :  { %v3065_v58 = vpop.f32.mrf.mxu1  ;;  %v3202_v48 = vmul.f32 %v5842_v61, %v3158_v46  ;;  %v2991_v52 = vadd.f32 %v2990_v42, %v5828_v51 }
 0x2b8   :  { %v3160_v18 = vmax.f32 %v3062_v23, %v3128_v29  ;;  %v3129_v12 = vmul.f32 0.2, %v3064_v10  ;;  %v3066_v43 = vadd.f32 %v3065_v58, %v2953_v37  ;;  %3235 = vadd.xlane.f32.xlu1 %v3234_v3  ;;  %v3203_v60 = vmul.f32 %v5845_v63, %v3159_v15 }
 0x2b9   :  { %v3067_v6 = vpop.f32.mrf.mxu1 }
 0x2ba   :  { %v3161_v41 = vmax.f32 %v3064_v10, %v3129_v12  ;;  %v3130_v56 = vmul.f32 0.2, %v3066_v43  ;;  %v3068_v13 = vadd.f32 %v3067_v6, %v2955_v50  ;;  %v3237_v53 = vadd.f32 %v3203_v60, %v3202_v48 }
 0x2bb   :  { %v3071_v14 = vpop.f32.mrf.mxu1  ;;  %v3204_v59 = vmul.f32 %v5842_v61, %v3160_v18  ;;  %v2992_v18 = vpop.f32.mrf.mxu0 }
 0x2bc   :  { %v3162_v8 = vmax.f32 %v3066_v43, %v3130_v56  ;;  %v3131_v0 = vmul.f32 0.2, %v3068_v13  ;;  %v3072_v7 = vadd.f32 %v3071_v14, %v2959_v17  ;;  %3238 = vadd.xlane.f32.xlu1 %v3237_v53  ;;  %v3205_v19 = vmul.f32 %v5845_v63, %v3161_v41 }
 0x2bd   :  { %v3073_v40 = vpop.f32.mrf.mxu1 }
 0x2be   :  { %v3163_v55 = vmax.f32 %v3068_v13, %v3131_v0  ;;  %v3132_v22 = vmul.f32 0.2, %v3072_v7  ;;  %v3074_v25 = vadd.f32 %v3073_v40, %v2961_v49  ;;  %v3240_v26 = vadd.f32 %v3205_v19, %v3204_v59  ;;  %v2994_v59 = vpop.f32.mrf.mxu0 }
 0x2bf   :  { %v3075_v38 = vpop.f32.mrf.mxu1  ;;  %v3206_v30 = vmul.f32 %v5842_v61, %v3162_v8 }
 0x2c0   :  { %v3164_v16 = vmax.f32 %v3072_v7, %v3132_v22  ;;  %v3133_v33 = vmul.f32 0.2, %v3074_v25  ;;  %v3076_v57 = vadd.f32 %v3075_v38, %v2963_v54  ;;  %3241 = vadd.xlane.f32.xlu0 %v3240_v26  ;;  %v3207_v27 = vmul.f32 %v5845_v63, %v3163_v55  ;;  %v2998_v38 = vpop.f32.mrf.mxu0 }
 0x2c1   :  { %v3077_v20 = vpop.f32.mrf.mxu1 }
 0x2c2   :  { %v3165_v45 = vmax.f32 %v3074_v25, %v3133_v33  ;;  %v3134_v28 = vmul.f32 0.2, %v3076_v57  ;;  %v3078_v9 = vadd.f32 %v3077_v20, %v2965_v2  ;;  %v3243_v1 = vadd.f32 %v3207_v27, %v3206_v30 }
 0x2c3   :  { %v3081_v39 = vpop.f32.mrf.mxu1  ;;  %v3208_v46 = vmul.f32 %v5842_v61, %v3164_v16 }
 0x2c4   :  { %v3166_v23 = vmax.f32 %v3076_v57, %v3134_v28  ;;  %v3135_v35 = vmul.f32 0.2, %v3078_v9  ;;  %v3082_v37 = vadd.f32 %v3081_v39, %v2969_v44  ;;  %3244 = vadd.xlane.f32.xlu1 %v3243_v1  ;;  %v3209_v47 = vmul.f32 %v5845_v63, %v3165_v45 }
 0x2c5   :  { %v3083_v15 = vpop.f32.mrf.mxu1 }
 0x2c6   :  { %v3167_v29 = vmax.f32 %v3078_v9, %v3135_v35  ;;  %v3136_v10 = vmul.f32 0.2, %v3082_v37  ;;  %v3084_v3 = vadd.f32 %v3083_v15, %v2971_v62  ;;  %v3246_v50 = vadd.f32 %v3209_v47, %v3208_v46  ;;  %v3000_v62 = vpop.f32.mrf.mxu0 }
 0x2c7   :  { %v3085_v58 = vpop.f32.mrf.mxu1  ;;  %v3210_v48 = vmul.f32 %v5842_v61, %v3166_v23 }
 0x2c8   :  { %v3168_v12 = vmax.f32 %v3082_v37, %v3136_v10  ;;  %v3137_v43 = vmul.f32 0.2, %v3084_v3  ;;  %v3086_v60 = vadd.f32 %v3085_v58, %v2973_v36  ;;  %3247 = vadd.xlane.f32.xlu0 %v3246_v50  ;;  %v3211_v17 = vmul.f32 %v5845_v63, %v3167_v29  ;;  %v3002_v50 = vpop.f32.mrf.mxu0 }
 0x2c9   :  { %v3087_v6 = vpop.f32.mrf.mxu1  ;;  %v2993_v37 = vadd.f32 %v2992_v18, %v5825_v31  ;;  %v2995_v10 = vadd.f32 %v2994_v59, %v5828_v51 }
 0x2ca   :  { %v3169_v41 = vmax.f32 %v3084_v3, %v3137_v43  ;;  %v3138_v56 = vmul.f32 0.2, %v3086_v60  ;;  %v3088_v13 = vadd.f32 %v3087_v6, %v2975_v32  ;;  %v3249_v53 = vadd.f32 %v3211_v17, %v3210_v48 }
 0x2cb   :  { %v3091_v49 = vpop.f32.mrf.mxu1  ;;  %v3212_v14 = vmul.f32 %v5842_v61, %v3168_v12  ;;  %v2999_v43 = vadd.f32 %v2998_v38, %v5825_v31 }
 0x2cc   :  { %v3170_v8 = vmax.f32 %v3086_v60, %v3138_v56  ;;  %v3139_v0 = vmul.f32 0.2, %v3088_v13  ;;  %v3092_v7 = vadd.f32 %v3091_v49, %v2979_v5  ;;  %3250 = vadd.xlane.f32.xlu1 %v3249_v53  ;;  %v3213_v19 = vmul.f32 %v5845_v63, %v3169_v41  ;;  %v3004_v53 = vpop.f32.mrf.mxu0 }
 0x2cd   :  { %v3093_v54 = vpop.f32.mrf.mxu1  ;;  %v3001_v41 = vadd.f32 %v3000_v62, %v5828_v51 }
 0x2ce   :  { %v3171_v40 = vmax.f32 %v3088_v13, %v3139_v0  ;;  %v3140_v55 = vmul.f32 0.2, %v3092_v7  ;;  %v3094_v22 = vadd.f32 %v3093_v54, %v2981_v11  ;;  %v3252_v25 = vadd.f32 %v3213_v19, %v3212_v14 }
 0x2cf   :  { %v3095_v26 = vpop.f32.mrf.mxu1  ;;  %v3214_v2 = vmul.f32 %v5842_v61, %v3170_v8  ;;  %v3003_v8 = vadd.f32 %v3002_v50, %v5825_v31 }
 0x2d0   :  { %v3172_v30 = vmax.f32 %v3092_v7, %v3140_v55  ;;  %v3141_v16 = vmul.f32 0.2, %v3094_v22  ;;  %v3096_v33 = vadd.f32 %v3095_v26, %v2983_v4  ;;  %3253 = vadd.xlane.f32.xlu0 %v3252_v25  ;;  %v3215_v57 = vmul.f32 %v5845_v63, %v3171_v40 }
 0x2d1   :  { %v3097_v27 = vpop.f32.mrf.mxu1  ;;  %v3005_v40 = vadd.f32 %v3004_v53, %v5828_v51 }
 0x2d2   :  { %v3173_v44 = vmax.f32 %v3094_v22, %v3141_v16  ;;  %v3142_v20 = vmul.f32 0.2, %v3096_v33  ;;  %v3098_v45 = vadd.f32 %v3097_v27, %v2985_v24  ;;  %v3255_v28 = vadd.f32 %v3215_v57, %v3214_v2 }
 0x2d3   :  { %v3101_v9 = vpop.f32.mrf.mxu1  ;;  %v3216_v1 = vmul.f32 %v5842_v61, %v3172_v30 }
 0x2d4   :  { %v3174_v39 = vmax.f32 %v3096_v33, %v3142_v20  ;;  %v3143_v46 = vmul.f32 0.2, %v3098_v45  ;;  %v3102_v23 = vadd.f32 %v3101_v9, %v2989_v21  ;;  %3256 = vadd.xlane.f32.xlu1 %v3255_v28  ;;  %v3217_v35 = vmul.f32 %v5845_v63, %v3173_v44  ;;  %v5937_v9 = vld [vmem:[#allocation2] ss:$0 sm:$0xff] }
 0x2d5   :  { %v3103_v34 = vpop.f32.mrf.mxu1 }
 0x2d6   :  { %v3175_v47 = vmax.f32 %v3098_v45, %v3143_v46  ;;  %v3144_v36 = vmul.f32 0.2, %v3102_v23  ;;  %v3104_v15 = vadd.f32 %v3103_v34, %v2991_v52  ;;  %v3258_v29 = vadd.f32 %v3217_v35, %v3216_v1 }
 0x2d7   :  { %v3105_v42 = vpop.f32.mrf.mxu1  ;;  %v3218_v3 = vmul.f32 %v5842_v61, %v3174_v39 }
 0x2d8   :  { %v3176_v32 = vmax.f32 %v3102_v23, %v3144_v36  ;;  %v3145_v58 = vmul.f32 0.2, %v3104_v15  ;;  %v3106_v48 = vadd.f32 %v3105_v42, %v2993_v37  ;;  %3259 = vadd.xlane.f32.xlu0 %v3258_v29  ;;  %v3219_v12 = vmul.f32 %v5845_v63, %v3175_v47 }
 0x2d9   :  { %v3107_v18 = vpop.f32.mrf.mxu1 }
 0x2da   :  { %v3177_v60 = vmax.f32 %v3104_v15, %v3145_v58  ;;  %v3146_v17 = vmul.f32 0.2, %v3106_v48  ;;  %v3108_v5 = vadd.f32 %v3107_v18, %v2995_v10  ;;  %v3261_v6 = vadd.f32 %v3219_v12, %v3218_v3 }
 0x2db   :  { %v3111_v56 = vpop.f32.mrf.mxu1  ;;  %v3220_v13 = vmul.f32 %v5842_v61, %v3176_v32 }
 0x2dc   :  { %v3178_v11 = vmax.f32 %v3106_v48, %v3146_v17  ;;  %v3147_v49 = vmul.f32 0.2, %v3108_v5  ;;  %v3112_v14 = vadd.f32 %v3111_v56, %v2999_v43  ;;  %3262 = vadd.xlane.f32.xlu1 %v3261_v6  ;;  %v3221_v59 = vmul.f32 %v5845_v63, %v3177_v60 }
 0x2dd   :  { %v3113_v0 = vpop.f32.mrf.mxu1 }
 0x2de   :  { %v3179_v7 = vmax.f32 %v3108_v5, %v3147_v49  ;;  %v3148_v19 = vmul.f32 0.2, %v3112_v14  ;;  %v3114_v4 = vadd.f32 %v3113_v0, %v3001_v41  ;;  %v3264_v54 = vadd.f32 %v3221_v59, %v3220_v13 }
 0x2df   :  { %v3115_v55 = vpop.f32.mrf.mxu1  ;;  %v3222_v22 = vmul.f32 %v5842_v61, %v3178_v11 }
 0x2e0   :  { %v3180_v25 = vmax.f32 %v3112_v14, %v3148_v19  ;;  %v3149_v24 = vmul.f32 0.2, %v3114_v4  ;;  %v3116_v26 = vadd.f32 %v3115_v55, %v3003_v8  ;;  %3265 = vadd.xlane.f32.xlu0 %v3264_v54  ;;  %v3223_v2 = vmul.f32 %v5845_v63, %v3179_v7 }
 0x2e1   :  { %v3117_v38 = vpop.f32.mrf.mxu1 }
 0x2e2   :  { %v3181_v30 = vmax.f32 %v3114_v4, %v3149_v24  ;;  %v3150_v16 = vmul.f32 0.2, %v3116_v26  ;;  %v3118_v31 = vadd.f32 %v3117_v38, %v3005_v40  ;;  %v3267_v33 = vadd.f32 %v3223_v2, %v3222_v22 }
 0x2e3   :  { %v3224_v27 = vmul.f32 %v5842_v61, %v3180_v25 }
 0x2e4   :  { %v3182_v57 = vmax.f32 %v3116_v26, %v3150_v16  ;;  %v3151_v21 = vmul.f32 0.2, %v3118_v31  ;;  %3268 = vadd.xlane.f32.xlu1 %v3267_v33  ;;  %v3225_v51 = vmul.f32 %v5845_v63, %v3181_v30 }
 0x2e6   :  { %v3183_v44 = vmax.f32 %v3118_v31, %v3151_v21  ;;  %v3270_v20 = vadd.f32 %v3225_v51, %v3224_v27  ;;  %v3226_v45 = vmul.f32 %v5842_v61, %v3182_v57 }
 0x2e8   :  { %3271 = vadd.xlane.f32.xlu0 %v3270_v20  ;;  %v3227_v28 = vmul.f32 %v5845_v63, %v3183_v44 }
 0x2ea   :  { %v3273_v52 = vadd.f32 %v3227_v28, %v3226_v45 }
 0x2ec   :  { %3274 = vadd.xlane.f32.xlu1 %v3273_v52 }
 0x339   :  { %v3230_v1 = vpop.xlane.xlu0 %3229 }
 0x33a   :  { %v5940_v62 = vadd.f32 %v5937_v9, %v3230_v1 }
 0x33c   :  { %v3299_v39 = vand.u32 2147483647, %v5940_v62  ;;  %vm3411_vm2 = vcmp.ge.f32.partialorder %v5940_v62, 0.0 }
 0x33d   :  { %v3233_v46 = vpop.xlane.xlu0 %3232 }
 0x33e   :  { %v3315_v23 = vsub.f32 0.0, %v3299_v39  ;;  %v5944_v35 = vadd.f32 %v5937_v9, %v3233_v46 }
 0x340   :  { %v3331_v37 = vmul.f32 1.442695, %v3315_v23  ;;  %v3300_v61 = vand.u32 2147483647, %v5944_v35  ;;  %vm3412_vm3 = vcmp.ge.f32.partialorder %v5944_v35, 0.0 }
 0x341   :  { %v3236_v34 = vpop.xlane.xlu1 %3235 }
 0x342   :  { %4152 = vpow2.f32 %v3331_v37  ;;  %v3316_v63 = vsub.f32 0.0, %v3300_v61  ;;  %v5948_v47 = vadd.f32 %v5937_v9, %v3236_v34 }
 0x344   :  { %v3333_v36 = vmul.f32 1.442695, %v3316_v63  ;;  %v3301_v15 = vand.u32 2147483647, %v5948_v47  ;;  %vm3413_vm4 = vcmp.ge.f32.partialorder %v5948_v47, 0.0 }
 0x345   :  { %v3239_v29 = vpop.xlane.xlu1 %3238 }
 0x346   :  { %4154 = vpow2.f32 %v3333_v36  ;;  %v3317_v10 = vsub.f32 0.0, %v3301_v15  ;;  %v5952_v42 = vadd.f32 %v5937_v9, %v3239_v29 }
 0x348   :  { %v3335_v3 = vmul.f32 1.442695, %v3317_v10  ;;  %v3302_v50 = vand.u32 2147483647, %v5952_v42  ;;  %vm3414_vm5 = vcmp.ge.f32.partialorder %v5952_v42, 0.0 }
 0x349   :  { %v3242_v32 = vpop.xlane.xlu0 %3241 }
 0x34a   :  { %4156 = vpow2.f32 %v3335_v3  ;;  %v3318_v58 = vsub.f32 0.0, %v3302_v50  ;;  %v5956_v48 = vadd.f32 %v5937_v9, %v3242_v32 }
 0x34c   :  { %v3337_v12 = vmul.f32 1.442695, %v3318_v58  ;;  %v3303_v43 = vand.u32 2147483647, %v5956_v48  ;;  %vm3415_vm6 = vcmp.ge.f32.partialorder %v5956_v48, 0.0 }
 0x34d   :  { %v3245_v18 = vpop.xlane.xlu1 %3244 }
 0x34e   :  { %4158 = vpow2.f32 %v3337_v12  ;;  %v3319_v17 = vsub.f32 0.0, %v3303_v43  ;;  %v5960_v5 = vadd.f32 %v5937_v9, %v3245_v18 }
 0x34f   :  { %v4153_v60 = vpop.eup %4152 }
 0x350   :  { %v3363_v6 = vadd.f32 1.0, %v4153_v60  ;;  %v3339_v41 = vmul.f32 1.442695, %v3319_v17  ;;  %v3304_v56 = vand.u32 2147483647, %v5960_v5  ;;  %vm3416_vm7 = vcmp.ge.f32.partialorder %v5960_v5, 0.0 }
 0x351   :  { %v3248_v13 = vpop.xlane.xlu0 %3247 }
 0x352   :  { %4160 = vrcp.f32 %v3363_v6  ;;  %v3320_v11 = vsub.f32 0.0, %v3304_v56  ;;  %v5964_v49 = vadd.f32 %v5937_v9, %v3248_v13 }
 0x353   :  { %v4155_v53 = vpop.eup %4154  ;;  %4162 = vpow2.f32 %v3339_v41 }
 0x354   :  { %v3364_v14 = vadd.f32 1.0, %v4155_v53  ;;  %v3341_v59 = vmul.f32 1.442695, %v3320_v11  ;;  %v3305_v8 = vand.u32 2147483647, %v5964_v49  ;;  %vm3417_vm8 = vcmp.ge.f32.partialorder %v5964_v49, 0.0 }
 0x355   :  { %v3251_v0 = vpop.xlane.xlu1 %3250 }
 0x356   :  { %4164 = vrcp.f32 %v3364_v14  ;;  %v3321_v7 = vsub.f32 0.0, %v3305_v8  ;;  %v5968_v19 = vadd.f32 %v5937_v9, %v3251_v0 }
 0x357   :  { %4166 = vpow2.f32 %v3341_v59  ;;  %v4157_v4 = vpop.eup %4156 }
 0x358   :  { %v3365_v54 = vadd.f32 1.0, %v4157_v4  ;;  %v3343_v40 = vmul.f32 1.442695, %v3321_v7  ;;  %v3306_v55 = vand.u32 2147483647, %v5968_v19  ;;  %vm3418_vm9 = vcmp.ge.f32.partialorder %v5968_v19, 0.0 }
 0x359   :  { %v3254_v22 = vpop.xlane.xlu0 %3253 }
 0x35a   :  { %4168 = vrcp.f32 %v3365_v54  ;;  %v3322_v25 = vsub.f32 0.0, %v3306_v55  ;;  %v5972_v24 = vadd.f32 %v5937_v9, %v3254_v22 }
 0x35b   :  { %v4159_v26 = vpop.eup %4158  ;;  %4170 = vpow2.f32 %v3343_v40 }
 0x35c   :  { %v3366_v2 = vadd.f32 1.0, %v4159_v26  ;;  %v3345_v38 = vmul.f32 1.442695, %v3322_v25  ;;  %v3307_v30 = vand.u32 2147483647, %v5972_v24  ;;  %vm3419_vm10 = vcmp.ge.f32.partialorder %v5972_v24, 0.0 }
 0x35d   :  { %v3257_v16 = vpop.xlane.xlu1 %3256 }
 0x35e   :  { %4172 = vrcp.f32 %v3366_v2  ;;  %v3323_v33 = vsub.f32 0.0, %v3307_v30  ;;  %v5976_v57 = vadd.f32 %v5937_v9, %v3257_v16 }
 0x35f   :  { %v4161_v31 = vpop.eup %4160  ;;  %4174 = vpow2.f32 %v3345_v38 }
 0x360   :  { %v4163_v21 = vpop.eup %4162  ;;  %v3427_v27 = vmul.f32 %v4161_v31, %v4153_v60  ;;  %v3347_v44 = vmul.f32 1.442695, %v3323_v33  ;;  %v3308_v20 = vand.u32 2147483647, %v5976_v57  ;;  %vm3420_vm11 = vcmp.ge.f32.partialorder %v5976_v57, 0.0 }
 0x361   :  { %v3367_v51 = vadd.f32 1.0, %v4163_v21  ;;  %v3260_v28 = vpop.xlane.xlu0 %3259 }
 0x362   :  { %v3443_v45 = vsel %vm3411_vm2, %v4161_v31, %v3427_v27  ;;  %v3324_v1 = vsub.f32 0.0, %v3308_v20  ;;  %v5985_v39 = vadd.f32 %v5937_v9, %v3260_v28 }
 0x363   :  { %v4165_v52 = vpop.eup %4164  ;;  %3460 = vst.msk [vmem:[%s6090_s7] sm:$0xff] %vm3459_vm1, %v3443_v45  ;;  %4176 = vrcp.f32 %v3367_v51 }
 0x364   :  { %v4167_v46 = vpop.eup %4166  ;;  %v3428_v23 = vmul.f32 %v4165_v52, %v4155_v53  ;;  %4178 = vpow2.f32 %v3347_v44  ;;  %v3349_v37 = vmul.f32 1.442695, %v3324_v1  ;;  %v3309_v61 = vand.u32 2147483647, %v5985_v39 }
 0x365   :  { %v3368_v62 = vadd.f32 1.0, %v4167_v46  ;;  %v3263_v34 = vpop.xlane.xlu1 %3262  ;;  %vm3421_vm12 = vcmp.ge.f32.partialorder %v5985_v39, 0.0 }
 0x366   :  { %v3444_v63 = vsel %vm3412_vm3, %v4165_v52, %v3428_v23  ;;  %v3325_v36 = vsub.f32 0.0, %v3309_v61  ;;  %v5994_v15 = vadd.f32 %v5937_v9, %v3263_v34 }
 0x367   :  { %3461 = vst.msk [vmem:[%s6090_s7 + $0x8] sm:$0xff] %vm3459_vm1, %v3444_v63  ;;  %4180 = vrcp.f32 %v3368_v62  ;;  %v4169_v29 = vpop.eup %4168 }
 0x368   :  { %4182 = vpow2.f32 %v3349_v37  ;;  %v4171_v10 = vpop.eup %4170  ;;  %v3429_v35 = vmul.f32 %v4169_v29, %v4157_v4  ;;  %v3351_v3 = vmul.f32 1.442695, %v3325_v36  ;;  %v3310_v50 = vand.u32 2147483647, %v5994_v15 }
 0x369   :  { %v3369_v32 = vadd.f32 1.0, %v4171_v10  ;;  %v3266_v58 = vpop.xlane.xlu0 %3265  ;;  %vm3422_vm13 = vcmp.ge.f32.partialorder %v5994_v15, 0.0 }
 0x36a   :  { %v3445_v12 = vsel %vm3413_vm4, %v4169_v29, %v3429_v35  ;;  %4184 = vpow2.f32 %v3351_v3  ;;  %v3326_v43 = vsub.f32 0.0, %v3310_v50  ;;  %v5999_v18 = vadd.f32 %v5937_v9, %v3266_v58 }
 0x36b   :  { %v4173_v60 = vpop.eup %4172  ;;  %3462 = vst.msk [vmem:[%s6090_s7 + $0x10] sm:$0xff] %vm3459_vm1, %v3445_v12  ;;  %4186 = vrcp.f32 %v3369_v32 }
 0x36c   :  { %v4175_v17 = vpop.eup %4174  ;;  %v3430_v6 = vmul.f32 %v4173_v60, %v4159_v26  ;;  %v3353_v41 = vmul.f32 1.442695, %v3326_v43  ;;  %v3311_v47 = vand.u32 2147483647, %v5999_v18  ;;  %vm3423_vm14 = vcmp.ge.f32.partialorder %v5999_v18, 0.0 }
 0x36d   :  { %v3370_v56 = vadd.f32 1.0, %v4175_v17  ;;  %v3269_v13 = vpop.xlane.xlu1 %3268 }
 0x36e   :  { %v3446_v53 = vsel %vm3414_vm5, %v4173_v60, %v3430_v6  ;;  %4188 = vpow2.f32 %v3353_v41  ;;  %v3327_v11 = vsub.f32 0.0, %v3311_v47  ;;  %v6008_v14 = vadd.f32 %v5937_v9, %v3269_v13 }
 0x36f   :  { %3463 = vst.msk [vmem:[%s6090_s7 + $0x18] sm:$0xff] %vm3459_vm1, %v3446_v53  ;;  %4190 = vrcp.f32 %v3370_v56 }
 0x370   :  { %v4177_v59 = vpop.eup %4176  ;;  %v3355_v7 = vmul.f32 1.442695, %v3327_v11  ;;  %v3312_v42 = vand.u32 2147483647, %v6008_v14  ;;  %vm3424_vm15 = vcmp.ge.f32.partialorder %v6008_v14, 0.0 }
 0x371   :  { %v4179_v8 = vpop.eup %4178  ;;  %v3431_v0 = vmul.f32 %v4177_v59, %v4163_v21  ;;  %v3272_v54 = vpop.xlane.xlu0 %3271 }
 0x372   :  { %v3371_v4 = vadd.f32 1.0, %v4179_v8  ;;  %4192 = vpow2.f32 %v3355_v7  ;;  %v3328_v55 = vsub.f32 0.0, %v3312_v42  ;;  %v6017_v22 = vadd.f32 %v5937_v9, %v3272_v54 }
 0x373   :  { %v3447_v40 = vsel %vm3415_vm6, %v4177_v59, %v3431_v0 }
 0x374   :  { %v4181_v25 = vpop.eup %4180  ;;  %3464 = vst.msk [vmem:[%s6090_s7 + $0x20] sm:$0xff] %vm3459_vm1, %v3447_v40  ;;  %4194 = vrcp.f32 %v3371_v4  ;;  %v3357_v38 = vmul.f32 1.442695, %v3328_v55  ;;  %v3313_v48 = vand.u32 2147483647, %v6017_v22  ;;  %vm3425_vm0 = vcmp.ge.f32.partialorder %v6017_v22, 0.0 }
 0x375   :  { %v4183_v26 = vpop.eup %4182  ;;  %v3432_v2 = vmul.f32 %v4181_v25, %v4167_v46  ;;  %v3275_v16 = vpop.xlane.xlu1 %3274 }
 0x376   :  { %v3372_v30 = vadd.f32 1.0, %v4183_v26  ;;  %4196 = vpow2.f32 %v3357_v38  ;;  %v3329_v33 = vsub.f32 0.0, %v3313_v48  ;;  %v6026_v21 = vadd.f32 %v5937_v9, %v3275_v16 }
 0x377   :  { %v3448_v31 = vsel %vm3416_vm7, %v4181_v25, %v3432_v2  ;;  %v4185_v27 = vpop.eup %4184 }
 0x378   :  { %3465 = vst.msk [vmem:[%s6090_s7 + $0x28] sm:$0xff] %vm3459_vm1, %v3448_v31  ;;  %4198 = vrcp.f32 %v3372_v30  ;;  %v4187_v51 = vpop.eup %4186  ;;  %v3373_v44 = vadd.f32 1.0, %v4185_v27  ;;  %v3359_v20 = vmul.f32 1.442695, %v3329_v33  ;;  %v3314_v5 = vand.u32 2147483647, %v6026_v21 }
 0x379   :  { %v3433_v45 = vmul.f32 %v4187_v51, %v4171_v10  ;;  %vm3426_vm2 = vcmp.ge.f32.partialorder %v6026_v21, 0.0 }
 0x37a   :  { %4200 = vrcp.f32 %v3373_v44  ;;  %v3330_v28 = vsub.f32 0.0, %v3314_v5 }
 0x37b   :  { %v4189_v52 = vpop.eup %4188  ;;  %v3449_v9 = vsel %vm3417_vm8, %v4187_v51, %v3433_v45  ;;  %4202 = vpow2.f32 %v3359_v20 }
 0x37c   :  { %v4191_v1 = vpop.eup %4190  ;;  %3466 = vst.msk [vmem:[%s6090_s7 + $0x30] sm:$0xff] %vm3459_vm1, %v3449_v9  ;;  %v3374_v46 = vadd.f32 1.0, %v4189_v52  ;;  %v3361_v23 = vmul.f32 1.442695, %v3330_v28 }
 0x37d   :  { %v3434_v62 = vmul.f32 %v4191_v1, %v4175_v17 }
 0x37e   :  { %4204 = vrcp.f32 %v3374_v46 }
 0x37f   :  { %v4193_v37 = vpop.eup %4192  ;;  %v3450_v61 = vsel %vm3418_vm9, %v4191_v1, %v3434_v62  ;;  %4206 = vpow2.f32 %v3361_v23 }
 0x380   :  { %3467 = vst.msk [vmem:[%s6090_s7 + $0x38] sm:$0xff] %vm3459_vm1, %v3450_v61  ;;  %v3375_v63 = vadd.f32 1.0, %v4193_v37 }
 0x381   :  { %v4195_v49 = vpop.eup %4194 }
 0x382   :  { %v3435_v34 = vmul.f32 %v4195_v49, %v4179_v8  ;;  %4208 = vrcp.f32 %v3375_v63 }
 0x383   :  { %v4197_v36 = vpop.eup %4196 }
 0x384   :  { %v3451_v29 = vsel %vm3419_vm10, %v4195_v49, %v3435_v34  ;;  %v3376_v19 = vadd.f32 1.0, %v4197_v36 }
 0x385   :  { %v4199_v10 = vpop.eup %4198  ;;  %3468 = vst.msk [vmem:[%s6090_s7 + $0x40] sm:$0xff] %vm3459_vm1, %v3451_v29 }
 0x386   :  { %v3436_v35 = vmul.f32 %v4199_v10, %v4183_v26  ;;  %4210 = vrcp.f32 %v3376_v19 }
 0x387   :  { %v4201_v3 = vpop.eup %4200 }
 0x388   :  { %v3452_v50 = vsel %vm3420_vm11, %v4199_v10, %v3436_v35  ;;  %v4203_v32 = vpop.eup %4202  ;;  %v3437_v24 = vmul.f32 %v4201_v3, %v4185_v27 }
 0x389   :  { %3469 = vst.msk [vmem:[%s6090_s7 + $0x48] sm:$0xff] %vm3459_vm1, %v3452_v50  ;;  %v3377_v58 = vadd.f32 1.0, %v4203_v32 }
 0x38a   :  { %v3453_v12 = vsel %vm3421_vm12, %v4201_v3, %v3437_v24 }
 0x38b   :  { %v4205_v43 = vpop.eup %4204  ;;  %3470 = vst.msk [vmem:[%s6090_s7 + $0x50] sm:$0xff] %vm3459_vm1, %v3453_v12  ;;  %4212 = vrcp.f32 %v3377_v58 }
 0x38c   :  { %v4207_v57 = vpop.eup %4206  ;;  %v3438_v60 = vmul.f32 %v4205_v43, %v4189_v52 }
 0x38d   :  { %v3378_v17 = vadd.f32 1.0, %v4207_v57 }
 0x38e   :  { %v3454_v6 = vsel %vm3422_vm13, %v4205_v43, %v3438_v60 }
 0x38f   :  { %v4209_v41 = vpop.eup %4208  ;;  %3471 = vst.msk [vmem:[%s6090_s7 + $0x58] sm:$0xff] %vm3459_vm1, %v3454_v6  ;;  %4214 = vrcp.f32 %v3378_v17 }
 0x390   :  { %v3439_v39 = vmul.f32 %v4209_v41, %v4193_v37 }
 0x392   :  { %v3455_v47 = vsel %vm3423_vm14, %v4209_v41, %v3439_v39 }
 0x393   :  { %v4211_v56 = vpop.eup %4210  ;;  %3472 = vst.msk [vmem:[%s6090_s7 + $0x60] sm:$0xff] %vm3459_vm1, %v3455_v47 }
 0x394   :  { %v3440_v15 = vmul.f32 %v4211_v56, %v4197_v36 }
 0x396   :  { %v3456_v13 = vsel %vm3424_vm15, %v4211_v56, %v3440_v15 }
 0x397   :  { %3473 = vst.msk [vmem:[%s6090_s7 + $0x68] sm:$0xff] %vm3459_vm1, %v3456_v13 }
 0x398   :  { %v4213_v53 = vpop.eup %4212 }
 0x399   :  { %v3441_v11 = vmul.f32 %v4213_v53, %v4203_v32 }
 0x39b   :  { %v3457_v18 = vsel %vm3425_vm0, %v4213_v53, %v3441_v11 }
 0x39c   :  { %v4215_v59 = vpop.eup %4214  ;;  %3474 = vst.msk [vmem:[%s6090_s7 + $0x70] sm:$0xff] %vm3459_vm1, %v3457_v18 }
 0x39d   :  { %v3442_v8 = vmul.f32 %v4215_v59, %v4207_v57 }
 0x39f   :  { %v3458_v14 = vsel %vm3426_vm2, %v4215_v59, %v3442_v8 }
 0x3a0   :  { %3475 = vst.msk [vmem:[%s6090_s7 + $0x78] sm:$0xff] %vm3459_vm1, %v3458_v14 }
 0x3a1   :  { %3480 = vsyncpa [#allocation4], 1 }

</bundles_post_ra>
